<compile_context>
chip_gen: v7x
topology: tpu7x:2x2x1
jax: 0.10.0
libtpu: 0.0.40
codegen_flags: <defaults>
</compile_context>

<pallas_src>
import jax
import jax.numpy as jnp
from jax.experimental import pallas as pl
from jax.experimental.pallas import tpu as pltpu


# ---------------------------------------------------------------------------
# Plain-JAX ResNet-50 backbone (feature extractor, fc = Identity)
# ---------------------------------------------------------------------------

def conv2d(x, w, stride=1, padding=0):
    return jax.lax.conv_general_dilated(
        x, w,
        window_strides=(stride, stride),
        padding=[(padding, padding), (padding, padding)],
        dimension_numbers=("NCHW", "OIHW", "NCHW"),
    )


def maxpool3x3s2(x):
    return jax.lax.reduce_window(
        x, -jnp.inf, jax.lax.max,
        window_dimensions=(1, 1, 3, 3),
        window_strides=(1, 1, 2, 2),
        padding=((0, 0), (0, 0), (1, 1), (1, 1)),
    )


def make_resnet50_params(key):
    """Deterministic He-init conv weights. BN is eval-identity, so omitted."""
    keys = iter(jax.random.split(key, 64))

    def conv_w(out_c, in_c, k):
        fan_in = in_c * k * k
        return (jax.random.normal(next(keys), (out_c, in_c, k, k), jnp.float32)
                * jnp.sqrt(2.0 / fan_in))

    params = {"conv1": conv_w(64, 3, 7)}

    def make_layer(in_c, width, out_c, n_blocks):
        layer = []
        for i in range(n_blocks):
            ic = in_c if i == 0 else out_c
            blk = {
                "conv1": conv_w(width, ic, 1),
                "conv2": conv_w(width, width, 3),
                "conv3": conv_w(out_c, width, 1),
            }
            if i == 0:
                blk["down"] = conv_w(out_c, ic, 1)
            layer.append(blk)
        return layer

    params["layer1"] = make_layer(64, 64, 256, 3)
    params["layer2"] = make_layer(256, 128, 512, 4)
    params["layer3"] = make_layer(512, 256, 1024, 6)
    params["layer4"] = make_layer(1024, 512, 2048, 3)
    return params


def resnet50_features(params, x):
    """x: (B, 3, H, W) NCHW -> (B, 2048) features (global average pool)."""
    x = conv2d(x, params["conv1"], stride=2, padding=3)
    x = jax.nn.relu(x)           # BN(eval, identity) folded away
    x = maxpool3x3s2(x)
    layer_strides = [1, 2, 2, 2]
    for li, stride in enumerate(layer_strides, start=1):
        for i, blk in enumerate(params[f"layer{li}"]):
            s = stride if i == 0 else 1
            identity = x
            out = jax.nn.relu(conv2d(x, blk["conv1"]))
            out = jax.nn.relu(conv2d(out, blk["conv2"], stride=s, padding=1))
            out = conv2d(out, blk["conv3"])
            if "down" in blk:
                identity = conv2d(x, blk["down"], stride=s)
            x = jax.nn.relu(out + identity)
    return jnp.mean(x, axis=(2, 3))   # adaptive avg pool -> (B, 2048)


# ---------------------------------------------------------------------------
# Head parameter preparation (hoisted out of the per-call path)
# ---------------------------------------------------------------------------

def _round_up(x, m):
    return ((x + m - 1) // m) * m


def prepare_head_params(fusion_w, fusion_b, cls_w, cls_b):
    """Pre-transpose, pad and bf16-cast the head weights ONCE at init.

    fusion_w: (H, 3*D) PyTorch (out, in); cls_w: (C, H) PyTorch (out, in).
    """
    H, _K = fusion_w.shape
    C = cls_w.shape[0]
    Cp = _round_up(max(C, 128), 128)                      # lane-dense classifier out
    w_fusion_t = jnp.transpose(fusion_w).astype(jnp.bfloat16)          # (3*D, H)
    w_cls_t = jnp.zeros((H, Cp), jnp.bfloat16).at[:, :C].set(
        jnp.transpose(cls_w).astype(jnp.bfloat16))                     # (H, Cp)
    return {
        "w_fusion_t": w_fusion_t,                         # bf16, streamed by kernel
        "b_fusion": fusion_b.reshape(1, H).astype(jnp.float32),
        "w_cls_t": w_cls_t,                               # bf16, zero-padded cols
        "b_cls": cls_b.astype(jnp.float32),               # (C,), added in wrapper
    }


# ---------------------------------------------------------------------------
# Pallas kernel: concat + fusion Linear + ReLU + (eval-)Dropout + classifier
# ---------------------------------------------------------------------------

def fusion_head_kernel(f_ref, w_ref, bf_ref, wcls_ref, o_ref, acc_ref):
    n = pl.program_id(1)                     # hidden-tile reduction step (arbitrary)

    @pl.when(n == 0)
    def _():
        acc_ref[...] = jnp.zeros_like(acc_ref)

    # hidden tile: relu( cat(fA,fB,fC) @ Wfusion[:, tile] + b[tile] )
    # (concat realized implicitly: features already concatenated to K=6144)
    h = jnp.dot(f_ref[...], w_ref[...], preferred_element_type=jnp.float32)
    h = jnp.maximum(h + bf_ref[...], 0.0)    # ReLU; Dropout(p=0.1) eval = identity

    # partial classifier logits for this hidden tile, f32 accumulation in VMEM
    acc_ref[...] += jnp.dot(h.astype(wcls_ref.dtype), wcls_ref[...],
                            preferred_element_type=jnp.float32)

    @pl.when(n == pl.num_programs(1) - 1)
    def _():
        o_ref[0] = acc_ref[...]              # single lane-dense store at the end


def fusion_head(features_cat, head, *, tn=512, n_parallel=2):
    """features_cat: (B, 3*2048) f32 concat of backbone features -> (B, C) logits."""
    B, K = features_cat.shape
    H = head["w_fusion_t"].shape[1]          # 2048 fusion hidden dim
    Cp = head["w_cls_t"].shape[1]            # padded classifier width (>=128)
    C = head["b_cls"].shape[0]               # true num_classes

    assert H % (n_parallel * tn) == 0
    nk = H // (n_parallel * tn)              # reduction steps per parallel slice

    # Pad batch to a full sublane group; cast features to bf16 (MXU-native).
    Bp = _round_up(max(B, 8), 8)
    f = jnp.zeros((Bp, K), jnp.bfloat16).at[:B].set(
        features_cat.astype(jnp.bfloat16))

    partials = pl.pallas_call(
        fusion_head_kernel,
        out_shape=jax.ShapeDtypeStruct((n_parallel, Bp, Cp), jnp.float32),
        grid_spec=pltpu.PrefetchScalarGridSpec(
            num_scalar_prefetch=0,
            grid=(n_parallel, nk),
            in_specs=[
                pl.BlockSpec((Bp, K), lambda p, n: (0, 0)),             # features (resident)
                pl.BlockSpec((K, tn), lambda p, n: (0, p * nk + n)),    # fusion W tile (bf16)
                pl.BlockSpec((1, tn), lambda p, n: (0, p * nk + n)),    # fusion bias tile
                pl.BlockSpec((tn, Cp), lambda p, n: (p * nk + n, 0)),   # classifier W tile (bf16)
            ],
            out_specs=pl.BlockSpec((1, Bp, Cp), lambda p, n: (p, 0, 0)),
            scratch_shapes=[pltpu.VMEM((Bp, Cp), jnp.float32)],         # logits accumulator
        ),
        compiler_params=pltpu.CompilerParams(
            dimension_semantics=("parallel", "arbitrary"),
            vmem_limit_bytes=48 << 20,       # ~13 MB actual use; headroom on v7x 64 MiB
        ),
    )(f, head["w_fusion_t"], head["b_fusion"], head["w_cls_t"])

    # Sum partial logits from the parallel K-split, drop padding, add cls bias.
    logits = jnp.sum(partials, axis=0)[:B, :C] + head["b_cls"][None, :]
    return logits


# ---------------------------------------------------------------------------
# Full model forward
# ---------------------------------------------------------------------------

def linear_logit_fusion_forward(params, x):
    fa = resnet50_features(params["block_A"], x)
    fb = resnet50_features(params["block_B"], x)
    fc = resnet50_features(params["block_C"], x)
    cat = jnp.concatenate([fa, fb, fc], axis=1)       # (B, 6144), ~50 KB: negligible
    return fusion_head(cat, params["head"])


def make_model_params(key, num_classes):
    k_a, k_b, k_c, k_fw, k_fb, k_cw, k_cb = jax.random.split(key, 7)
    d_in = 2048 * 3
    # PyTorch nn.Linear weight shape: (out_features, in_features)
    fusion_w = jax.random.normal(k_fw, (2048, d_in), jnp.float32) / jnp.sqrt(d_in)
    fusion_b = jax.random.normal(k_fb, (2048,), jnp.float32) * 0.01
    cls_w = jax.random.normal(k_cw, (num_classes, 2048), jnp.float32) / jnp.sqrt(2048.0)
    cls_b = jax.random.normal(k_cb, (num_classes,), jnp.float32) * 0.01
    params = {
        "block_A": make_resnet50_params(k_a),
        "block_B": make_resnet50_params(k_b),
        "block_C": make_resnet50_params(k_c),
        "head": prepare_head_params(fusion_w, fusion_b, cls_w, cls_b),
    }
    return params


if __name__ == "__main__":
    num_classes = 10
    key = jax.random.PRNGKey(0)
    k_params, k_x = jax.random.split(key)

    params = make_model_params(k_params, num_classes)
    # NCHW image input, 3 channels (ResNet-50 stem expects 3).
    x = jax.random.normal(k_x, (2, 3, 32, 32), jnp.float32)

    fwd = jax.jit(linear_logit_fusion_forward)
    logits = fwd(params, x)
    jax.block_until_ready(logits)

    # Sanity: compare the Pallas fusion head against a pure-JAX reference that
    # uses exactly the same (bf16) head weights and casts as the kernel.
    fa = resnet50_features(params["block_A"], x)
    fb = resnet50_features(params["block_B"], x)
    fc = resnet50_features(params["block_C"], x)
    cat = jnp.concatenate([fa, fb, fc], axis=1)
    head = params["head"]
    cat_b = cat.astype(jnp.bfloat16).astype(jnp.float32)
    hid = jnp.maximum(
        cat_b @ head["w_fusion_t"].astype(jnp.float32) + head["b_fusion"], 0.0)
    hid_b = hid.astype(jnp.bfloat16).astype(jnp.float32)
    ref = (hid_b @ head["w_cls_t"].astype(jnp.float32))[:, :num_classes] \
        + head["b_cls"][None, :]

    assert logits.shape == (2, num_classes)
    rel_err = float(jnp.max(jnp.abs(logits - ref)) / (jnp.max(jnp.abs(ref)) + 1e-6))
    assert rel_err < 1e-2, f"relative error too large: {rel_err}"

    print("KERNEL_OK")
</pallas_src>

<mosaic_0001>
module attributes {stable_mosaic.version = 11 : i64} {
  func.func @fusion_head_kernel(%arg0: i32, %arg1: i32, %arg2: memref<8x6144xbf16, #tpu.memory_space<vmem>>, %arg3: memref<6144x512xbf16, #tpu.memory_space<vmem>>, %arg4: memref<1x512xf32, #tpu.memory_space<vmem>>, %arg5: memref<512x128xbf16, #tpu.memory_space<vmem>>, %arg6: memref<1x8x128xf32, #tpu.memory_space<vmem>>, %arg7: memref<8x128xf32, #tpu.memory_space<vmem>>) attributes {dimension_semantics = [#tpu.dimension_semantics<parallel>, #tpu.dimension_semantics<arbitrary>], iteration_bounds = array<i64: 2, 2>, scalar_prefetch = 0 : i64, scratch_operands = 1 : i64, tpu.core_type = #tpu.core_type<tc>, window_params = [{pipeline_mode = #tpu.pipeline_mode<synchronous>, transform_indices = @transform_0, window_bounds = array<i64: 8, 6144>}, {transform_indices = @transform_1, window_bounds = array<i64: 6144, 512>}, {transform_indices = @transform_2, window_bounds = array<i64: 1, 512>}, {transform_indices = @transform_3, window_bounds = array<i64: 512, 128>}, {transform_indices = @transform_4, window_bounds = array<i64: 1, 8, 128>}]} {
    %c0_i32 = arith.constant 0 : i32
    %0 = arith.cmpi eq, %arg1, %c0_i32 : i32
    %1 = arith.extui %0 : i1 to i32
    %c0_i32_0 = arith.constant 0 : i32
    %2 = arith.cmpi ne, %1, %c0_i32_0 : i32
    scf.if %2 {
      %cst_15 = arith.constant 0.000000e+00 : f32
      %20 = vector.broadcast %cst_15 : f32 to vector<8x128xf32>
      %c0_16 = arith.constant 0 : index
      %c0_17 = arith.constant 0 : index
      %21 = vector.load %arg7[%c0_16, %c0_17] : memref<8x128xf32, #tpu.memory_space<vmem>>, vector<8x128xf32>
      tpu.vector_store %arg7[%c0_16, %c0_17], %20 {strides = array<i32>} : memref<8x128xf32, #tpu.memory_space<vmem>>, vector<8x128xf32>,
    } else {
    }
    %c0 = arith.constant 0 : index
    %c0_1 = arith.constant 0 : index
    %3 = vector.load %arg2[%c0, %c0_1] : memref<8x6144xbf16, #tpu.memory_space<vmem>>, vector<8x6144xbf16>
    %c0_2 = arith.constant 0 : index
    %c0_3 = arith.constant 0 : index
    %4 = vector.load %arg3[%c0_2, %c0_3] : memref<6144x512xbf16, #tpu.memory_space<vmem>>, vector<6144x512xbf16>
    %cst = arith.constant dense<0.000000e+00> : vector<8x512xf32>
    %5 = tpu.matmul %3, %4, %cst {dimension_numbers = #tpu.dot_dimension_numbers<[1], [0], [0], [1], [0, 0, 1, 1], [], []>} : vector<8x6144xbf16>, vector<6144x512xbf16>, vector<8x512xf32> -> vector<8x512xf32>
    %c0_4 = arith.constant 0 : index
    %c0_5 = arith.constant 0 : index
    %6 = vector.load %arg4[%c0_4, %c0_5] : memref<1x512xf32, #tpu.memory_space<vmem>>, vector<1x512xf32>
    %7 = vector.broadcast %6 : vector<1x512xf32> to vector<8x512xf32>
    %8 = arith.addf %5, %7 : vector<8x512xf32>
    %cst_6 = arith.constant 0.000000e+00 : f32
    %9 = vector.broadcast %cst_6 : f32 to vector<8x512xf32>
    %10 = arith.maximumf %8, %9 : vector<8x512xf32>
    %c0_7 = arith.constant 0 : index
    %c0_8 = arith.constant 0 : index
    %11 = vector.load %arg7[%c0_7, %c0_8] : memref<8x128xf32, #tpu.memory_space<vmem>>, vector<8x128xf32>
    %12 = arith.truncf %10 : vector<8x512xf32> to vector<8x512xbf16>
    %c0_9 = arith.constant 0 : index
    %c0_10 = arith.constant 0 : index
    %13 = vector.load %arg5[%c0_9, %c0_10] : memref<512x128xbf16, #tpu.memory_space<vmem>>, vector<512x128xbf16>
    %cst_11 = arith.constant dense<0.000000e+00> : vector<8x128xf32>
    %14 = tpu.matmul %12, %13, %cst_11 {dimension_numbers = #tpu.dot_dimension_numbers<[1], [0], [0], [1], [0, 0, 1, 1], [], []>} : vector<8x512xbf16>, vector<512x128xbf16>, vector<8x128xf32> -> vector<8x128xf32>
    %15 = arith.addf %11, %14 : vector<8x128xf32>
    %c0_12 = arith.constant 0 : index
    %c0_13 = arith.constant 0 : index
    %16 = vector.load %arg7[%c0_12, %c0_13] : memref<8x128xf32, #tpu.memory_space<vmem>>, vector<8x128xf32>
    tpu.vector_store %arg7[%c0_12, %c0_13], %15 {strides = array<i32>} : memref<8x128xf32, #tpu.memory_space<vmem>>, vector<8x128xf32>,
    %c1_i32 = arith.constant 1 : i32
    %17 = arith.cmpi eq, %arg1, %c1_i32 : i32
    %18 = arith.extui %17 : i1 to i32
    %c0_i32_14 = arith.constant 0 : i32
    %19 = arith.cmpi ne, %18, %c0_i32_14 : i32
    scf.if %19 {
      %c0_15 = arith.constant 0 : index
      %c0_16 = arith.constant 0 : index
      %20 = vector.load %arg7[%c0_15, %c0_16] : memref<8x128xf32, #tpu.memory_space<vmem>>, vector<8x128xf32>
      %c0_17 = arith.constant 0 : index
      %c0_18 = arith.constant 0 : index
      %c0_19 = arith.constant 0 : index
      %21 = vector.load %arg6[%c0_17, %c0_18, %c0_19] : memref<1x8x128xf32, #tpu.memory_space<vmem>>, vector<1x8x128xf32>
      %22 = vector.shape_cast %21 : vector<1x8x128xf32> to vector<8x128xf32>
      %23 = vector.shape_cast %20 : vector<8x128xf32> to vector<1x8x128xf32>
      tpu.vector_store %arg6[%c0_17, %c0_18, %c0_19], %23 {strides = array<i32>} : memref<1x8x128xf32, #tpu.memory_space<vmem>>, vector<1x8x128xf32>,
    } else {
    }
    return
  }
  func.func @transform_0(%arg0: i32, %arg1: i32) -> (i32, i32) {
    %c0_i32 = arith.constant 0 : i32
    %c0_i32_0 = arith.constant 0 : i32
    %c0_i32_1 = arith.constant 0 : i32
    return %c0_i32, %c0_i32_0 : i32, i32
  }
  func.func @transform_1(%arg0: i32, %arg1: i32) -> (i32, i32) {
    %c2_i32 = arith.constant 2 : i32
    %0 = arith.muli %arg0, %c2_i32 : i32
    %1 = arith.addi %0, %arg1 : i32
    %c0_i32 = arith.constant 0 : i32
    %c0_i32_0 = arith.constant 0 : i32
    return %c0_i32, %1 : i32, i32
  }
  func.func @transform_2(%arg0: i32, %arg1: i32) -> (i32, i32) {
    %c2_i32 = arith.constant 2 : i32
    %0 = arith.muli %arg0, %c2_i32 : i32
    %1 = arith.addi %0, %arg1 : i32
    %c0_i32 = arith.constant 0 : i32
    %c0_i32_0 = arith.constant 0 : i32
    return %c0_i32, %1 : i32, i32
  }
  func.func @transform_3(%arg0: i32, %arg1: i32) -> (i32, i32) {
    %c2_i32 = arith.constant 2 : i32
    %0 = arith.muli %arg0, %c2_i32 : i32
    %1 = arith.addi %0, %arg1 : i32
    %c0_i32 = arith.constant 0 : i32
    %c0_i32_0 = arith.constant 0 : i32
    return %1, %c0_i32 : i32, i32
  }
  func.func @transform_4(%arg0: i32, %arg1: i32) -> (i32, i32, i32) {
    %c0_i32 = arith.constant 0 : i32
    %c0_i32_0 = arith.constant 0 : i32
    %c0_i32_1 = arith.constant 0 : i32
    return %arg0, %c0_i32, %c0_i32_0 : i32, i32, i32
  }
}

</mosaic_0001>

<bundles_post_ra>
// kernel: reverse
= control target key start
LH: loop header
LB: loop body
LE: loop exit
PB: predicated region body
PF: predicated region fallthrough
CT: control target
= control target key end

     0   :  { %s8325_s0 = inlined_call_operand.vmem [shape: f32[256,256,3,3], index: 0, kind: input, shape index: {}]   ;;  %s8326_s1 = inlined_call_operand.vmem [shape: bf16[256,256,3,3], index: 1, kind: output, shape index: {}]  }
   0x1   :  { %v3744_v0 = vld [vmem:[%s8325_s0 + $0x1000] sm:$0xff]  ;;  %v4935_v9 = vld [vmem:[%s8325_s0 + $0x1010] sm:$0xff]  ;;  %v4031_v15 = vld [vmem:[%s8325_s0 + $0x1008] sm:$0xff] }
   0x2   :  { %v3745_v1 = vld [vmem:[%s8325_s0 + $0xa00] sm:$0xff]  ;;  %v4940_v10 = vld [vmem:[%s8325_s0 + $0xa10] sm:$0xff]  ;;  %v4034_v16 = vld [vmem:[%s8325_s0 + $0xa08] sm:$0xff]  ;;  %v870_v21 = vpack.c.bf16 %v4031_v15, %v3744_v0 }
   0x3   :  { %v3746_v2 = vld [vmem:[%s8325_s0 + $0x400] sm:$0xff]  ;;  %v4945_v11 = vld [vmem:[%s8325_s0 + $0x410] sm:$0xff]  ;;  %v4037_v17 = vld [vmem:[%s8325_s0 + $0x408] sm:$0xff]  ;;  %v878_v22 = vpack.c.bf16 %v4034_v16, %v3745_v1 }
   0x4   :  { %v3747_v3 = vld [vmem:[%s8325_s0 + $0xe00] sm:$0xff]  ;;  %v4950_v12 = vld [vmem:[%s8325_s0 + $0xe10] sm:$0xff]  ;;  %v886_v23 = vpack.c.bf16 %v4037_v17, %v3746_v2  ;;  %v4040_v24 = vld [vmem:[%s8325_s0 + $0xe08] sm:$0xff]  ;;  %4033 = vst [vmem:[%s8326_s1] sm:$0xff] %v870_v21 }
   0x5   :  { %v3748_v4 = vld [vmem:[%s8325_s0 + $0x800] sm:$0xff]  ;;  %v4955_v13 = vld [vmem:[%s8325_s0 + $0x810] sm:$0xff]  ;;  %v4043_v25 = vld [vmem:[%s8325_s0 + $0x808] sm:$0xff]  ;;  %v894_v30 = vpack.c.bf16 %v4040_v24, %v3747_v3  ;;  %4036 = vst [vmem:[%s8326_s1 + $0x300] sm:$0xff] %v878_v22 }
   0x6   :  { %v3749_v5 = vld [vmem:[%s8325_s0 + $0x200] sm:$0xff]  ;;  %v4960_v14 = vld [vmem:[%s8325_s0 + $0x210] sm:$0xff]  ;;  %v4046_v26 = vld [vmem:[%s8325_s0 + $0x208] sm:$0xff]  ;;  %v902_v31 = vpack.c.bf16 %v4043_v25, %v3748_v4  ;;  %4039 = vst [vmem:[%s8326_s1 + $0x600] sm:$0xff] %v886_v23 }
   0x7   :  { %v3750_v6 = vld [vmem:[%s8325_s0 + $0xc00] sm:$0xff]  ;;  %v4974_v18 = vld [vmem:[%s8325_s0 + $0xc10] sm:$0xff]  ;;  %v910_v32 = vpack.c.bf16 %v4046_v26, %v3749_v5  ;;  %v4049_v33 = vld [vmem:[%s8325_s0 + $0xc08] sm:$0xff]  ;;  %4042 = vst [vmem:[%s8326_s1 + $0x100] sm:$0xff] %v894_v30 }
   0x8   :  { %v3751_v7 = vld [vmem:[%s8325_s0 + $0x600] sm:$0xff]  ;;  %v4979_v19 = vld [vmem:[%s8325_s0 + $0x610] sm:$0xff]  ;;  %v4052_v34 = vld [vmem:[%s8325_s0 + $0x608] sm:$0xff]  ;;  %v918_v39 = vpack.c.bf16 %v4049_v33, %v3750_v6  ;;  %4045 = vst [vmem:[%s8326_s1 + $0x400] sm:$0xff] %v902_v31 }
   0x9   :  { %v25_v8 = vld [vmem:[%s8325_s0] sm:$0xff]  ;;  %v4984_v20 = vld [vmem:[%s8325_s0 + $0x10] sm:$0xff]  ;;  %v4055_v35 = vld [vmem:[%s8325_s0 + $0x8] sm:$0xff]  ;;  %v926_v40 = vpack.c.bf16 %v4052_v34, %v3751_v7  ;;  %4048 = vst [vmem:[%s8326_s1 + $0x700] sm:$0xff] %v910_v32 }
   0xa   :  { %v4998_v27 = vld [vmem:[%s8325_s0 + $0x1020] sm:$0xff]  ;;  %v934_v41 = vpack.c.bf16 %v4055_v35, %v25_v8  ;;  %v4058_v42 = vld [vmem:[%s8325_s0 + $0x1018] sm:$0xff]  ;;  %v5091_v54 = vld [vmem:[%s8325_s0 + $0x1030] sm:$0xff]  ;;  %4051 = vst [vmem:[%s8326_s1 + $0x200] sm:$0xff] %v918_v39 }
   0xb   :  { %v5003_v28 = vld [vmem:[%s8325_s0 + $0xa20] sm:$0xff]  ;;  %v4061_v43 = vld [vmem:[%s8325_s0 + $0xa18] sm:$0xff]  ;;  %v942_v48 = vpack.c.bf16 %v4058_v42, %v4935_v9  ;;  %v5096_v55 = vld [vmem:[%s8325_s0 + $0xa30] sm:$0xff]  ;;  %4054 = vst [vmem:[%s8326_s1 + $0x500] sm:$0xff] %v926_v40 }
   0xc   :  { %v5008_v29 = vld [vmem:[%s8325_s0 + $0x420] sm:$0xff]  ;;  %v4064_v44 = vld [vmem:[%s8325_s0 + $0x418] sm:$0xff]  ;;  %v950_v49 = vpack.c.bf16 %v4061_v43, %v4940_v10  ;;  %v5101_v56 = vld [vmem:[%s8325_s0 + $0x430] sm:$0xff]  ;;  %4057 = vst [vmem:[%s8326_s1 + $0x800] sm:$0xff] %v934_v41 }
   0xd   :  { %v5022_v36 = vld [vmem:[%s8325_s0 + $0xe20] sm:$0xff]  ;;  %v958_v50 = vpack.c.bf16 %v4064_v44, %v4945_v11  ;;  %v4067_v51 = vld [vmem:[%s8325_s0 + $0xe18] sm:$0xff]  ;;  %v5127_v63 = vld [vmem:[%s8325_s0 + $0xe30] sm:$0xff]  ;;  %4060 = vst [vmem:[%s8326_s1 + $0x8] sm:$0xff] %v942_v48 }
   0xe   :  { %v5027_v37 = vld [vmem:[%s8325_s0 + $0x820] sm:$0xff]  ;;  %v4070_v52 = vld [vmem:[%s8325_s0 + $0x818] sm:$0xff]  ;;  %v966_v57 = vpack.c.bf16 %v4067_v51, %v4950_v12  ;;  %v5132_v0 = vld [vmem:[%s8325_s0 + $0x830] sm:$0xff]  ;;  %4063 = vst [vmem:[%s8326_s1 + $0x308] sm:$0xff] %v950_v49 }
   0xf   :  { %v5032_v38 = vld [vmem:[%s8325_s0 + $0x220] sm:$0xff]  ;;  %v4073_v53 = vld [vmem:[%s8325_s0 + $0x218] sm:$0xff]  ;;  %v974_v58 = vpack.c.bf16 %v4070_v52, %v4955_v13  ;;  %v5137_v1 = vld [vmem:[%s8325_s0 + $0x230] sm:$0xff]  ;;  %4066 = vst [vmem:[%s8326_s1 + $0x608] sm:$0xff] %v958_v50 }
  0x10   :  { %v5055_v45 = vld [vmem:[%s8325_s0 + $0xc20] sm:$0xff]  ;;  %v982_v59 = vpack.c.bf16 %v4073_v53, %v4960_v14  ;;  %v4076_v60 = vld [vmem:[%s8325_s0 + $0xc18] sm:$0xff]  ;;  %v4085_v5 = vld [vmem:[%s8325_s0 + $0x1028] sm:$0xff]  ;;  %4069 = vst [vmem:[%s8326_s1 + $0x108] sm:$0xff] %v966_v57 }
  0x11   :  { %v5060_v46 = vld [vmem:[%s8325_s0 + $0x620] sm:$0xff]  ;;  %v4079_v61 = vld [vmem:[%s8325_s0 + $0x618] sm:$0xff]  ;;  %v990_v2 = vpack.c.bf16 %v4076_v60, %v4974_v18  ;;  %v4088_v6 = vld [vmem:[%s8325_s0 + $0xa28] sm:$0xff]  ;;  %4072 = vst [vmem:[%s8326_s1 + $0x408] sm:$0xff] %v974_v58  ;;  %v1014_v11 = vpack.c.bf16 %v4085_v5, %v4998_v27 }
  0x12   :  { %v5065_v47 = vld [vmem:[%s8325_s0 + $0x20] sm:$0xff]  ;;  %v4082_v62 = vld [vmem:[%s8325_s0 + $0x18] sm:$0xff]  ;;  %v998_v3 = vpack.c.bf16 %v4079_v61, %v4979_v19  ;;  %v4091_v7 = vld [vmem:[%s8325_s0 + $0x428] sm:$0xff]  ;;  %4075 = vst [vmem:[%s8326_s1 + $0x708] sm:$0xff] %v982_v59  ;;  %v1022_v12 = vpack.c.bf16 %v4088_v6, %v5003_v28 }
  0x13   :  { %v1006_v4 = vpack.c.bf16 %v4082_v62, %v4984_v20  ;;  %v5163_v8 = vld [vmem:[%s8325_s0 + $0xc30] sm:$0xff]  ;;  %v1030_v13 = vpack.c.bf16 %v4091_v7, %v5008_v29  ;;  %v4094_v14 = vld [vmem:[%s8325_s0 + $0xe28] sm:$0xff]  ;;  %v5199_v17 = vld [vmem:[%s8325_s0 + $0x1040] sm:$0xff]  ;;  %4078 = vst [vmem:[%s8326_s1 + $0x208] sm:$0xff] %v990_v2 }
  0x14   :  { %v5168_v9 = vld [vmem:[%s8325_s0 + $0x630] sm:$0xff]  ;;  %v4097_v15 = vld [vmem:[%s8325_s0 + $0x828] sm:$0xff]  ;;  %v5204_v18 = vld [vmem:[%s8325_s0 + $0xa40] sm:$0xff]  ;;  %4081 = vst [vmem:[%s8326_s1 + $0x508] sm:$0xff] %v998_v3  ;;  %v1038_v20 = vpack.c.bf16 %v4094_v14, %v5022_v36 }
  0x15   :  { %v5173_v10 = vld [vmem:[%s8325_s0 + $0x30] sm:$0xff]  ;;  %v4100_v16 = vld [vmem:[%s8325_s0 + $0x228] sm:$0xff]  ;;  %v5209_v19 = vld [vmem:[%s8325_s0 + $0x440] sm:$0xff]  ;;  %4084 = vst [vmem:[%s8326_s1 + $0x808] sm:$0xff] %v1006_v4  ;;  %v1046_v21 = vpack.c.bf16 %v4097_v15, %v5027_v37 }
  0x16   :  { %v1054_v22 = vpack.c.bf16 %v4100_v16, %v5032_v38  ;;  %v4103_v23 = vld [vmem:[%s8325_s0 + $0xc28] sm:$0xff]  ;;  %v5235_v26 = vld [vmem:[%s8325_s0 + $0xe40] sm:$0xff]  ;;  %4087 = vst [vmem:[%s8326_s1 + $0x10] sm:$0xff] %v1014_v11  ;;  %4090 = vst [vmem:[%s8326_s1 + $0x310] sm:$0xff] %v1022_v12 }
  0x17   :  { %v4106_v24 = vld [vmem:[%s8325_s0 + $0x628] sm:$0xff]  ;;  %v5240_v27 = vld [vmem:[%s8325_s0 + $0x840] sm:$0xff]  ;;  %4093 = vst [vmem:[%s8326_s1 + $0x610] sm:$0xff] %v1030_v13  ;;  %v1062_v29 = vpack.c.bf16 %v4103_v23, %v5055_v45  ;;  %v4112_v32 = vld [vmem:[%s8325_s0 + $0x1038] sm:$0xff] }
  0x18   :  { %v4109_v25 = vld [vmem:[%s8325_s0 + $0x28] sm:$0xff]  ;;  %v5245_v28 = vld [vmem:[%s8325_s0 + $0x240] sm:$0xff]  ;;  %v1070_v30 = vpack.c.bf16 %v4106_v24, %v5060_v46  ;;  %v4115_v33 = vld [vmem:[%s8325_s0 + $0xa38] sm:$0xff]  ;;  %4096 = vst [vmem:[%s8326_s1 + $0x110] sm:$0xff] %v1038_v20  ;;  %v1086_v38 = vpack.c.bf16 %v4112_v32, %v5091_v54 }
  0x19   :  { %v1078_v31 = vpack.c.bf16 %v4109_v25, %v5065_v47  ;;  %v4118_v34 = vld [vmem:[%s8325_s0 + $0x438] sm:$0xff]  ;;  %v5271_v35 = vld [vmem:[%s8325_s0 + $0xc40] sm:$0xff]  ;;  %4099 = vst [vmem:[%s8326_s1 + $0x410] sm:$0xff] %v1046_v21  ;;  %4102 = vst [vmem:[%s8326_s1 + $0x710] sm:$0xff] %v1054_v22  ;;  %v1094_v39 = vpack.c.bf16 %v4115_v33, %v5096_v55 }
  0x1a   :  { %v5276_v36 = vld [vmem:[%s8325_s0 + $0x640] sm:$0xff]  ;;  %v1102_v40 = vpack.c.bf16 %v4118_v34, %v5101_v56  ;;  %v4121_v41 = vld [vmem:[%s8325_s0 + $0xe38] sm:$0xff]  ;;  %v5307_v44 = vld [vmem:[%s8325_s0 + $0x1050] sm:$0xff]  ;;  %4105 = vst [vmem:[%s8326_s1 + $0x210] sm:$0xff] %v1062_v29 }
  0x1b   :  { %v5281_v37 = vld [vmem:[%s8325_s0 + $0x40] sm:$0xff]  ;;  %v4124_v42 = vld [vmem:[%s8325_s0 + $0x838] sm:$0xff]  ;;  %v5312_v45 = vld [vmem:[%s8325_s0 + $0xa50] sm:$0xff]  ;;  %4108 = vst [vmem:[%s8326_s1 + $0x510] sm:$0xff] %v1070_v30  ;;  %v1110_v47 = vpack.c.bf16 %v4121_v41, %v5127_v63 }
  0x1c   :  { %v4127_v43 = vld [vmem:[%s8325_s0 + $0x238] sm:$0xff]  ;;  %v5317_v46 = vld [vmem:[%s8325_s0 + $0x450] sm:$0xff]  ;;  %4111 = vst [vmem:[%s8326_s1 + $0x810] sm:$0xff] %v1078_v31  ;;  %v1118_v48 = vpack.c.bf16 %v4124_v42, %v5132_v0  ;;  %4114 = vst [vmem:[%s8326_s1 + $0x18] sm:$0xff] %v1086_v38 }
  0x1d   :  { %v1126_v49 = vpack.c.bf16 %v4127_v43, %v5137_v1  ;;  %v4130_v50 = vld [vmem:[%s8325_s0 + $0xc38] sm:$0xff]  ;;  %v5343_v53 = vld [vmem:[%s8325_s0 + $0xe50] sm:$0xff]  ;;  %4117 = vst [vmem:[%s8326_s1 + $0x318] sm:$0xff] %v1094_v39  ;;  %4120 = vst [vmem:[%s8326_s1 + $0x618] sm:$0xff] %v1102_v40 }
  0x1e   :  { %v4133_v51 = vld [vmem:[%s8325_s0 + $0x638] sm:$0xff]  ;;  %v5348_v54 = vld [vmem:[%s8325_s0 + $0x850] sm:$0xff]  ;;  %v1134_v56 = vpack.c.bf16 %v4130_v50, %v5163_v8  ;;  %v4139_v59 = vld [vmem:[%s8325_s0 + $0x1048] sm:$0xff]  ;;  %4123 = vst [vmem:[%s8326_s1 + $0x118] sm:$0xff] %v1110_v47 }
  0x1f   :  { %v4136_v52 = vld [vmem:[%s8325_s0 + $0x38] sm:$0xff]  ;;  %v5353_v55 = vld [vmem:[%s8325_s0 + $0x250] sm:$0xff]  ;;  %v1142_v57 = vpack.c.bf16 %v4133_v51, %v5168_v9  ;;  %v4142_v60 = vld [vmem:[%s8325_s0 + $0xa48] sm:$0xff]  ;;  %4126 = vst [vmem:[%s8326_s1 + $0x418] sm:$0xff] %v1118_v48  ;;  %v1158_v1 = vpack.c.bf16 %v4139_v59, %v5199_v17 }
  0x20   :  { %v1150_v58 = vpack.c.bf16 %v4136_v52, %v5173_v10  ;;  %v4145_v61 = vld [vmem:[%s8325_s0 + $0x448] sm:$0xff]  ;;  %v5379_v62 = vld [vmem:[%s8325_s0 + $0xc50] sm:$0xff]  ;;  %4129 = vst [vmem:[%s8326_s1 + $0x718] sm:$0xff] %v1126_v49  ;;  %v1166_v2 = vpack.c.bf16 %v4142_v60, %v5204_v18  ;;  %v5415_v7 = vld [vmem:[%s8325_s0 + $0x1060] sm:$0xff] }
  0x21   :  { %v5384_v63 = vld [vmem:[%s8325_s0 + $0x650] sm:$0xff]  ;;  %v1174_v3 = vpack.c.bf16 %v4145_v61, %v5209_v19  ;;  %v4148_v4 = vld [vmem:[%s8325_s0 + $0xe48] sm:$0xff]  ;;  %v5420_v8 = vld [vmem:[%s8325_s0 + $0xa60] sm:$0xff]  ;;  %4132 = vst [vmem:[%s8326_s1 + $0x218] sm:$0xff] %v1134_v56 }
  0x22   :  { %v5389_v0 = vld [vmem:[%s8325_s0 + $0x50] sm:$0xff]  ;;  %v4151_v5 = vld [vmem:[%s8325_s0 + $0x848] sm:$0xff]  ;;  %v5425_v9 = vld [vmem:[%s8325_s0 + $0x460] sm:$0xff]  ;;  %4135 = vst [vmem:[%s8326_s1 + $0x518] sm:$0xff] %v1142_v57  ;;  %v1182_v10 = vpack.c.bf16 %v4148_v4, %v5235_v26 }
  0x23   :  { %v4154_v6 = vld [vmem:[%s8325_s0 + $0x248] sm:$0xff]  ;;  %4138 = vst [vmem:[%s8326_s1 + $0x818] sm:$0xff] %v1150_v58  ;;  %v1190_v11 = vpack.c.bf16 %v4151_v5, %v5240_v27  ;;  %v5451_v16 = vld [vmem:[%s8325_s0 + $0xe60] sm:$0xff]  ;;  %4141 = vst [vmem:[%s8326_s1 + $0x20] sm:$0xff] %v1158_v1 }
  0x24   :  { %v1198_v12 = vpack.c.bf16 %v4154_v6, %v5245_v28  ;;  %v4157_v13 = vld [vmem:[%s8325_s0 + $0xc48] sm:$0xff]  ;;  %v5456_v17 = vld [vmem:[%s8325_s0 + $0x860] sm:$0xff]  ;;  %4144 = vst [vmem:[%s8326_s1 + $0x320] sm:$0xff] %v1166_v2  ;;  %4147 = vst [vmem:[%s8326_s1 + $0x620] sm:$0xff] %v1174_v3 }
  0x25   :  { %v4160_v14 = vld [vmem:[%s8325_s0 + $0x648] sm:$0xff]  ;;  %v5461_v18 = vld [vmem:[%s8325_s0 + $0x260] sm:$0xff]  ;;  %v1206_v19 = vpack.c.bf16 %v4157_v13, %v5271_v35  ;;  %v4166_v22 = vld [vmem:[%s8325_s0 + $0x1058] sm:$0xff]  ;;  %4150 = vst [vmem:[%s8326_s1 + $0x120] sm:$0xff] %v1182_v10 }
  0x26   :  { %v4163_v15 = vld [vmem:[%s8325_s0 + $0x48] sm:$0xff]  ;;  %v1214_v20 = vpack.c.bf16 %v4160_v14, %v5276_v36  ;;  %v4169_v23 = vld [vmem:[%s8325_s0 + $0xa58] sm:$0xff]  ;;  %v5487_v25 = vld [vmem:[%s8325_s0 + $0xc60] sm:$0xff]  ;;  %4153 = vst [vmem:[%s8326_s1 + $0x420] sm:$0xff] %v1190_v11  ;;  %v1230_v28 = vpack.c.bf16 %v4166_v22, %v5307_v44 }
  0x27   :  { %v1222_v21 = vpack.c.bf16 %v4163_v15, %v5281_v37  ;;  %v4172_v24 = vld [vmem:[%s8325_s0 + $0x458] sm:$0xff]  ;;  %v5492_v26 = vld [vmem:[%s8325_s0 + $0x660] sm:$0xff]  ;;  %4156 = vst [vmem:[%s8326_s1 + $0x720] sm:$0xff] %v1198_v12  ;;  %v1238_v29 = vpack.c.bf16 %v4169_v23, %v5312_v45  ;;  %v5523_v34 = vld [vmem:[%s8325_s0 + $0x1070] sm:$0xff] }
  0x28   :  { %v5497_v27 = vld [vmem:[%s8325_s0 + $0x60] sm:$0xff]  ;;  %v1246_v30 = vpack.c.bf16 %v4172_v24, %v5317_v46  ;;  %v4175_v31 = vld [vmem:[%s8325_s0 + $0xe58] sm:$0xff]  ;;  %v5528_v35 = vld [vmem:[%s8325_s0 + $0xa70] sm:$0xff]  ;;  %4159 = vst [vmem:[%s8326_s1 + $0x220] sm:$0xff] %v1206_v19 }
  0x29   :  { %v4178_v32 = vld [vmem:[%s8325_s0 + $0x858] sm:$0xff]  ;;  %v5533_v36 = vld [vmem:[%s8325_s0 + $0x470] sm:$0xff]  ;;  %4162 = vst [vmem:[%s8326_s1 + $0x520] sm:$0xff] %v1214_v20  ;;  %4165 = vst [vmem:[%s8326_s1 + $0x820] sm:$0xff] %v1222_v21  ;;  %v1254_v37 = vpack.c.bf16 %v4175_v31, %v5343_v53 }
  0x2a   :  { %v4181_v33 = vld [vmem:[%s8325_s0 + $0x258] sm:$0xff]  ;;  %v1262_v38 = vpack.c.bf16 %v4178_v32, %v5348_v54  ;;  %v5559_v43 = vld [vmem:[%s8325_s0 + $0xe70] sm:$0xff]  ;;  %4168 = vst [vmem:[%s8326_s1 + $0x28] sm:$0xff] %v1230_v28  ;;  %4171 = vst [vmem:[%s8326_s1 + $0x328] sm:$0xff] %v1238_v29 }
  0x2b   :  { %v1270_v39 = vpack.c.bf16 %v4181_v33, %v5353_v55  ;;  %v4184_v40 = vld [vmem:[%s8325_s0 + $0xc58] sm:$0xff]  ;;  %v5564_v44 = vld [vmem:[%s8325_s0 + $0x870] sm:$0xff]  ;;  %4174 = vst [vmem:[%s8326_s1 + $0x628] sm:$0xff] %v1246_v30  ;;  %v4193_v49 = vld [vmem:[%s8325_s0 + $0x1068] sm:$0xff] }
  0x2c   :  { %v4187_v41 = vld [vmem:[%s8325_s0 + $0x658] sm:$0xff]  ;;  %v5569_v45 = vld [vmem:[%s8325_s0 + $0x270] sm:$0xff]  ;;  %v1278_v46 = vpack.c.bf16 %v4184_v40, %v5379_v62  ;;  %v4196_v50 = vld [vmem:[%s8325_s0 + $0xa68] sm:$0xff]  ;;  %4177 = vst [vmem:[%s8326_s1 + $0x128] sm:$0xff] %v1254_v37  ;;  %v1302_v55 = vpack.c.bf16 %v4193_v49, %v5415_v7 }
  0x2d   :  { %v4190_v42 = vld [vmem:[%s8325_s0 + $0x58] sm:$0xff]  ;;  %v1286_v47 = vpack.c.bf16 %v4187_v41, %v5384_v63  ;;  %v4199_v51 = vld [vmem:[%s8325_s0 + $0x468] sm:$0xff]  ;;  %v5595_v52 = vld [vmem:[%s8325_s0 + $0xc70] sm:$0xff]  ;;  %4180 = vst [vmem:[%s8326_s1 + $0x428] sm:$0xff] %v1262_v38  ;;  %v1310_v56 = vpack.c.bf16 %v4196_v50, %v5420_v8 }
  0x2e   :  { %v1294_v48 = vpack.c.bf16 %v4190_v42, %v5389_v0  ;;  %v5600_v53 = vld [vmem:[%s8325_s0 + $0x670] sm:$0xff]  ;;  %4183 = vst [vmem:[%s8326_s1 + $0x728] sm:$0xff] %v1270_v39  ;;  %v1318_v57 = vpack.c.bf16 %v4199_v51, %v5425_v9  ;;  %v4202_v58 = vld [vmem:[%s8325_s0 + $0xe68] sm:$0xff]  ;;  %v5631_v61 = vld [vmem:[%s8325_s0 + $0x1080] sm:$0xff] }
  0x2f   :  { %v5605_v54 = vld [vmem:[%s8325_s0 + $0x70] sm:$0xff]  ;;  %v4205_v59 = vld [vmem:[%s8325_s0 + $0x868] sm:$0xff]  ;;  %v5636_v62 = vld [vmem:[%s8325_s0 + $0xa80] sm:$0xff]  ;;  %4186 = vst [vmem:[%s8326_s1 + $0x228] sm:$0xff] %v1278_v46  ;;  %v1326_v0 = vpack.c.bf16 %v4202_v58, %v5451_v16 }
  0x30   :  { %v4208_v60 = vld [vmem:[%s8325_s0 + $0x268] sm:$0xff]  ;;  %v5641_v63 = vld [vmem:[%s8325_s0 + $0x480] sm:$0xff]  ;;  %4189 = vst [vmem:[%s8326_s1 + $0x528] sm:$0xff] %v1286_v47  ;;  %4192 = vst [vmem:[%s8326_s1 + $0x828] sm:$0xff] %v1294_v48  ;;  %v1334_v1 = vpack.c.bf16 %v4205_v59, %v5456_v17 }
  0x31   :  { %v1342_v2 = vpack.c.bf16 %v4208_v60, %v5461_v18  ;;  %v4211_v3 = vld [vmem:[%s8325_s0 + $0xc68] sm:$0xff]  ;;  %v5667_v6 = vld [vmem:[%s8325_s0 + $0xe80] sm:$0xff]  ;;  %4195 = vst [vmem:[%s8326_s1 + $0x30] sm:$0xff] %v1302_v55  ;;  %4198 = vst [vmem:[%s8326_s1 + $0x330] sm:$0xff] %v1310_v56 }
  0x32   :  { %v4214_v4 = vld [vmem:[%s8325_s0 + $0x668] sm:$0xff]  ;;  %v5672_v7 = vld [vmem:[%s8325_s0 + $0x880] sm:$0xff]  ;;  %4201 = vst [vmem:[%s8326_s1 + $0x630] sm:$0xff] %v1318_v57  ;;  %v1350_v9 = vpack.c.bf16 %v4211_v3, %v5487_v25  ;;  %v4220_v12 = vld [vmem:[%s8325_s0 + $0x1078] sm:$0xff] }
  0x33   :  { %v4217_v5 = vld [vmem:[%s8325_s0 + $0x68] sm:$0xff]  ;;  %v5677_v8 = vld [vmem:[%s8325_s0 + $0x280] sm:$0xff]  ;;  %v1358_v10 = vpack.c.bf16 %v4214_v4, %v5492_v26  ;;  %v4223_v13 = vld [vmem:[%s8325_s0 + $0xa78] sm:$0xff]  ;;  %4204 = vst [vmem:[%s8326_s1 + $0x130] sm:$0xff] %v1326_v0  ;;  %v1374_v18 = vpack.c.bf16 %v4220_v12, %v5523_v34 }
  0x34   :  { %v1366_v11 = vpack.c.bf16 %v4217_v5, %v5497_v27  ;;  %v4226_v14 = vld [vmem:[%s8325_s0 + $0x478] sm:$0xff]  ;;  %v5703_v15 = vld [vmem:[%s8325_s0 + $0xc80] sm:$0xff]  ;;  %4207 = vst [vmem:[%s8326_s1 + $0x430] sm:$0xff] %v1334_v1  ;;  %4210 = vst [vmem:[%s8326_s1 + $0x730] sm:$0xff] %v1342_v2  ;;  %v1382_v19 = vpack.c.bf16 %v4223_v13, %v5528_v35 }
  0x35   :  { %v5708_v16 = vld [vmem:[%s8325_s0 + $0x680] sm:$0xff]  ;;  %v1390_v20 = vpack.c.bf16 %v4226_v14, %v5533_v36  ;;  %v4229_v21 = vld [vmem:[%s8325_s0 + $0xe78] sm:$0xff]  ;;  %v5739_v24 = vld [vmem:[%s8325_s0 + $0x1090] sm:$0xff]  ;;  %4213 = vst [vmem:[%s8326_s1 + $0x230] sm:$0xff] %v1350_v9 }
  0x36   :  { %v5713_v17 = vld [vmem:[%s8325_s0 + $0x80] sm:$0xff]  ;;  %v4232_v22 = vld [vmem:[%s8325_s0 + $0x878] sm:$0xff]  ;;  %v5744_v25 = vld [vmem:[%s8325_s0 + $0xa90] sm:$0xff]  ;;  %4216 = vst [vmem:[%s8326_s1 + $0x530] sm:$0xff] %v1358_v10  ;;  %v1398_v27 = vpack.c.bf16 %v4229_v21, %v5559_v43 }
  0x37   :  { %v4235_v23 = vld [vmem:[%s8325_s0 + $0x278] sm:$0xff]  ;;  %v5749_v26 = vld [vmem:[%s8325_s0 + $0x490] sm:$0xff]  ;;  %4219 = vst [vmem:[%s8326_s1 + $0x830] sm:$0xff] %v1366_v11  ;;  %v1406_v28 = vpack.c.bf16 %v4232_v22, %v5564_v44  ;;  %4222 = vst [vmem:[%s8326_s1 + $0x38] sm:$0xff] %v1374_v18 }
  0x38   :  { %v1414_v29 = vpack.c.bf16 %v4235_v23, %v5569_v45  ;;  %v4238_v30 = vld [vmem:[%s8325_s0 + $0xc78] sm:$0xff]  ;;  %v5775_v33 = vld [vmem:[%s8325_s0 + $0xe90] sm:$0xff]  ;;  %4225 = vst [vmem:[%s8326_s1 + $0x338] sm:$0xff] %v1382_v19  ;;  %4228 = vst [vmem:[%s8326_s1 + $0x638] sm:$0xff] %v1390_v20 }
  0x39   :  { %v4241_v31 = vld [vmem:[%s8325_s0 + $0x678] sm:$0xff]  ;;  %v5780_v34 = vld [vmem:[%s8325_s0 + $0x890] sm:$0xff]  ;;  %v1422_v36 = vpack.c.bf16 %v4238_v30, %v5595_v52  ;;  %v4247_v39 = vld [vmem:[%s8325_s0 + $0x1088] sm:$0xff]  ;;  %4231 = vst [vmem:[%s8326_s1 + $0x138] sm:$0xff] %v1398_v27 }
  0x3a   :  { %v4244_v32 = vld [vmem:[%s8325_s0 + $0x78] sm:$0xff]  ;;  %v5785_v35 = vld [vmem:[%s8325_s0 + $0x290] sm:$0xff]  ;;  %v1430_v37 = vpack.c.bf16 %v4241_v31, %v5600_v53  ;;  %v4250_v40 = vld [vmem:[%s8325_s0 + $0xa88] sm:$0xff]  ;;  %4234 = vst [vmem:[%s8326_s1 + $0x438] sm:$0xff] %v1406_v28  ;;  %v1446_v45 = vpack.c.bf16 %v4247_v39, %v5631_v61 }
  0x3b   :  { %v1438_v38 = vpack.c.bf16 %v4244_v32, %v5605_v54  ;;  %v4253_v41 = vld [vmem:[%s8325_s0 + $0x488] sm:$0xff]  ;;  %v5811_v42 = vld [vmem:[%s8325_s0 + $0xc90] sm:$0xff]  ;;  %4237 = vst [vmem:[%s8326_s1 + $0x738] sm:$0xff] %v1414_v29  ;;  %v1454_v46 = vpack.c.bf16 %v4250_v40, %v5636_v62  ;;  %v5847_v51 = vld [vmem:[%s8325_s0 + $0x10a0] sm:$0xff] }
  0x3c   :  { %v5816_v43 = vld [vmem:[%s8325_s0 + $0x690] sm:$0xff]  ;;  %v1462_v47 = vpack.c.bf16 %v4253_v41, %v5641_v63  ;;  %v4256_v48 = vld [vmem:[%s8325_s0 + $0xe88] sm:$0xff]  ;;  %v5852_v52 = vld [vmem:[%s8325_s0 + $0xaa0] sm:$0xff]  ;;  %4240 = vst [vmem:[%s8326_s1 + $0x238] sm:$0xff] %v1422_v36 }
  0x3d   :  { %v5821_v44 = vld [vmem:[%s8325_s0 + $0x90] sm:$0xff]  ;;  %v4259_v49 = vld [vmem:[%s8325_s0 + $0x888] sm:$0xff]  ;;  %v5857_v53 = vld [vmem:[%s8325_s0 + $0x4a0] sm:$0xff]  ;;  %4243 = vst [vmem:[%s8326_s1 + $0x538] sm:$0xff] %v1430_v37  ;;  %v1470_v54 = vpack.c.bf16 %v4256_v48, %v5667_v6 }
  0x3e   :  { %v4262_v50 = vld [vmem:[%s8325_s0 + $0x288] sm:$0xff]  ;;  %4246 = vst [vmem:[%s8326_s1 + $0x838] sm:$0xff] %v1438_v38  ;;  %v1478_v55 = vpack.c.bf16 %v4259_v49, %v5672_v7  ;;  %v5883_v60 = vld [vmem:[%s8325_s0 + $0xea0] sm:$0xff]  ;;  %4249 = vst [vmem:[%s8326_s1 + $0x40] sm:$0xff] %v1446_v45 }
  0x3f   :  { %v1486_v56 = vpack.c.bf16 %v4262_v50, %v5677_v8  ;;  %v4265_v57 = vld [vmem:[%s8325_s0 + $0xc88] sm:$0xff]  ;;  %v5888_v61 = vld [vmem:[%s8325_s0 + $0x8a0] sm:$0xff]  ;;  %4252 = vst [vmem:[%s8326_s1 + $0x340] sm:$0xff] %v1454_v46  ;;  %4255 = vst [vmem:[%s8326_s1 + $0x640] sm:$0xff] %v1462_v47 }
  0x40   :  { %v4268_v58 = vld [vmem:[%s8325_s0 + $0x688] sm:$0xff]  ;;  %v5893_v62 = vld [vmem:[%s8325_s0 + $0x2a0] sm:$0xff]  ;;  %v1494_v63 = vpack.c.bf16 %v4265_v57, %v5703_v15  ;;  %v4274_v2 = vld [vmem:[%s8325_s0 + $0x1098] sm:$0xff]  ;;  %4258 = vst [vmem:[%s8326_s1 + $0x140] sm:$0xff] %v1470_v54 }
  0x41   :  { %v4271_v59 = vld [vmem:[%s8325_s0 + $0x88] sm:$0xff]  ;;  %v1502_v0 = vpack.c.bf16 %v4268_v58, %v5708_v16  ;;  %v4277_v3 = vld [vmem:[%s8325_s0 + $0xa98] sm:$0xff]  ;;  %v5919_v5 = vld [vmem:[%s8325_s0 + $0xca0] sm:$0xff]  ;;  %4261 = vst [vmem:[%s8326_s1 + $0x440] sm:$0xff] %v1478_v55  ;;  %v1518_v8 = vpack.c.bf16 %v4274_v2, %v5739_v24 }
  0x42   :  { %v1510_v1 = vpack.c.bf16 %v4271_v59, %v5713_v17  ;;  %v4280_v4 = vld [vmem:[%s8325_s0 + $0x498] sm:$0xff]  ;;  %v5924_v6 = vld [vmem:[%s8325_s0 + $0x6a0] sm:$0xff]  ;;  %4264 = vst [vmem:[%s8326_s1 + $0x740] sm:$0xff] %v1486_v56  ;;  %v1526_v9 = vpack.c.bf16 %v4277_v3, %v5744_v25  ;;  %v5955_v14 = vld [vmem:[%s8325_s0 + $0x10b0] sm:$0xff] }
  0x43   :  { %v5929_v7 = vld [vmem:[%s8325_s0 + $0xa0] sm:$0xff]  ;;  %v1534_v10 = vpack.c.bf16 %v4280_v4, %v5749_v26  ;;  %v4283_v11 = vld [vmem:[%s8325_s0 + $0xe98] sm:$0xff]  ;;  %v5960_v15 = vld [vmem:[%s8325_s0 + $0xab0] sm:$0xff]  ;;  %4267 = vst [vmem:[%s8326_s1 + $0x240] sm:$0xff] %v1494_v63 }
  0x44   :  { %v4286_v12 = vld [vmem:[%s8325_s0 + $0x898] sm:$0xff]  ;;  %v5965_v16 = vld [vmem:[%s8325_s0 + $0x4b0] sm:$0xff]  ;;  %4270 = vst [vmem:[%s8326_s1 + $0x540] sm:$0xff] %v1502_v0  ;;  %4273 = vst [vmem:[%s8326_s1 + $0x840] sm:$0xff] %v1510_v1  ;;  %v1542_v17 = vpack.c.bf16 %v4283_v11, %v5775_v33 }
  0x45   :  { %v4289_v13 = vld [vmem:[%s8325_s0 + $0x298] sm:$0xff]  ;;  %v1550_v18 = vpack.c.bf16 %v4286_v12, %v5780_v34  ;;  %v5991_v23 = vld [vmem:[%s8325_s0 + $0xeb0] sm:$0xff]  ;;  %4276 = vst [vmem:[%s8326_s1 + $0x48] sm:$0xff] %v1518_v8  ;;  %4279 = vst [vmem:[%s8326_s1 + $0x348] sm:$0xff] %v1526_v9 }
  0x46   :  { %v1558_v19 = vpack.c.bf16 %v4289_v13, %v5785_v35  ;;  %v4292_v20 = vld [vmem:[%s8325_s0 + $0xc98] sm:$0xff]  ;;  %v5996_v24 = vld [vmem:[%s8325_s0 + $0x8b0] sm:$0xff]  ;;  %4282 = vst [vmem:[%s8326_s1 + $0x648] sm:$0xff] %v1534_v10  ;;  %v4301_v29 = vld [vmem:[%s8325_s0 + $0x10a8] sm:$0xff] }
  0x47   :  { %v4295_v21 = vld [vmem:[%s8325_s0 + $0x698] sm:$0xff]  ;;  %v6001_v25 = vld [vmem:[%s8325_s0 + $0x2b0] sm:$0xff]  ;;  %v1566_v26 = vpack.c.bf16 %v4292_v20, %v5811_v42  ;;  %v4304_v30 = vld [vmem:[%s8325_s0 + $0xaa8] sm:$0xff]  ;;  %4285 = vst [vmem:[%s8326_s1 + $0x148] sm:$0xff] %v1542_v17  ;;  %v1590_v35 = vpack.c.bf16 %v4301_v29, %v5847_v51 }
  0x48   :  { %v4298_v22 = vld [vmem:[%s8325_s0 + $0x98] sm:$0xff]  ;;  %v1574_v27 = vpack.c.bf16 %v4295_v21, %v5816_v43  ;;  %v4307_v31 = vld [vmem:[%s8325_s0 + $0x4a8] sm:$0xff]  ;;  %v6027_v32 = vld [vmem:[%s8325_s0 + $0xcb0] sm:$0xff]  ;;  %4288 = vst [vmem:[%s8326_s1 + $0x448] sm:$0xff] %v1550_v18  ;;  %v1598_v36 = vpack.c.bf16 %v4304_v30, %v5852_v52 }
  0x49   :  { %v1582_v28 = vpack.c.bf16 %v4298_v22, %v5821_v44  ;;  %v6032_v33 = vld [vmem:[%s8325_s0 + $0x6b0] sm:$0xff]  ;;  %4291 = vst [vmem:[%s8326_s1 + $0x748] sm:$0xff] %v1558_v19  ;;  %v1606_v37 = vpack.c.bf16 %v4307_v31, %v5857_v53  ;;  %v4310_v38 = vld [vmem:[%s8325_s0 + $0xea8] sm:$0xff]  ;;  %v6063_v41 = vld [vmem:[%s8325_s0 + $0x10c0] sm:$0xff] }
  0x4a   :  { %v6037_v34 = vld [vmem:[%s8325_s0 + $0xb0] sm:$0xff]  ;;  %v4313_v39 = vld [vmem:[%s8325_s0 + $0x8a8] sm:$0xff]  ;;  %v6068_v42 = vld [vmem:[%s8325_s0 + $0xac0] sm:$0xff]  ;;  %4294 = vst [vmem:[%s8326_s1 + $0x248] sm:$0xff] %v1566_v26  ;;  %v1614_v44 = vpack.c.bf16 %v4310_v38, %v5883_v60 }
  0x4b   :  { %v4316_v40 = vld [vmem:[%s8325_s0 + $0x2a8] sm:$0xff]  ;;  %v6073_v43 = vld [vmem:[%s8325_s0 + $0x4c0] sm:$0xff]  ;;  %4297 = vst [vmem:[%s8326_s1 + $0x548] sm:$0xff] %v1574_v27  ;;  %4300 = vst [vmem:[%s8326_s1 + $0x848] sm:$0xff] %v1582_v28  ;;  %v1622_v45 = vpack.c.bf16 %v4313_v39, %v5888_v61 }
  0x4c   :  { %v1630_v46 = vpack.c.bf16 %v4316_v40, %v5893_v62  ;;  %v4319_v47 = vld [vmem:[%s8325_s0 + $0xca8] sm:$0xff]  ;;  %v6099_v50 = vld [vmem:[%s8325_s0 + $0xec0] sm:$0xff]  ;;  %4303 = vst [vmem:[%s8326_s1 + $0x50] sm:$0xff] %v1590_v35  ;;  %4306 = vst [vmem:[%s8326_s1 + $0x350] sm:$0xff] %v1598_v36 }
  0x4d   :  { %v4322_v48 = vld [vmem:[%s8325_s0 + $0x6a8] sm:$0xff]  ;;  %v6104_v51 = vld [vmem:[%s8325_s0 + $0x8c0] sm:$0xff]  ;;  %4309 = vst [vmem:[%s8326_s1 + $0x650] sm:$0xff] %v1606_v37  ;;  %v1638_v53 = vpack.c.bf16 %v4319_v47, %v5919_v5  ;;  %v4328_v56 = vld [vmem:[%s8325_s0 + $0x10b8] sm:$0xff] }
  0x4e   :  { %v4325_v49 = vld [vmem:[%s8325_s0 + $0xa8] sm:$0xff]  ;;  %v6109_v52 = vld [vmem:[%s8325_s0 + $0x2c0] sm:$0xff]  ;;  %v1646_v54 = vpack.c.bf16 %v4322_v48, %v5924_v6  ;;  %v4331_v57 = vld [vmem:[%s8325_s0 + $0xab8] sm:$0xff]  ;;  %4312 = vst [vmem:[%s8326_s1 + $0x150] sm:$0xff] %v1614_v44  ;;  %v1662_v62 = vpack.c.bf16 %v4328_v56, %v5955_v14 }
  0x4f   :  { %v1654_v55 = vpack.c.bf16 %v4325_v49, %v5929_v7  ;;  %v4334_v58 = vld [vmem:[%s8325_s0 + $0x4b8] sm:$0xff]  ;;  %v6135_v59 = vld [vmem:[%s8325_s0 + $0xcc0] sm:$0xff]  ;;  %4315 = vst [vmem:[%s8326_s1 + $0x450] sm:$0xff] %v1622_v45  ;;  %4318 = vst [vmem:[%s8326_s1 + $0x750] sm:$0xff] %v1630_v46  ;;  %v1670_v63 = vpack.c.bf16 %v4331_v57, %v5960_v15 }
  0x50   :  { %v6140_v60 = vld [vmem:[%s8325_s0 + $0x6c0] sm:$0xff]  ;;  %v1678_v0 = vpack.c.bf16 %v4334_v58, %v5965_v16  ;;  %v4337_v1 = vld [vmem:[%s8325_s0 + $0xeb8] sm:$0xff]  ;;  %v6171_v4 = vld [vmem:[%s8325_s0 + $0x10d0] sm:$0xff]  ;;  %4321 = vst [vmem:[%s8326_s1 + $0x250] sm:$0xff] %v1638_v53 }
  0x51   :  { %v6145_v61 = vld [vmem:[%s8325_s0 + $0xc0] sm:$0xff]  ;;  %v4340_v2 = vld [vmem:[%s8325_s0 + $0x8b8] sm:$0xff]  ;;  %v6176_v5 = vld [vmem:[%s8325_s0 + $0xad0] sm:$0xff]  ;;  %4324 = vst [vmem:[%s8326_s1 + $0x550] sm:$0xff] %v1646_v54  ;;  %v1686_v7 = vpack.c.bf16 %v4337_v1, %v5991_v23 }
  0x52   :  { %v4343_v3 = vld [vmem:[%s8325_s0 + $0x2b8] sm:$0xff]  ;;  %v6181_v6 = vld [vmem:[%s8325_s0 + $0x4d0] sm:$0xff]  ;;  %4327 = vst [vmem:[%s8326_s1 + $0x850] sm:$0xff] %v1654_v55  ;;  %v1694_v8 = vpack.c.bf16 %v4340_v2, %v5996_v24  ;;  %4330 = vst [vmem:[%s8326_s1 + $0x58] sm:$0xff] %v1662_v62 }
  0x53   :  { %v1702_v9 = vpack.c.bf16 %v4343_v3, %v6001_v25  ;;  %v4346_v10 = vld [vmem:[%s8325_s0 + $0xcb8] sm:$0xff]  ;;  %v6207_v13 = vld [vmem:[%s8325_s0 + $0xed0] sm:$0xff]  ;;  %4333 = vst [vmem:[%s8326_s1 + $0x358] sm:$0xff] %v1670_v63  ;;  %4336 = vst [vmem:[%s8326_s1 + $0x658] sm:$0xff] %v1678_v0 }
  0x54   :  { %v4349_v11 = vld [vmem:[%s8325_s0 + $0x6b8] sm:$0xff]  ;;  %v6212_v14 = vld [vmem:[%s8325_s0 + $0x8d0] sm:$0xff]  ;;  %v1710_v16 = vpack.c.bf16 %v4346_v10, %v6027_v32  ;;  %v4355_v19 = vld [vmem:[%s8325_s0 + $0x10c8] sm:$0xff]  ;;  %4339 = vst [vmem:[%s8326_s1 + $0x158] sm:$0xff] %v1686_v7 }
  0x55   :  { %v4352_v12 = vld [vmem:[%s8325_s0 + $0xb8] sm:$0xff]  ;;  %v6217_v15 = vld [vmem:[%s8325_s0 + $0x2d0] sm:$0xff]  ;;  %v1718_v17 = vpack.c.bf16 %v4349_v11, %v6032_v33  ;;  %v4358_v20 = vld [vmem:[%s8325_s0 + $0xac8] sm:$0xff]  ;;  %4342 = vst [vmem:[%s8326_s1 + $0x458] sm:$0xff] %v1694_v8  ;;  %v1734_v25 = vpack.c.bf16 %v4355_v19, %v6063_v41 }
  0x56   :  { %v1726_v18 = vpack.c.bf16 %v4352_v12, %v6037_v34  ;;  %v4361_v21 = vld [vmem:[%s8325_s0 + $0x4c8] sm:$0xff]  ;;  %v6243_v22 = vld [vmem:[%s8325_s0 + $0xcd0] sm:$0xff]  ;;  %4345 = vst [vmem:[%s8326_s1 + $0x758] sm:$0xff] %v1702_v9  ;;  %v1742_v26 = vpack.c.bf16 %v4358_v20, %v6068_v42  ;;  %v6279_v31 = vld [vmem:[%s8325_s0 + $0x10e0] sm:$0xff] }
  0x57   :  { %v6248_v23 = vld [vmem:[%s8325_s0 + $0x6d0] sm:$0xff]  ;;  %v1750_v27 = vpack.c.bf16 %v4361_v21, %v6073_v43  ;;  %v4364_v28 = vld [vmem:[%s8325_s0 + $0xec8] sm:$0xff]  ;;  %v6284_v32 = vld [vmem:[%s8325_s0 + $0xae0] sm:$0xff]  ;;  %4348 = vst [vmem:[%s8326_s1 + $0x258] sm:$0xff] %v1710_v16 }
  0x58   :  { %v6253_v24 = vld [vmem:[%s8325_s0 + $0xd0] sm:$0xff]  ;;  %v4367_v29 = vld [vmem:[%s8325_s0 + $0x8c8] sm:$0xff]  ;;  %v6289_v33 = vld [vmem:[%s8325_s0 + $0x4e0] sm:$0xff]  ;;  %4351 = vst [vmem:[%s8326_s1 + $0x558] sm:$0xff] %v1718_v17  ;;  %v1758_v34 = vpack.c.bf16 %v4364_v28, %v6099_v50 }
  0x59   :  { %v4370_v30 = vld [vmem:[%s8325_s0 + $0x2c8] sm:$0xff]  ;;  %4354 = vst [vmem:[%s8326_s1 + $0x858] sm:$0xff] %v1726_v18  ;;  %v1766_v35 = vpack.c.bf16 %v4367_v29, %v6104_v51  ;;  %v6315_v40 = vld [vmem:[%s8325_s0 + $0xee0] sm:$0xff]  ;;  %4357 = vst [vmem:[%s8326_s1 + $0x60] sm:$0xff] %v1734_v25 }
  0x5a   :  { %v1774_v36 = vpack.c.bf16 %v4370_v30, %v6109_v52  ;;  %v4373_v37 = vld [vmem:[%s8325_s0 + $0xcc8] sm:$0xff]  ;;  %v6320_v41 = vld [vmem:[%s8325_s0 + $0x8e0] sm:$0xff]  ;;  %4360 = vst [vmem:[%s8326_s1 + $0x360] sm:$0xff] %v1742_v26  ;;  %4363 = vst [vmem:[%s8326_s1 + $0x660] sm:$0xff] %v1750_v27 }
  0x5b   :  { %v4376_v38 = vld [vmem:[%s8325_s0 + $0x6c8] sm:$0xff]  ;;  %v6325_v42 = vld [vmem:[%s8325_s0 + $0x2e0] sm:$0xff]  ;;  %v1782_v43 = vpack.c.bf16 %v4373_v37, %v6135_v59  ;;  %v4382_v46 = vld [vmem:[%s8325_s0 + $0x10d8] sm:$0xff]  ;;  %4366 = vst [vmem:[%s8326_s1 + $0x160] sm:$0xff] %v1758_v34 }
  0x5c   :  { %v4379_v39 = vld [vmem:[%s8325_s0 + $0xc8] sm:$0xff]  ;;  %v1790_v44 = vpack.c.bf16 %v4376_v38, %v6140_v60  ;;  %v4385_v47 = vld [vmem:[%s8325_s0 + $0xad8] sm:$0xff]  ;;  %v6351_v49 = vld [vmem:[%s8325_s0 + $0xce0] sm:$0xff]  ;;  %4369 = vst [vmem:[%s8326_s1 + $0x460] sm:$0xff] %v1766_v35  ;;  %v1806_v52 = vpack.c.bf16 %v4382_v46, %v6171_v4 }
  0x5d   :  { %v1798_v45 = vpack.c.bf16 %v4379_v39, %v6145_v61  ;;  %v4388_v48 = vld [vmem:[%s8325_s0 + $0x4d8] sm:$0xff]  ;;  %v6356_v50 = vld [vmem:[%s8325_s0 + $0x6e0] sm:$0xff]  ;;  %4372 = vst [vmem:[%s8326_s1 + $0x760] sm:$0xff] %v1774_v36  ;;  %v1814_v53 = vpack.c.bf16 %v4385_v47, %v6176_v5  ;;  %v6387_v58 = vld [vmem:[%s8325_s0 + $0x10f0] sm:$0xff] }
  0x5e   :  { %v6361_v51 = vld [vmem:[%s8325_s0 + $0xe0] sm:$0xff]  ;;  %v1822_v54 = vpack.c.bf16 %v4388_v48, %v6181_v6  ;;  %v4391_v55 = vld [vmem:[%s8325_s0 + $0xed8] sm:$0xff]  ;;  %v6392_v59 = vld [vmem:[%s8325_s0 + $0xaf0] sm:$0xff]  ;;  %4375 = vst [vmem:[%s8326_s1 + $0x260] sm:$0xff] %v1782_v43 }
  0x5f   :  { %v4394_v56 = vld [vmem:[%s8325_s0 + $0x8d8] sm:$0xff]  ;;  %v6397_v60 = vld [vmem:[%s8325_s0 + $0x4f0] sm:$0xff]  ;;  %4378 = vst [vmem:[%s8326_s1 + $0x560] sm:$0xff] %v1790_v44  ;;  %4381 = vst [vmem:[%s8326_s1 + $0x860] sm:$0xff] %v1798_v45  ;;  %v1830_v61 = vpack.c.bf16 %v4391_v55, %v6207_v13 }
  0x60   :  { %v4397_v57 = vld [vmem:[%s8325_s0 + $0x2d8] sm:$0xff]  ;;  %v1838_v62 = vpack.c.bf16 %v4394_v56, %v6212_v14  ;;  %v6423_v3 = vld [vmem:[%s8325_s0 + $0xef0] sm:$0xff]  ;;  %4384 = vst [vmem:[%s8326_s1 + $0x68] sm:$0xff] %v1806_v52  ;;  %4387 = vst [vmem:[%s8326_s1 + $0x368] sm:$0xff] %v1814_v53 }
  0x61   :  { %v1846_v63 = vpack.c.bf16 %v4397_v57, %v6217_v15  ;;  %v4400_v0 = vld [vmem:[%s8325_s0 + $0xcd8] sm:$0xff]  ;;  %v6428_v4 = vld [vmem:[%s8325_s0 + $0x8f0] sm:$0xff]  ;;  %4390 = vst [vmem:[%s8326_s1 + $0x668] sm:$0xff] %v1822_v54  ;;  %v4409_v9 = vld [vmem:[%s8325_s0 + $0x10e8] sm:$0xff] }
  0x62   :  { %v4403_v1 = vld [vmem:[%s8325_s0 + $0x6d8] sm:$0xff]  ;;  %v6433_v5 = vld [vmem:[%s8325_s0 + $0x2f0] sm:$0xff]  ;;  %v1854_v6 = vpack.c.bf16 %v4400_v0, %v6243_v22  ;;  %v4412_v10 = vld [vmem:[%s8325_s0 + $0xae8] sm:$0xff]  ;;  %4393 = vst [vmem:[%s8326_s1 + $0x168] sm:$0xff] %v1830_v61  ;;  %v1878_v15 = vpack.c.bf16 %v4409_v9, %v6279_v31 }
  0x63   :  { %v4406_v2 = vld [vmem:[%s8325_s0 + $0xd8] sm:$0xff]  ;;  %v1862_v7 = vpack.c.bf16 %v4403_v1, %v6248_v23  ;;  %v4415_v11 = vld [vmem:[%s8325_s0 + $0x4e8] sm:$0xff]  ;;  %v6459_v12 = vld [vmem:[%s8325_s0 + $0xcf0] sm:$0xff]  ;;  %4396 = vst [vmem:[%s8326_s1 + $0x468] sm:$0xff] %v1838_v62  ;;  %v1886_v16 = vpack.c.bf16 %v4412_v10, %v6284_v32 }
  0x64   :  { %v1870_v8 = vpack.c.bf16 %v4406_v2, %v6253_v24  ;;  %v6464_v13 = vld [vmem:[%s8325_s0 + $0x6f0] sm:$0xff]  ;;  %4399 = vst [vmem:[%s8326_s1 + $0x768] sm:$0xff] %v1846_v63  ;;  %v1894_v17 = vpack.c.bf16 %v4415_v11, %v6289_v33  ;;  %v4418_v18 = vld [vmem:[%s8325_s0 + $0xee8] sm:$0xff]  ;;  %v6495_v21 = vld [vmem:[%s8325_s0 + $0x1100] sm:$0xff] }
  0x65   :  { %v6469_v14 = vld [vmem:[%s8325_s0 + $0xf0] sm:$0xff]  ;;  %v4421_v19 = vld [vmem:[%s8325_s0 + $0x8e8] sm:$0xff]  ;;  %v6500_v22 = vld [vmem:[%s8325_s0 + $0xb00] sm:$0xff]  ;;  %4402 = vst [vmem:[%s8326_s1 + $0x268] sm:$0xff] %v1854_v6  ;;  %v1902_v24 = vpack.c.bf16 %v4418_v18, %v6315_v40 }
  0x66   :  { %v4424_v20 = vld [vmem:[%s8325_s0 + $0x2e8] sm:$0xff]  ;;  %v6505_v23 = vld [vmem:[%s8325_s0 + $0x500] sm:$0xff]  ;;  %4405 = vst [vmem:[%s8326_s1 + $0x568] sm:$0xff] %v1862_v7  ;;  %4408 = vst [vmem:[%s8326_s1 + $0x868] sm:$0xff] %v1870_v8  ;;  %v1910_v25 = vpack.c.bf16 %v4421_v19, %v6320_v41 }
  0x67   :  { %v1918_v26 = vpack.c.bf16 %v4424_v20, %v6325_v42  ;;  %v4427_v27 = vld [vmem:[%s8325_s0 + $0xce8] sm:$0xff]  ;;  %v6531_v30 = vld [vmem:[%s8325_s0 + $0xf00] sm:$0xff]  ;;  %4411 = vst [vmem:[%s8326_s1 + $0x70] sm:$0xff] %v1878_v15  ;;  %4414 = vst [vmem:[%s8326_s1 + $0x370] sm:$0xff] %v1886_v16 }
  0x68   :  { %v4430_v28 = vld [vmem:[%s8325_s0 + $0x6e8] sm:$0xff]  ;;  %v6536_v31 = vld [vmem:[%s8325_s0 + $0x900] sm:$0xff]  ;;  %4417 = vst [vmem:[%s8326_s1 + $0x670] sm:$0xff] %v1894_v17  ;;  %v1926_v33 = vpack.c.bf16 %v4427_v27, %v6351_v49  ;;  %v4436_v36 = vld [vmem:[%s8325_s0 + $0x10f8] sm:$0xff] }
  0x69   :  { %v4433_v29 = vld [vmem:[%s8325_s0 + $0xe8] sm:$0xff]  ;;  %v6541_v32 = vld [vmem:[%s8325_s0 + $0x300] sm:$0xff]  ;;  %v1934_v34 = vpack.c.bf16 %v4430_v28, %v6356_v50  ;;  %v4439_v37 = vld [vmem:[%s8325_s0 + $0xaf8] sm:$0xff]  ;;  %4420 = vst [vmem:[%s8326_s1 + $0x170] sm:$0xff] %v1902_v24  ;;  %v1950_v42 = vpack.c.bf16 %v4436_v36, %v6387_v58 }
  0x6a   :  { %v1942_v35 = vpack.c.bf16 %v4433_v29, %v6361_v51  ;;  %v4442_v38 = vld [vmem:[%s8325_s0 + $0x4f8] sm:$0xff]  ;;  %v6567_v39 = vld [vmem:[%s8325_s0 + $0xd00] sm:$0xff]  ;;  %4423 = vst [vmem:[%s8326_s1 + $0x470] sm:$0xff] %v1910_v25  ;;  %4426 = vst [vmem:[%s8326_s1 + $0x770] sm:$0xff] %v1918_v26  ;;  %v1958_v43 = vpack.c.bf16 %v4439_v37, %v6392_v59 }
  0x6b   :  { %v6572_v40 = vld [vmem:[%s8325_s0 + $0x700] sm:$0xff]  ;;  %v1966_v44 = vpack.c.bf16 %v4442_v38, %v6397_v60  ;;  %v4445_v45 = vld [vmem:[%s8325_s0 + $0xef8] sm:$0xff]  ;;  %v6603_v48 = vld [vmem:[%s8325_s0 + $0x1110] sm:$0xff]  ;;  %4429 = vst [vmem:[%s8326_s1 + $0x270] sm:$0xff] %v1926_v33 }
  0x6c   :  { %v6577_v41 = vld [vmem:[%s8325_s0 + $0x100] sm:$0xff]  ;;  %v4448_v46 = vld [vmem:[%s8325_s0 + $0x8f8] sm:$0xff]  ;;  %v6608_v49 = vld [vmem:[%s8325_s0 + $0xb10] sm:$0xff]  ;;  %4432 = vst [vmem:[%s8326_s1 + $0x570] sm:$0xff] %v1934_v34  ;;  %v1974_v51 = vpack.c.bf16 %v4445_v45, %v6423_v3 }
  0x6d   :  { %v4451_v47 = vld [vmem:[%s8325_s0 + $0x2f8] sm:$0xff]  ;;  %v6613_v50 = vld [vmem:[%s8325_s0 + $0x510] sm:$0xff]  ;;  %4435 = vst [vmem:[%s8326_s1 + $0x870] sm:$0xff] %v1942_v35  ;;  %v1982_v52 = vpack.c.bf16 %v4448_v46, %v6428_v4  ;;  %4438 = vst [vmem:[%s8326_s1 + $0x78] sm:$0xff] %v1950_v42 }
  0x6e   :  { %v1990_v53 = vpack.c.bf16 %v4451_v47, %v6433_v5  ;;  %v4454_v54 = vld [vmem:[%s8325_s0 + $0xcf8] sm:$0xff]  ;;  %v6639_v57 = vld [vmem:[%s8325_s0 + $0xf10] sm:$0xff]  ;;  %4441 = vst [vmem:[%s8326_s1 + $0x378] sm:$0xff] %v1958_v43  ;;  %4444 = vst [vmem:[%s8326_s1 + $0x678] sm:$0xff] %v1966_v44 }
  0x6f   :  { %v4457_v55 = vld [vmem:[%s8325_s0 + $0x6f8] sm:$0xff]  ;;  %v6644_v58 = vld [vmem:[%s8325_s0 + $0x910] sm:$0xff]  ;;  %v1998_v60 = vpack.c.bf16 %v4454_v54, %v6459_v12  ;;  %v4463_v63 = vld [vmem:[%s8325_s0 + $0x1108] sm:$0xff]  ;;  %4447 = vst [vmem:[%s8326_s1 + $0x178] sm:$0xff] %v1974_v51 }
  0x70   :  { %v4460_v56 = vld [vmem:[%s8325_s0 + $0xf8] sm:$0xff]  ;;  %v6649_v59 = vld [vmem:[%s8325_s0 + $0x310] sm:$0xff]  ;;  %v2006_v61 = vpack.c.bf16 %v4457_v55, %v6464_v13  ;;  %v4466_v0 = vld [vmem:[%s8325_s0 + $0xb08] sm:$0xff]  ;;  %4450 = vst [vmem:[%s8326_s1 + $0x478] sm:$0xff] %v1982_v52  ;;  %v2022_v5 = vpack.c.bf16 %v4463_v63, %v6495_v21 }
  0x71   :  { %v2014_v62 = vpack.c.bf16 %v4460_v56, %v6469_v14  ;;  %v4469_v1 = vld [vmem:[%s8325_s0 + $0x508] sm:$0xff]  ;;  %v6675_v2 = vld [vmem:[%s8325_s0 + $0xd10] sm:$0xff]  ;;  %4453 = vst [vmem:[%s8326_s1 + $0x778] sm:$0xff] %v1990_v53  ;;  %v2030_v6 = vpack.c.bf16 %v4466_v0, %v6500_v22  ;;  %v6711_v11 = vld [vmem:[%s8325_s0 + $0x1120] sm:$0xff] }
  0x72   :  { %v6680_v3 = vld [vmem:[%s8325_s0 + $0x710] sm:$0xff]  ;;  %v2038_v7 = vpack.c.bf16 %v4469_v1, %v6505_v23  ;;  %v4472_v8 = vld [vmem:[%s8325_s0 + $0xf08] sm:$0xff]  ;;  %v6716_v12 = vld [vmem:[%s8325_s0 + $0xb20] sm:$0xff]  ;;  %4456 = vst [vmem:[%s8326_s1 + $0x278] sm:$0xff] %v1998_v60 }
  0x73   :  { %v6685_v4 = vld [vmem:[%s8325_s0 + $0x110] sm:$0xff]  ;;  %v4475_v9 = vld [vmem:[%s8325_s0 + $0x908] sm:$0xff]  ;;  %v6721_v13 = vld [vmem:[%s8325_s0 + $0x520] sm:$0xff]  ;;  %4459 = vst [vmem:[%s8326_s1 + $0x578] sm:$0xff] %v2006_v61  ;;  %v2046_v14 = vpack.c.bf16 %v4472_v8, %v6531_v30 }
  0x74   :  { %v4478_v10 = vld [vmem:[%s8325_s0 + $0x308] sm:$0xff]  ;;  %4462 = vst [vmem:[%s8326_s1 + $0x878] sm:$0xff] %v2014_v62  ;;  %v2054_v15 = vpack.c.bf16 %v4475_v9, %v6536_v31  ;;  %v6747_v20 = vld [vmem:[%s8325_s0 + $0xf20] sm:$0xff]  ;;  %4465 = vst [vmem:[%s8326_s1 + $0x80] sm:$0xff] %v2022_v5 }
  0x75   :  { %v2062_v16 = vpack.c.bf16 %v4478_v10, %v6541_v32  ;;  %v4481_v17 = vld [vmem:[%s8325_s0 + $0xd08] sm:$0xff]  ;;  %v6752_v21 = vld [vmem:[%s8325_s0 + $0x920] sm:$0xff]  ;;  %4468 = vst [vmem:[%s8326_s1 + $0x380] sm:$0xff] %v2030_v6  ;;  %4471 = vst [vmem:[%s8326_s1 + $0x680] sm:$0xff] %v2038_v7 }
  0x76   :  { %v4484_v18 = vld [vmem:[%s8325_s0 + $0x708] sm:$0xff]  ;;  %v6757_v22 = vld [vmem:[%s8325_s0 + $0x320] sm:$0xff]  ;;  %v2070_v23 = vpack.c.bf16 %v4481_v17, %v6567_v39  ;;  %v4490_v26 = vld [vmem:[%s8325_s0 + $0x1118] sm:$0xff]  ;;  %4474 = vst [vmem:[%s8326_s1 + $0x180] sm:$0xff] %v2046_v14 }
  0x77   :  { %v4487_v19 = vld [vmem:[%s8325_s0 + $0x108] sm:$0xff]  ;;  %v2078_v24 = vpack.c.bf16 %v4484_v18, %v6572_v40  ;;  %v4493_v27 = vld [vmem:[%s8325_s0 + $0xb18] sm:$0xff]  ;;  %v6783_v29 = vld [vmem:[%s8325_s0 + $0xd20] sm:$0xff]  ;;  %4477 = vst [vmem:[%s8326_s1 + $0x480] sm:$0xff] %v2054_v15  ;;  %v2094_v32 = vpack.c.bf16 %v4490_v26, %v6603_v48 }
  0x78   :  { %v2086_v25 = vpack.c.bf16 %v4487_v19, %v6577_v41  ;;  %v4496_v28 = vld [vmem:[%s8325_s0 + $0x518] sm:$0xff]  ;;  %v6788_v30 = vld [vmem:[%s8325_s0 + $0x720] sm:$0xff]  ;;  %4480 = vst [vmem:[%s8326_s1 + $0x780] sm:$0xff] %v2062_v16  ;;  %v2102_v33 = vpack.c.bf16 %v4493_v27, %v6608_v49  ;;  %v6819_v38 = vld [vmem:[%s8325_s0 + $0x1130] sm:$0xff] }
  0x79   :  { %v6793_v31 = vld [vmem:[%s8325_s0 + $0x120] sm:$0xff]  ;;  %v2110_v34 = vpack.c.bf16 %v4496_v28, %v6613_v50  ;;  %v4499_v35 = vld [vmem:[%s8325_s0 + $0xf18] sm:$0xff]  ;;  %v6824_v39 = vld [vmem:[%s8325_s0 + $0xb30] sm:$0xff]  ;;  %4483 = vst [vmem:[%s8326_s1 + $0x280] sm:$0xff] %v2070_v23 }
  0x7a   :  { %v4502_v36 = vld [vmem:[%s8325_s0 + $0x918] sm:$0xff]  ;;  %v6829_v40 = vld [vmem:[%s8325_s0 + $0x530] sm:$0xff]  ;;  %4486 = vst [vmem:[%s8326_s1 + $0x580] sm:$0xff] %v2078_v24  ;;  %4489 = vst [vmem:[%s8326_s1 + $0x880] sm:$0xff] %v2086_v25  ;;  %v2118_v41 = vpack.c.bf16 %v4499_v35, %v6639_v57 }
  0x7b   :  { %v4505_v37 = vld [vmem:[%s8325_s0 + $0x318] sm:$0xff]  ;;  %v2126_v42 = vpack.c.bf16 %v4502_v36, %v6644_v58  ;;  %v6855_v47 = vld [vmem:[%s8325_s0 + $0xf30] sm:$0xff]  ;;  %4492 = vst [vmem:[%s8326_s1 + $0x88] sm:$0xff] %v2094_v32  ;;  %4495 = vst [vmem:[%s8326_s1 + $0x388] sm:$0xff] %v2102_v33 }
  0x7c   :  { %v2134_v43 = vpack.c.bf16 %v4505_v37, %v6649_v59  ;;  %v4508_v44 = vld [vmem:[%s8325_s0 + $0xd18] sm:$0xff]  ;;  %v6860_v48 = vld [vmem:[%s8325_s0 + $0x930] sm:$0xff]  ;;  %4498 = vst [vmem:[%s8326_s1 + $0x688] sm:$0xff] %v2110_v34  ;;  %v4517_v53 = vld [vmem:[%s8325_s0 + $0x1128] sm:$0xff] }
  0x7d   :  { %v4511_v45 = vld [vmem:[%s8325_s0 + $0x718] sm:$0xff]  ;;  %v6865_v49 = vld [vmem:[%s8325_s0 + $0x330] sm:$0xff]  ;;  %v2142_v50 = vpack.c.bf16 %v4508_v44, %v6675_v2  ;;  %v4520_v54 = vld [vmem:[%s8325_s0 + $0xb28] sm:$0xff]  ;;  %4501 = vst [vmem:[%s8326_s1 + $0x188] sm:$0xff] %v2118_v41  ;;  %v2166_v59 = vpack.c.bf16 %v4517_v53, %v6711_v11 }
  0x7e   :  { %v4514_v46 = vld [vmem:[%s8325_s0 + $0x118] sm:$0xff]  ;;  %v2150_v51 = vpack.c.bf16 %v4511_v45, %v6680_v3  ;;  %v4523_v55 = vld [vmem:[%s8325_s0 + $0x528] sm:$0xff]  ;;  %v6891_v56 = vld [vmem:[%s8325_s0 + $0xd30] sm:$0xff]  ;;  %4504 = vst [vmem:[%s8326_s1 + $0x488] sm:$0xff] %v2126_v42  ;;  %v2174_v60 = vpack.c.bf16 %v4520_v54, %v6716_v12 }
  0x7f   :  { %v2158_v52 = vpack.c.bf16 %v4514_v46, %v6685_v4  ;;  %v6896_v57 = vld [vmem:[%s8325_s0 + $0x730] sm:$0xff]  ;;  %4507 = vst [vmem:[%s8326_s1 + $0x788] sm:$0xff] %v2134_v43  ;;  %v2182_v61 = vpack.c.bf16 %v4523_v55, %v6721_v13  ;;  %v4526_v62 = vld [vmem:[%s8325_s0 + $0xf28] sm:$0xff]  ;;  %v6927_v1 = vld [vmem:[%s8325_s0 + $0x1140] sm:$0xff] }
  0x80   :  { %v6901_v58 = vld [vmem:[%s8325_s0 + $0x130] sm:$0xff]  ;;  %v4529_v63 = vld [vmem:[%s8325_s0 + $0x928] sm:$0xff]  ;;  %v6932_v2 = vld [vmem:[%s8325_s0 + $0xb40] sm:$0xff]  ;;  %4510 = vst [vmem:[%s8326_s1 + $0x288] sm:$0xff] %v2142_v50  ;;  %v2190_v4 = vpack.c.bf16 %v4526_v62, %v6747_v20 }
  0x81   :  { %v4532_v0 = vld [vmem:[%s8325_s0 + $0x328] sm:$0xff]  ;;  %v6937_v3 = vld [vmem:[%s8325_s0 + $0x540] sm:$0xff]  ;;  %4513 = vst [vmem:[%s8326_s1 + $0x588] sm:$0xff] %v2150_v51  ;;  %4516 = vst [vmem:[%s8326_s1 + $0x888] sm:$0xff] %v2158_v52  ;;  %v2198_v5 = vpack.c.bf16 %v4529_v63, %v6752_v21 }
  0x82   :  { %v2206_v6 = vpack.c.bf16 %v4532_v0, %v6757_v22  ;;  %v4535_v7 = vld [vmem:[%s8325_s0 + $0xd28] sm:$0xff]  ;;  %v6963_v10 = vld [vmem:[%s8325_s0 + $0xf40] sm:$0xff]  ;;  %4519 = vst [vmem:[%s8326_s1 + $0x90] sm:$0xff] %v2166_v59  ;;  %4522 = vst [vmem:[%s8326_s1 + $0x390] sm:$0xff] %v2174_v60 }
  0x83   :  { %v4538_v8 = vld [vmem:[%s8325_s0 + $0x728] sm:$0xff]  ;;  %v6968_v11 = vld [vmem:[%s8325_s0 + $0x940] sm:$0xff]  ;;  %4525 = vst [vmem:[%s8326_s1 + $0x690] sm:$0xff] %v2182_v61  ;;  %v2214_v13 = vpack.c.bf16 %v4535_v7, %v6783_v29  ;;  %v4544_v16 = vld [vmem:[%s8325_s0 + $0x1138] sm:$0xff] }
  0x84   :  { %v4541_v9 = vld [vmem:[%s8325_s0 + $0x128] sm:$0xff]  ;;  %v6973_v12 = vld [vmem:[%s8325_s0 + $0x340] sm:$0xff]  ;;  %v2222_v14 = vpack.c.bf16 %v4538_v8, %v6788_v30  ;;  %v4547_v17 = vld [vmem:[%s8325_s0 + $0xb38] sm:$0xff]  ;;  %4528 = vst [vmem:[%s8326_s1 + $0x190] sm:$0xff] %v2190_v4  ;;  %v2238_v22 = vpack.c.bf16 %v4544_v16, %v6819_v38 }
  0x85   :  { %v2230_v15 = vpack.c.bf16 %v4541_v9, %v6793_v31  ;;  %v4550_v18 = vld [vmem:[%s8325_s0 + $0x538] sm:$0xff]  ;;  %v6999_v19 = vld [vmem:[%s8325_s0 + $0xd40] sm:$0xff]  ;;  %4531 = vst [vmem:[%s8326_s1 + $0x490] sm:$0xff] %v2198_v5  ;;  %4534 = vst [vmem:[%s8326_s1 + $0x790] sm:$0xff] %v2206_v6  ;;  %v2246_v23 = vpack.c.bf16 %v4547_v17, %v6824_v39 }
  0x86   :  { %v7004_v20 = vld [vmem:[%s8325_s0 + $0x740] sm:$0xff]  ;;  %v2254_v24 = vpack.c.bf16 %v4550_v18, %v6829_v40  ;;  %v4553_v25 = vld [vmem:[%s8325_s0 + $0xf38] sm:$0xff]  ;;  %v7035_v28 = vld [vmem:[%s8325_s0 + $0x1150] sm:$0xff]  ;;  %4537 = vst [vmem:[%s8326_s1 + $0x290] sm:$0xff] %v2214_v13 }
  0x87   :  { %v7009_v21 = vld [vmem:[%s8325_s0 + $0x140] sm:$0xff]  ;;  %v4556_v26 = vld [vmem:[%s8325_s0 + $0x938] sm:$0xff]  ;;  %v7040_v29 = vld [vmem:[%s8325_s0 + $0xb50] sm:$0xff]  ;;  %4540 = vst [vmem:[%s8326_s1 + $0x590] sm:$0xff] %v2222_v14  ;;  %v2262_v31 = vpack.c.bf16 %v4553_v25, %v6855_v47 }
  0x88   :  { %v4559_v27 = vld [vmem:[%s8325_s0 + $0x338] sm:$0xff]  ;;  %v7045_v30 = vld [vmem:[%s8325_s0 + $0x550] sm:$0xff]  ;;  %4543 = vst [vmem:[%s8326_s1 + $0x890] sm:$0xff] %v2230_v15  ;;  %v2270_v32 = vpack.c.bf16 %v4556_v26, %v6860_v48  ;;  %4546 = vst [vmem:[%s8326_s1 + $0x98] sm:$0xff] %v2238_v22 }
  0x89   :  { %v2278_v33 = vpack.c.bf16 %v4559_v27, %v6865_v49  ;;  %v4562_v34 = vld [vmem:[%s8325_s0 + $0xd38] sm:$0xff]  ;;  %v7071_v37 = vld [vmem:[%s8325_s0 + $0xf50] sm:$0xff]  ;;  %4549 = vst [vmem:[%s8326_s1 + $0x398] sm:$0xff] %v2246_v23  ;;  %4552 = vst [vmem:[%s8326_s1 + $0x698] sm:$0xff] %v2254_v24 }
  0x8a   :  { %v4565_v35 = vld [vmem:[%s8325_s0 + $0x738] sm:$0xff]  ;;  %v7076_v38 = vld [vmem:[%s8325_s0 + $0x950] sm:$0xff]  ;;  %v2286_v40 = vpack.c.bf16 %v4562_v34, %v6891_v56  ;;  %v4571_v43 = vld [vmem:[%s8325_s0 + $0x1148] sm:$0xff]  ;;  %4555 = vst [vmem:[%s8326_s1 + $0x198] sm:$0xff] %v2262_v31 }
  0x8b   :  { %v4568_v36 = vld [vmem:[%s8325_s0 + $0x138] sm:$0xff]  ;;  %v7081_v39 = vld [vmem:[%s8325_s0 + $0x350] sm:$0xff]  ;;  %v2294_v41 = vpack.c.bf16 %v4565_v35, %v6896_v57  ;;  %v4574_v44 = vld [vmem:[%s8325_s0 + $0xb48] sm:$0xff]  ;;  %4558 = vst [vmem:[%s8326_s1 + $0x498] sm:$0xff] %v2270_v32  ;;  %v2310_v49 = vpack.c.bf16 %v4571_v43, %v6927_v1 }
  0x8c   :  { %v2302_v42 = vpack.c.bf16 %v4568_v36, %v6901_v58  ;;  %v4577_v45 = vld [vmem:[%s8325_s0 + $0x548] sm:$0xff]  ;;  %v7107_v46 = vld [vmem:[%s8325_s0 + $0xd50] sm:$0xff]  ;;  %4561 = vst [vmem:[%s8326_s1 + $0x798] sm:$0xff] %v2278_v33  ;;  %v2318_v50 = vpack.c.bf16 %v4574_v44, %v6932_v2  ;;  %v7143_v55 = vld [vmem:[%s8325_s0 + $0x1160] sm:$0xff] }
  0x8d   :  { %v7112_v47 = vld [vmem:[%s8325_s0 + $0x750] sm:$0xff]  ;;  %v2326_v51 = vpack.c.bf16 %v4577_v45, %v6937_v3  ;;  %v4580_v52 = vld [vmem:[%s8325_s0 + $0xf48] sm:$0xff]  ;;  %v7148_v56 = vld [vmem:[%s8325_s0 + $0xb60] sm:$0xff]  ;;  %4564 = vst [vmem:[%s8326_s1 + $0x298] sm:$0xff] %v2286_v40 }
  0x8e   :  { %v7117_v48 = vld [vmem:[%s8325_s0 + $0x150] sm:$0xff]  ;;  %v4583_v53 = vld [vmem:[%s8325_s0 + $0x948] sm:$0xff]  ;;  %v7153_v57 = vld [vmem:[%s8325_s0 + $0x560] sm:$0xff]  ;;  %4567 = vst [vmem:[%s8326_s1 + $0x598] sm:$0xff] %v2294_v41  ;;  %v2334_v58 = vpack.c.bf16 %v4580_v52, %v6963_v10 }
  0x8f   :  { %v4586_v54 = vld [vmem:[%s8325_s0 + $0x348] sm:$0xff]  ;;  %4570 = vst [vmem:[%s8326_s1 + $0x898] sm:$0xff] %v2302_v42  ;;  %v2342_v59 = vpack.c.bf16 %v4583_v53, %v6968_v11  ;;  %v7179_v0 = vld [vmem:[%s8325_s0 + $0xf60] sm:$0xff]  ;;  %4573 = vst [vmem:[%s8326_s1 + $0xa0] sm:$0xff] %v2310_v49 }
  0x90   :  { %v2350_v60 = vpack.c.bf16 %v4586_v54, %v6973_v12  ;;  %v4589_v61 = vld [vmem:[%s8325_s0 + $0xd48] sm:$0xff]  ;;  %v7184_v1 = vld [vmem:[%s8325_s0 + $0x960] sm:$0xff]  ;;  %4576 = vst [vmem:[%s8326_s1 + $0x3a0] sm:$0xff] %v2318_v50  ;;  %4579 = vst [vmem:[%s8326_s1 + $0x6a0] sm:$0xff] %v2326_v51 }
  0x91   :  { %v4592_v62 = vld [vmem:[%s8325_s0 + $0x748] sm:$0xff]  ;;  %v7189_v2 = vld [vmem:[%s8325_s0 + $0x360] sm:$0xff]  ;;  %v2358_v3 = vpack.c.bf16 %v4589_v61, %v6999_v19  ;;  %v4598_v6 = vld [vmem:[%s8325_s0 + $0x1158] sm:$0xff]  ;;  %4582 = vst [vmem:[%s8326_s1 + $0x1a0] sm:$0xff] %v2334_v58 }
  0x92   :  { %v4595_v63 = vld [vmem:[%s8325_s0 + $0x148] sm:$0xff]  ;;  %v2366_v4 = vpack.c.bf16 %v4592_v62, %v7004_v20  ;;  %v4601_v7 = vld [vmem:[%s8325_s0 + $0xb58] sm:$0xff]  ;;  %v7215_v9 = vld [vmem:[%s8325_s0 + $0xd60] sm:$0xff]  ;;  %4585 = vst [vmem:[%s8326_s1 + $0x4a0] sm:$0xff] %v2342_v59  ;;  %v2382_v12 = vpack.c.bf16 %v4598_v6, %v7035_v28 }
  0x93   :  { %v2374_v5 = vpack.c.bf16 %v4595_v63, %v7009_v21  ;;  %v4604_v8 = vld [vmem:[%s8325_s0 + $0x558] sm:$0xff]  ;;  %v7220_v10 = vld [vmem:[%s8325_s0 + $0x760] sm:$0xff]  ;;  %4588 = vst [vmem:[%s8326_s1 + $0x7a0] sm:$0xff] %v2350_v60  ;;  %v2390_v13 = vpack.c.bf16 %v4601_v7, %v7040_v29  ;;  %v7251_v18 = vld [vmem:[%s8325_s0 + $0x1170] sm:$0xff] }
  0x94   :  { %v7225_v11 = vld [vmem:[%s8325_s0 + $0x160] sm:$0xff]  ;;  %v2398_v14 = vpack.c.bf16 %v4604_v8, %v7045_v30  ;;  %v4607_v15 = vld [vmem:[%s8325_s0 + $0xf58] sm:$0xff]  ;;  %v7256_v19 = vld [vmem:[%s8325_s0 + $0xb70] sm:$0xff]  ;;  %4591 = vst [vmem:[%s8326_s1 + $0x2a0] sm:$0xff] %v2358_v3 }
  0x95   :  { %v4610_v16 = vld [vmem:[%s8325_s0 + $0x958] sm:$0xff]  ;;  %v7261_v20 = vld [vmem:[%s8325_s0 + $0x570] sm:$0xff]  ;;  %4594 = vst [vmem:[%s8326_s1 + $0x5a0] sm:$0xff] %v2366_v4  ;;  %4597 = vst [vmem:[%s8326_s1 + $0x8a0] sm:$0xff] %v2374_v5  ;;  %v2406_v21 = vpack.c.bf16 %v4607_v15, %v7071_v37 }
  0x96   :  { %v4613_v17 = vld [vmem:[%s8325_s0 + $0x358] sm:$0xff]  ;;  %v2414_v22 = vpack.c.bf16 %v4610_v16, %v7076_v38  ;;  %v7287_v27 = vld [vmem:[%s8325_s0 + $0xf70] sm:$0xff]  ;;  %4600 = vst [vmem:[%s8326_s1 + $0xa8] sm:$0xff] %v2382_v12  ;;  %4603 = vst [vmem:[%s8326_s1 + $0x3a8] sm:$0xff] %v2390_v13 }
  0x97   :  { %v2422_v23 = vpack.c.bf16 %v4613_v17, %v7081_v39  ;;  %v4616_v24 = vld [vmem:[%s8325_s0 + $0xd58] sm:$0xff]  ;;  %v7292_v28 = vld [vmem:[%s8325_s0 + $0x970] sm:$0xff]  ;;  %4606 = vst [vmem:[%s8326_s1 + $0x6a8] sm:$0xff] %v2398_v14  ;;  %v4625_v33 = vld [vmem:[%s8325_s0 + $0x1168] sm:$0xff] }
  0x98   :  { %v4619_v25 = vld [vmem:[%s8325_s0 + $0x758] sm:$0xff]  ;;  %v7297_v29 = vld [vmem:[%s8325_s0 + $0x370] sm:$0xff]  ;;  %v2430_v30 = vpack.c.bf16 %v4616_v24, %v7107_v46  ;;  %v4628_v34 = vld [vmem:[%s8325_s0 + $0xb68] sm:$0xff]  ;;  %4609 = vst [vmem:[%s8326_s1 + $0x1a8] sm:$0xff] %v2406_v21  ;;  %v2454_v39 = vpack.c.bf16 %v4625_v33, %v7143_v55 }
  0x99   :  { %v4622_v26 = vld [vmem:[%s8325_s0 + $0x158] sm:$0xff]  ;;  %v2438_v31 = vpack.c.bf16 %v4619_v25, %v7112_v47  ;;  %v4631_v35 = vld [vmem:[%s8325_s0 + $0x568] sm:$0xff]  ;;  %v7323_v36 = vld [vmem:[%s8325_s0 + $0xd70] sm:$0xff]  ;;  %4612 = vst [vmem:[%s8326_s1 + $0x4a8] sm:$0xff] %v2414_v22  ;;  %v2462_v40 = vpack.c.bf16 %v4628_v34, %v7148_v56 }
  0x9a   :  { %v2446_v32 = vpack.c.bf16 %v4622_v26, %v7117_v48  ;;  %v7328_v37 = vld [vmem:[%s8325_s0 + $0x770] sm:$0xff]  ;;  %4615 = vst [vmem:[%s8326_s1 + $0x7a8] sm:$0xff] %v2422_v23  ;;  %v2470_v41 = vpack.c.bf16 %v4631_v35, %v7153_v57  ;;  %v4634_v42 = vld [vmem:[%s8325_s0 + $0xf68] sm:$0xff]  ;;  %v7359_v45 = vld [vmem:[%s8325_s0 + $0x1180] sm:$0xff] }
  0x9b   :  { %v7333_v38 = vld [vmem:[%s8325_s0 + $0x170] sm:$0xff]  ;;  %v4637_v43 = vld [vmem:[%s8325_s0 + $0x968] sm:$0xff]  ;;  %v7364_v46 = vld [vmem:[%s8325_s0 + $0xb80] sm:$0xff]  ;;  %4618 = vst [vmem:[%s8326_s1 + $0x2a8] sm:$0xff] %v2430_v30  ;;  %v2478_v48 = vpack.c.bf16 %v4634_v42, %v7179_v0 }
  0x9c   :  { %v4640_v44 = vld [vmem:[%s8325_s0 + $0x368] sm:$0xff]  ;;  %v7369_v47 = vld [vmem:[%s8325_s0 + $0x580] sm:$0xff]  ;;  %4621 = vst [vmem:[%s8326_s1 + $0x5a8] sm:$0xff] %v2438_v31  ;;  %4624 = vst [vmem:[%s8326_s1 + $0x8a8] sm:$0xff] %v2446_v32  ;;  %v2486_v49 = vpack.c.bf16 %v4637_v43, %v7184_v1 }
  0x9d   :  { %v2494_v50 = vpack.c.bf16 %v4640_v44, %v7189_v2  ;;  %v4643_v51 = vld [vmem:[%s8325_s0 + $0xd68] sm:$0xff]  ;;  %v7395_v54 = vld [vmem:[%s8325_s0 + $0xf80] sm:$0xff]  ;;  %4627 = vst [vmem:[%s8326_s1 + $0xb0] sm:$0xff] %v2454_v39  ;;  %4630 = vst [vmem:[%s8326_s1 + $0x3b0] sm:$0xff] %v2462_v40 }
  0x9e   :  { %v4646_v52 = vld [vmem:[%s8325_s0 + $0x768] sm:$0xff]  ;;  %v7400_v55 = vld [vmem:[%s8325_s0 + $0x980] sm:$0xff]  ;;  %4633 = vst [vmem:[%s8326_s1 + $0x6b0] sm:$0xff] %v2470_v41  ;;  %v2502_v57 = vpack.c.bf16 %v4643_v51, %v7215_v9  ;;  %v4652_v60 = vld [vmem:[%s8325_s0 + $0x1178] sm:$0xff] }
  0x9f   :  { %v4649_v53 = vld [vmem:[%s8325_s0 + $0x168] sm:$0xff]  ;;  %v7405_v56 = vld [vmem:[%s8325_s0 + $0x380] sm:$0xff]  ;;  %v2510_v58 = vpack.c.bf16 %v4646_v52, %v7220_v10  ;;  %v4655_v61 = vld [vmem:[%s8325_s0 + $0xb78] sm:$0xff]  ;;  %4636 = vst [vmem:[%s8326_s1 + $0x1b0] sm:$0xff] %v2478_v48  ;;  %v2526_v2 = vpack.c.bf16 %v4652_v60, %v7251_v18 }
  0xa0   :  { %v2518_v59 = vpack.c.bf16 %v4649_v53, %v7225_v11  ;;  %v4658_v62 = vld [vmem:[%s8325_s0 + $0x578] sm:$0xff]  ;;  %v7431_v63 = vld [vmem:[%s8325_s0 + $0xd80] sm:$0xff]  ;;  %4639 = vst [vmem:[%s8326_s1 + $0x4b0] sm:$0xff] %v2486_v49  ;;  %4642 = vst [vmem:[%s8326_s1 + $0x7b0] sm:$0xff] %v2494_v50  ;;  %v2534_v3 = vpack.c.bf16 %v4655_v61, %v7256_v19 }
  0xa1   :  { %v7436_v0 = vld [vmem:[%s8325_s0 + $0x780] sm:$0xff]  ;;  %v2542_v4 = vpack.c.bf16 %v4658_v62, %v7261_v20  ;;  %v4661_v5 = vld [vmem:[%s8325_s0 + $0xf78] sm:$0xff]  ;;  %v7467_v8 = vld [vmem:[%s8325_s0 + $0x1190] sm:$0xff]  ;;  %4645 = vst [vmem:[%s8326_s1 + $0x2b0] sm:$0xff] %v2502_v57 }
  0xa2   :  { %v7441_v1 = vld [vmem:[%s8325_s0 + $0x180] sm:$0xff]  ;;  %v4664_v6 = vld [vmem:[%s8325_s0 + $0x978] sm:$0xff]  ;;  %v7472_v9 = vld [vmem:[%s8325_s0 + $0xb90] sm:$0xff]  ;;  %4648 = vst [vmem:[%s8326_s1 + $0x5b0] sm:$0xff] %v2510_v58  ;;  %v2550_v11 = vpack.c.bf16 %v4661_v5, %v7287_v27 }
  0xa3   :  { %v4667_v7 = vld [vmem:[%s8325_s0 + $0x378] sm:$0xff]  ;;  %v7477_v10 = vld [vmem:[%s8325_s0 + $0x590] sm:$0xff]  ;;  %4651 = vst [vmem:[%s8326_s1 + $0x8b0] sm:$0xff] %v2518_v59  ;;  %v2558_v12 = vpack.c.bf16 %v4664_v6, %v7292_v28  ;;  %4654 = vst [vmem:[%s8326_s1 + $0xb8] sm:$0xff] %v2526_v2 }
  0xa4   :  { %v2566_v13 = vpack.c.bf16 %v4667_v7, %v7297_v29  ;;  %v4670_v14 = vld [vmem:[%s8325_s0 + $0xd78] sm:$0xff]  ;;  %v7503_v17 = vld [vmem:[%s8325_s0 + $0xf90] sm:$0xff]  ;;  %4657 = vst [vmem:[%s8326_s1 + $0x3b8] sm:$0xff] %v2534_v3  ;;  %4660 = vst [vmem:[%s8326_s1 + $0x6b8] sm:$0xff] %v2542_v4 }
  0xa5   :  { %v4673_v15 = vld [vmem:[%s8325_s0 + $0x778] sm:$0xff]  ;;  %v7508_v18 = vld [vmem:[%s8325_s0 + $0x990] sm:$0xff]  ;;  %v2574_v20 = vpack.c.bf16 %v4670_v14, %v7323_v36  ;;  %v4679_v23 = vld [vmem:[%s8325_s0 + $0x1188] sm:$0xff]  ;;  %4663 = vst [vmem:[%s8326_s1 + $0x1b8] sm:$0xff] %v2550_v11 }
  0xa6   :  { %v4676_v16 = vld [vmem:[%s8325_s0 + $0x178] sm:$0xff]  ;;  %v7513_v19 = vld [vmem:[%s8325_s0 + $0x390] sm:$0xff]  ;;  %v2582_v21 = vpack.c.bf16 %v4673_v15, %v7328_v37  ;;  %v4682_v24 = vld [vmem:[%s8325_s0 + $0xb88] sm:$0xff]  ;;  %4666 = vst [vmem:[%s8326_s1 + $0x4b8] sm:$0xff] %v2558_v12  ;;  %v2598_v29 = vpack.c.bf16 %v4679_v23, %v7359_v45 }
  0xa7   :  { %v2590_v22 = vpack.c.bf16 %v4676_v16, %v7333_v38  ;;  %v4685_v25 = vld [vmem:[%s8325_s0 + $0x588] sm:$0xff]  ;;  %v7539_v26 = vld [vmem:[%s8325_s0 + $0xd90] sm:$0xff]  ;;  %4669 = vst [vmem:[%s8326_s1 + $0x7b8] sm:$0xff] %v2566_v13  ;;  %v2606_v30 = vpack.c.bf16 %v4682_v24, %v7364_v46  ;;  %v7575_v35 = vld [vmem:[%s8325_s0 + $0x11a0] sm:$0xff] }
  0xa8   :  { %v7544_v27 = vld [vmem:[%s8325_s0 + $0x790] sm:$0xff]  ;;  %v2614_v31 = vpack.c.bf16 %v4685_v25, %v7369_v47  ;;  %v4688_v32 = vld [vmem:[%s8325_s0 + $0xf88] sm:$0xff]  ;;  %v7580_v36 = vld [vmem:[%s8325_s0 + $0xba0] sm:$0xff]  ;;  %4672 = vst [vmem:[%s8326_s1 + $0x2b8] sm:$0xff] %v2574_v20 }
  0xa9   :  { %v7549_v28 = vld [vmem:[%s8325_s0 + $0x190] sm:$0xff]  ;;  %v4691_v33 = vld [vmem:[%s8325_s0 + $0x988] sm:$0xff]  ;;  %v7585_v37 = vld [vmem:[%s8325_s0 + $0x5a0] sm:$0xff]  ;;  %4675 = vst [vmem:[%s8326_s1 + $0x5b8] sm:$0xff] %v2582_v21  ;;  %v2622_v38 = vpack.c.bf16 %v4688_v32, %v7395_v54 }
  0xaa   :  { %v4694_v34 = vld [vmem:[%s8325_s0 + $0x388] sm:$0xff]  ;;  %4678 = vst [vmem:[%s8326_s1 + $0x8b8] sm:$0xff] %v2590_v22  ;;  %v2630_v39 = vpack.c.bf16 %v4691_v33, %v7400_v55  ;;  %v7611_v44 = vld [vmem:[%s8325_s0 + $0xfa0] sm:$0xff]  ;;  %4681 = vst [vmem:[%s8326_s1 + $0xc0] sm:$0xff] %v2598_v29 }
  0xab   :  { %v2638_v40 = vpack.c.bf16 %v4694_v34, %v7405_v56  ;;  %v4697_v41 = vld [vmem:[%s8325_s0 + $0xd88] sm:$0xff]  ;;  %v7616_v45 = vld [vmem:[%s8325_s0 + $0x9a0] sm:$0xff]  ;;  %4684 = vst [vmem:[%s8326_s1 + $0x3c0] sm:$0xff] %v2606_v30  ;;  %4687 = vst [vmem:[%s8326_s1 + $0x6c0] sm:$0xff] %v2614_v31 }
  0xac   :  { %v4700_v42 = vld [vmem:[%s8325_s0 + $0x788] sm:$0xff]  ;;  %v7621_v46 = vld [vmem:[%s8325_s0 + $0x3a0] sm:$0xff]  ;;  %v2646_v47 = vpack.c.bf16 %v4697_v41, %v7431_v63  ;;  %v4706_v50 = vld [vmem:[%s8325_s0 + $0x1198] sm:$0xff]  ;;  %4690 = vst [vmem:[%s8326_s1 + $0x1c0] sm:$0xff] %v2622_v38 }
  0xad   :  { %v4703_v43 = vld [vmem:[%s8325_s0 + $0x188] sm:$0xff]  ;;  %v2654_v48 = vpack.c.bf16 %v4700_v42, %v7436_v0  ;;  %v4709_v51 = vld [vmem:[%s8325_s0 + $0xb98] sm:$0xff]  ;;  %v7647_v53 = vld [vmem:[%s8325_s0 + $0xda0] sm:$0xff]  ;;  %4693 = vst [vmem:[%s8326_s1 + $0x4c0] sm:$0xff] %v2630_v39  ;;  %v2670_v56 = vpack.c.bf16 %v4706_v50, %v7467_v8 }
  0xae   :  { %v2662_v49 = vpack.c.bf16 %v4703_v43, %v7441_v1  ;;  %v4712_v52 = vld [vmem:[%s8325_s0 + $0x598] sm:$0xff]  ;;  %v7652_v54 = vld [vmem:[%s8325_s0 + $0x7a0] sm:$0xff]  ;;  %4696 = vst [vmem:[%s8326_s1 + $0x7c0] sm:$0xff] %v2638_v40  ;;  %v2678_v57 = vpack.c.bf16 %v4709_v51, %v7472_v9  ;;  %v7683_v62 = vld [vmem:[%s8325_s0 + $0x11b0] sm:$0xff] }
  0xaf   :  { %v7657_v55 = vld [vmem:[%s8325_s0 + $0x1a0] sm:$0xff]  ;;  %v2686_v58 = vpack.c.bf16 %v4712_v52, %v7477_v10  ;;  %v4715_v59 = vld [vmem:[%s8325_s0 + $0xf98] sm:$0xff]  ;;  %v7688_v63 = vld [vmem:[%s8325_s0 + $0xbb0] sm:$0xff]  ;;  %4699 = vst [vmem:[%s8326_s1 + $0x2c0] sm:$0xff] %v2646_v47 }
  0xb0   :  { %v4718_v60 = vld [vmem:[%s8325_s0 + $0x998] sm:$0xff]  ;;  %v7693_v0 = vld [vmem:[%s8325_s0 + $0x5b0] sm:$0xff]  ;;  %4702 = vst [vmem:[%s8326_s1 + $0x5c0] sm:$0xff] %v2654_v48  ;;  %4705 = vst [vmem:[%s8326_s1 + $0x8c0] sm:$0xff] %v2662_v49  ;;  %v2694_v1 = vpack.c.bf16 %v4715_v59, %v7503_v17 }
  0xb1   :  { %v4721_v61 = vld [vmem:[%s8325_s0 + $0x398] sm:$0xff]  ;;  %v2702_v2 = vpack.c.bf16 %v4718_v60, %v7508_v18  ;;  %v7719_v7 = vld [vmem:[%s8325_s0 + $0xfb0] sm:$0xff]  ;;  %4708 = vst [vmem:[%s8326_s1 + $0xc8] sm:$0xff] %v2670_v56  ;;  %4711 = vst [vmem:[%s8326_s1 + $0x3c8] sm:$0xff] %v2678_v57 }
  0xb2   :  { %v2710_v3 = vpack.c.bf16 %v4721_v61, %v7513_v19  ;;  %v4724_v4 = vld [vmem:[%s8325_s0 + $0xd98] sm:$0xff]  ;;  %v7724_v8 = vld [vmem:[%s8325_s0 + $0x9b0] sm:$0xff]  ;;  %4714 = vst [vmem:[%s8326_s1 + $0x6c8] sm:$0xff] %v2686_v58  ;;  %v4733_v13 = vld [vmem:[%s8325_s0 + $0x11a8] sm:$0xff] }
  0xb3   :  { %v4727_v5 = vld [vmem:[%s8325_s0 + $0x798] sm:$0xff]  ;;  %v7729_v9 = vld [vmem:[%s8325_s0 + $0x3b0] sm:$0xff]  ;;  %v2718_v10 = vpack.c.bf16 %v4724_v4, %v7539_v26  ;;  %v4736_v14 = vld [vmem:[%s8325_s0 + $0xba8] sm:$0xff]  ;;  %4717 = vst [vmem:[%s8326_s1 + $0x1c8] sm:$0xff] %v2694_v1  ;;  %v2742_v19 = vpack.c.bf16 %v4733_v13, %v7575_v35 }
  0xb4   :  { %v4730_v6 = vld [vmem:[%s8325_s0 + $0x198] sm:$0xff]  ;;  %v2726_v11 = vpack.c.bf16 %v4727_v5, %v7544_v27  ;;  %v4739_v15 = vld [vmem:[%s8325_s0 + $0x5a8] sm:$0xff]  ;;  %v7755_v16 = vld [vmem:[%s8325_s0 + $0xdb0] sm:$0xff]  ;;  %4720 = vst [vmem:[%s8326_s1 + $0x4c8] sm:$0xff] %v2702_v2  ;;  %v2750_v20 = vpack.c.bf16 %v4736_v14, %v7580_v36 }
  0xb5   :  { %v2734_v12 = vpack.c.bf16 %v4730_v6, %v7549_v28  ;;  %v7760_v17 = vld [vmem:[%s8325_s0 + $0x7b0] sm:$0xff]  ;;  %4723 = vst [vmem:[%s8326_s1 + $0x7c8] sm:$0xff] %v2710_v3  ;;  %v2758_v21 = vpack.c.bf16 %v4739_v15, %v7585_v37  ;;  %v4742_v22 = vld [vmem:[%s8325_s0 + $0xfa8] sm:$0xff]  ;;  %v7791_v25 = vld [vmem:[%s8325_s0 + $0x11c0] sm:$0xff] }
  0xb6   :  { %v7765_v18 = vld [vmem:[%s8325_s0 + $0x1b0] sm:$0xff]  ;;  %v4745_v23 = vld [vmem:[%s8325_s0 + $0x9a8] sm:$0xff]  ;;  %v7796_v26 = vld [vmem:[%s8325_s0 + $0xbc0] sm:$0xff]  ;;  %4726 = vst [vmem:[%s8326_s1 + $0x2c8] sm:$0xff] %v2718_v10  ;;  %v2766_v28 = vpack.c.bf16 %v4742_v22, %v7611_v44 }
  0xb7   :  { %v4748_v24 = vld [vmem:[%s8325_s0 + $0x3a8] sm:$0xff]  ;;  %v7801_v27 = vld [vmem:[%s8325_s0 + $0x5c0] sm:$0xff]  ;;  %4729 = vst [vmem:[%s8326_s1 + $0x5c8] sm:$0xff] %v2726_v11  ;;  %4732 = vst [vmem:[%s8326_s1 + $0x8c8] sm:$0xff] %v2734_v12  ;;  %v2774_v29 = vpack.c.bf16 %v4745_v23, %v7616_v45 }
  0xb8   :  { %v2782_v30 = vpack.c.bf16 %v4748_v24, %v7621_v46  ;;  %v4751_v31 = vld [vmem:[%s8325_s0 + $0xda8] sm:$0xff]  ;;  %v7827_v34 = vld [vmem:[%s8325_s0 + $0xfc0] sm:$0xff]  ;;  %4735 = vst [vmem:[%s8326_s1 + $0xd0] sm:$0xff] %v2742_v19  ;;  %4738 = vst [vmem:[%s8326_s1 + $0x3d0] sm:$0xff] %v2750_v20 }
  0xb9   :  { %v4754_v32 = vld [vmem:[%s8325_s0 + $0x7a8] sm:$0xff]  ;;  %v7832_v35 = vld [vmem:[%s8325_s0 + $0x9c0] sm:$0xff]  ;;  %4741 = vst [vmem:[%s8326_s1 + $0x6d0] sm:$0xff] %v2758_v21  ;;  %v2790_v37 = vpack.c.bf16 %v4751_v31, %v7647_v53  ;;  %v4760_v40 = vld [vmem:[%s8325_s0 + $0x11b8] sm:$0xff] }
  0xba   :  { %v4757_v33 = vld [vmem:[%s8325_s0 + $0x1a8] sm:$0xff]  ;;  %v7837_v36 = vld [vmem:[%s8325_s0 + $0x3c0] sm:$0xff]  ;;  %v2798_v38 = vpack.c.bf16 %v4754_v32, %v7652_v54  ;;  %v4763_v41 = vld [vmem:[%s8325_s0 + $0xbb8] sm:$0xff]  ;;  %4744 = vst [vmem:[%s8326_s1 + $0x1d0] sm:$0xff] %v2766_v28  ;;  %v2814_v46 = vpack.c.bf16 %v4760_v40, %v7683_v62 }
  0xbb   :  { %v2806_v39 = vpack.c.bf16 %v4757_v33, %v7657_v55  ;;  %v4766_v42 = vld [vmem:[%s8325_s0 + $0x5b8] sm:$0xff]  ;;  %v7863_v43 = vld [vmem:[%s8325_s0 + $0xdc0] sm:$0xff]  ;;  %4747 = vst [vmem:[%s8326_s1 + $0x4d0] sm:$0xff] %v2774_v29  ;;  %4750 = vst [vmem:[%s8326_s1 + $0x7d0] sm:$0xff] %v2782_v30  ;;  %v2822_v47 = vpack.c.bf16 %v4763_v41, %v7688_v63 }
  0xbc   :  { %v7868_v44 = vld [vmem:[%s8325_s0 + $0x7c0] sm:$0xff]  ;;  %v2830_v48 = vpack.c.bf16 %v4766_v42, %v7693_v0  ;;  %v4769_v49 = vld [vmem:[%s8325_s0 + $0xfb8] sm:$0xff]  ;;  %v7899_v52 = vld [vmem:[%s8325_s0 + $0x11d0] sm:$0xff]  ;;  %4753 = vst [vmem:[%s8326_s1 + $0x2d0] sm:$0xff] %v2790_v37 }
  0xbd   :  { %v7873_v45 = vld [vmem:[%s8325_s0 + $0x1c0] sm:$0xff]  ;;  %v4772_v50 = vld [vmem:[%s8325_s0 + $0x9b8] sm:$0xff]  ;;  %v7904_v53 = vld [vmem:[%s8325_s0 + $0xbd0] sm:$0xff]  ;;  %4756 = vst [vmem:[%s8326_s1 + $0x5d0] sm:$0xff] %v2798_v38  ;;  %v2838_v55 = vpack.c.bf16 %v4769_v49, %v7719_v7 }
  0xbe   :  { %v4775_v51 = vld [vmem:[%s8325_s0 + $0x3b8] sm:$0xff]  ;;  %v7909_v54 = vld [vmem:[%s8325_s0 + $0x5d0] sm:$0xff]  ;;  %4759 = vst [vmem:[%s8326_s1 + $0x8d0] sm:$0xff] %v2806_v39  ;;  %v2846_v56 = vpack.c.bf16 %v4772_v50, %v7724_v8  ;;  %4762 = vst [vmem:[%s8326_s1 + $0xd8] sm:$0xff] %v2814_v46 }
  0xbf   :  { %v2854_v57 = vpack.c.bf16 %v4775_v51, %v7729_v9  ;;  %v4778_v58 = vld [vmem:[%s8325_s0 + $0xdb8] sm:$0xff]  ;;  %v7935_v61 = vld [vmem:[%s8325_s0 + $0xfd0] sm:$0xff]  ;;  %4765 = vst [vmem:[%s8326_s1 + $0x3d8] sm:$0xff] %v2822_v47  ;;  %4768 = vst [vmem:[%s8326_s1 + $0x6d8] sm:$0xff] %v2830_v48 }
  0xc0   :  { %v4781_v59 = vld [vmem:[%s8325_s0 + $0x7b8] sm:$0xff]  ;;  %v7940_v62 = vld [vmem:[%s8325_s0 + $0x9d0] sm:$0xff]  ;;  %v2862_v0 = vpack.c.bf16 %v4778_v58, %v7755_v16  ;;  %v4787_v3 = vld [vmem:[%s8325_s0 + $0x11c8] sm:$0xff]  ;;  %4771 = vst [vmem:[%s8326_s1 + $0x1d8] sm:$0xff] %v2838_v55 }
  0xc1   :  { %v4784_v60 = vld [vmem:[%s8325_s0 + $0x1b8] sm:$0xff]  ;;  %v7945_v63 = vld [vmem:[%s8325_s0 + $0x3d0] sm:$0xff]  ;;  %v2870_v1 = vpack.c.bf16 %v4781_v59, %v7760_v17  ;;  %v4790_v4 = vld [vmem:[%s8325_s0 + $0xbc8] sm:$0xff]  ;;  %4774 = vst [vmem:[%s8326_s1 + $0x4d8] sm:$0xff] %v2846_v56  ;;  %v2886_v9 = vpack.c.bf16 %v4787_v3, %v7791_v25 }
  0xc2   :  { %v2878_v2 = vpack.c.bf16 %v4784_v60, %v7765_v18  ;;  %v4793_v5 = vld [vmem:[%s8325_s0 + $0x5c8] sm:$0xff]  ;;  %v7971_v6 = vld [vmem:[%s8325_s0 + $0xdd0] sm:$0xff]  ;;  %4777 = vst [vmem:[%s8326_s1 + $0x7d8] sm:$0xff] %v2854_v57  ;;  %v2894_v10 = vpack.c.bf16 %v4790_v4, %v7796_v26  ;;  %v8007_v15 = vld [vmem:[%s8325_s0 + $0x11e0] sm:$0xff] }
  0xc3   :  { %v7976_v7 = vld [vmem:[%s8325_s0 + $0x7d0] sm:$0xff]  ;;  %v2902_v11 = vpack.c.bf16 %v4793_v5, %v7801_v27  ;;  %v4796_v12 = vld [vmem:[%s8325_s0 + $0xfc8] sm:$0xff]  ;;  %v8012_v16 = vld [vmem:[%s8325_s0 + $0xbe0] sm:$0xff]  ;;  %4780 = vst [vmem:[%s8326_s1 + $0x2d8] sm:$0xff] %v2862_v0 }
  0xc4   :  { %v7981_v8 = vld [vmem:[%s8325_s0 + $0x1d0] sm:$0xff]  ;;  %v4799_v13 = vld [vmem:[%s8325_s0 + $0x9c8] sm:$0xff]  ;;  %v8017_v17 = vld [vmem:[%s8325_s0 + $0x5e0] sm:$0xff]  ;;  %4783 = vst [vmem:[%s8326_s1 + $0x5d8] sm:$0xff] %v2870_v1  ;;  %v2910_v18 = vpack.c.bf16 %v4796_v12, %v7827_v34 }
  0xc5   :  { %v4802_v14 = vld [vmem:[%s8325_s0 + $0x3c8] sm:$0xff]  ;;  %4786 = vst [vmem:[%s8326_s1 + $0x8d8] sm:$0xff] %v2878_v2  ;;  %v2918_v19 = vpack.c.bf16 %v4799_v13, %v7832_v35  ;;  %v8043_v24 = vld [vmem:[%s8325_s0 + $0xfe0] sm:$0xff]  ;;  %4789 = vst [vmem:[%s8326_s1 + $0xe0] sm:$0xff] %v2886_v9 }
  0xc6   :  { %v2926_v20 = vpack.c.bf16 %v4802_v14, %v7837_v36  ;;  %v4805_v21 = vld [vmem:[%s8325_s0 + $0xdc8] sm:$0xff]  ;;  %v8048_v25 = vld [vmem:[%s8325_s0 + $0x9e0] sm:$0xff]  ;;  %4792 = vst [vmem:[%s8326_s1 + $0x3e0] sm:$0xff] %v2894_v10  ;;  %4795 = vst [vmem:[%s8326_s1 + $0x6e0] sm:$0xff] %v2902_v11 }
  0xc7   :  { %v4808_v22 = vld [vmem:[%s8325_s0 + $0x7c8] sm:$0xff]  ;;  %v8053_v26 = vld [vmem:[%s8325_s0 + $0x3e0] sm:$0xff]  ;;  %v2934_v27 = vpack.c.bf16 %v4805_v21, %v7863_v43  ;;  %v4814_v30 = vld [vmem:[%s8325_s0 + $0x11d8] sm:$0xff]  ;;  %4798 = vst [vmem:[%s8326_s1 + $0x1e0] sm:$0xff] %v2910_v18 }
  0xc8   :  { %v4811_v23 = vld [vmem:[%s8325_s0 + $0x1c8] sm:$0xff]  ;;  %v2942_v28 = vpack.c.bf16 %v4808_v22, %v7868_v44  ;;  %v4817_v31 = vld [vmem:[%s8325_s0 + $0xbd8] sm:$0xff]  ;;  %v8079_v33 = vld [vmem:[%s8325_s0 + $0xde0] sm:$0xff]  ;;  %4801 = vst [vmem:[%s8326_s1 + $0x4e0] sm:$0xff] %v2918_v19  ;;  %v2958_v36 = vpack.c.bf16 %v4814_v30, %v7899_v52 }
  0xc9   :  { %v2950_v29 = vpack.c.bf16 %v4811_v23, %v7873_v45  ;;  %v4820_v32 = vld [vmem:[%s8325_s0 + $0x5d8] sm:$0xff]  ;;  %v8084_v34 = vld [vmem:[%s8325_s0 + $0x7e0] sm:$0xff]  ;;  %4804 = vst [vmem:[%s8326_s1 + $0x7e0] sm:$0xff] %v2926_v20  ;;  %v2966_v37 = vpack.c.bf16 %v4817_v31, %v7904_v53  ;;  %v8115_v42 = vld [vmem:[%s8325_s0 + $0x11f0] sm:$0xff] }
  0xca   :  { %v8089_v35 = vld [vmem:[%s8325_s0 + $0x1e0] sm:$0xff]  ;;  %v2974_v38 = vpack.c.bf16 %v4820_v32, %v7909_v54  ;;  %v4823_v39 = vld [vmem:[%s8325_s0 + $0xfd8] sm:$0xff]  ;;  %v8120_v43 = vld [vmem:[%s8325_s0 + $0xbf0] sm:$0xff]  ;;  %4807 = vst [vmem:[%s8326_s1 + $0x2e0] sm:$0xff] %v2934_v27 }
  0xcb   :  { %v4826_v40 = vld [vmem:[%s8325_s0 + $0x9d8] sm:$0xff]  ;;  %v8125_v44 = vld [vmem:[%s8325_s0 + $0x5f0] sm:$0xff]  ;;  %4810 = vst [vmem:[%s8326_s1 + $0x5e0] sm:$0xff] %v2942_v28  ;;  %4813 = vst [vmem:[%s8326_s1 + $0x8e0] sm:$0xff] %v2950_v29  ;;  %v2982_v45 = vpack.c.bf16 %v4823_v39, %v7935_v61 }
  0xcc   :  { %v4829_v41 = vld [vmem:[%s8325_s0 + $0x3d8] sm:$0xff]  ;;  %v2990_v46 = vpack.c.bf16 %v4826_v40, %v7940_v62  ;;  %v8151_v51 = vld [vmem:[%s8325_s0 + $0xff0] sm:$0xff]  ;;  %4816 = vst [vmem:[%s8326_s1 + $0xe8] sm:$0xff] %v2958_v36  ;;  %4819 = vst [vmem:[%s8326_s1 + $0x3e8] sm:$0xff] %v2966_v37 }
  0xcd   :  { %v2998_v47 = vpack.c.bf16 %v4829_v41, %v7945_v63  ;;  %v4832_v48 = vld [vmem:[%s8325_s0 + $0xdd8] sm:$0xff]  ;;  %v8156_v52 = vld [vmem:[%s8325_s0 + $0x9f0] sm:$0xff]  ;;  %4822 = vst [vmem:[%s8326_s1 + $0x6e8] sm:$0xff] %v2974_v38  ;;  %v4841_v57 = vld [vmem:[%s8325_s0 + $0x11e8] sm:$0xff] }
  0xce   :  { %v4835_v49 = vld [vmem:[%s8325_s0 + $0x7d8] sm:$0xff]  ;;  %v8161_v53 = vld [vmem:[%s8325_s0 + $0x3f0] sm:$0xff]  ;;  %v3006_v54 = vpack.c.bf16 %v4832_v48, %v7971_v6  ;;  %v4844_v58 = vld [vmem:[%s8325_s0 + $0xbe8] sm:$0xff]  ;;  %4825 = vst [vmem:[%s8326_s1 + $0x1e8] sm:$0xff] %v2982_v45  ;;  %v3030_v63 = vpack.c.bf16 %v4841_v57, %v8007_v15 }
  0xcf   :  { %v4838_v50 = vld [vmem:[%s8325_s0 + $0x1d8] sm:$0xff]  ;;  %v3014_v55 = vpack.c.bf16 %v4835_v49, %v7976_v7  ;;  %v4847_v59 = vld [vmem:[%s8325_s0 + $0x5e8] sm:$0xff]  ;;  %v4028_v60 = vld [vmem:[%s8325_s0 + $0xdf0] sm:$0xff]  ;;  %4828 = vst [vmem:[%s8326_s1 + $0x4e8] sm:$0xff] %v2990_v46  ;;  %v3038_v0 = vpack.c.bf16 %v4844_v58, %v8012_v16 }
  0xd0   :  { %v3022_v56 = vpack.c.bf16 %v4838_v50, %v7981_v8  ;;  %v4029_v61 = vld [vmem:[%s8325_s0 + $0x7f0] sm:$0xff]  ;;  %4831 = vst [vmem:[%s8326_s1 + $0x7e8] sm:$0xff] %v2998_v47  ;;  %v3046_v1 = vpack.c.bf16 %v4847_v59, %v8017_v17  ;;  %v4850_v2 = vld [vmem:[%s8325_s0 + $0xfe8] sm:$0xff]  ;;  %4834 = vst [vmem:[%s8326_s1 + $0x2e8] sm:$0xff] %v3006_v54 }
  0xd1   :  { %v4030_v62 = vld [vmem:[%s8325_s0 + $0x1f0] sm:$0xff]  ;;  %v4853_v3 = vld [vmem:[%s8325_s0 + $0x9e8] sm:$0xff]  ;;  %4837 = vst [vmem:[%s8326_s1 + $0x5e8] sm:$0xff] %v3014_v55  ;;  %v3054_v5 = vpack.c.bf16 %v4850_v2, %v8043_v24  ;;  %4843 = vst [vmem:[%s8326_s1 + $0xf0] sm:$0xff] %v3030_v63 }
  0xd2   :  { %v4856_v4 = vld [vmem:[%s8325_s0 + $0x3e8] sm:$0xff]  ;;  %4840 = vst [vmem:[%s8326_s1 + $0x8e8] sm:$0xff] %v3022_v56  ;;  %v3062_v6 = vpack.c.bf16 %v4853_v3, %v8048_v25  ;;  %4846 = vst [vmem:[%s8326_s1 + $0x3f0] sm:$0xff] %v3038_v0  ;;  %v4868_v14 = vld [vmem:[%s8325_s0 + $0x11f8] sm:$0xff] }
  0xd3   :  { %v3070_v7 = vpack.c.bf16 %v4856_v4, %v8053_v26  ;;  %v4859_v8 = vld [vmem:[%s8325_s0 + $0xde8] sm:$0xff]  ;;  %4849 = vst [vmem:[%s8326_s1 + $0x6f0] sm:$0xff] %v3046_v1  ;;  %v4871_v15 = vld [vmem:[%s8325_s0 + $0xbf8] sm:$0xff]  ;;  %4852 = vst [vmem:[%s8326_s1 + $0x1f0] sm:$0xff] %v3054_v5  ;;  %v3102_v17 = vpack.c.bf16 %v4868_v14, %v8115_v42 }
  0xd4   :  { %v4862_v9 = vld [vmem:[%s8325_s0 + $0x7e8] sm:$0xff]  ;;  %v3078_v11 = vpack.c.bf16 %v4859_v8, %v8079_v33  ;;  %v4874_v16 = vld [vmem:[%s8325_s0 + $0x5f8] sm:$0xff]  ;;  %4855 = vst [vmem:[%s8326_s1 + $0x4f0] sm:$0xff] %v3062_v6  ;;  %v3110_v18 = vpack.c.bf16 %v4871_v15, %v8120_v43 }
  0xd5   :  { %v4865_v10 = vld [vmem:[%s8325_s0 + $0x1e8] sm:$0xff]  ;;  %v3086_v12 = vpack.c.bf16 %v4862_v9, %v8084_v34  ;;  %4858 = vst [vmem:[%s8326_s1 + $0x7f0] sm:$0xff] %v3070_v7  ;;  %v3118_v19 = vpack.c.bf16 %v4874_v16, %v8125_v44  ;;  %v4877_v20 = vld [vmem:[%s8325_s0 + $0xff8] sm:$0xff]  ;;  %4870 = vst [vmem:[%s8326_s1 + $0xf8] sm:$0xff] %v3102_v17 }
  0xd6   :  { %v3094_v13 = vpack.c.bf16 %v4865_v10, %v8089_v35  ;;  %v4880_v21 = vld [vmem:[%s8325_s0 + $0x9f8] sm:$0xff]  ;;  %4861 = vst [vmem:[%s8326_s1 + $0x2f0] sm:$0xff] %v3078_v11  ;;  %v3126_v23 = vpack.c.bf16 %v4877_v20, %v8151_v51  ;;  %4873 = vst [vmem:[%s8326_s1 + $0x3f8] sm:$0xff] %v3110_v18 }
  0xd7   :  { %v4883_v22 = vld [vmem:[%s8325_s0 + $0x3f8] sm:$0xff]  ;;  %4864 = vst [vmem:[%s8326_s1 + $0x5f0] sm:$0xff] %v3086_v12  ;;  %v3134_v24 = vpack.c.bf16 %v4880_v21, %v8156_v52  ;;  %4876 = vst [vmem:[%s8326_s1 + $0x6f8] sm:$0xff] %v3118_v19 }
  0xd8   :  { %4867 = vst [vmem:[%s8326_s1 + $0x8f0] sm:$0xff] %v3094_v13  ;;  %v3142_v25 = vpack.c.bf16 %v4883_v22, %v8161_v53  ;;  %v4886_v26 = vld [vmem:[%s8325_s0 + $0xdf8] sm:$0xff]  ;;  %4879 = vst [vmem:[%s8326_s1 + $0x1f8] sm:$0xff] %v3126_v23 }
  0xd9   :  { %v4889_v27 = vld [vmem:[%s8325_s0 + $0x7f8] sm:$0xff]  ;;  %v3150_v29 = vpack.c.bf16 %v4886_v26, %v4028_v60  ;;  %4882 = vst [vmem:[%s8326_s1 + $0x4f8] sm:$0xff] %v3134_v24 }
  0xda   :  { %v4892_v28 = vld [vmem:[%s8325_s0 + $0x1f8] sm:$0xff]  ;;  %v3158_v30 = vpack.c.bf16 %v4889_v27, %v4029_v61  ;;  %4885 = vst [vmem:[%s8326_s1 + $0x7f8] sm:$0xff] %v3142_v25 }
  0xdb   :  { %v3166_v31 = vpack.c.bf16 %v4892_v28, %v4030_v62  ;;  %4888 = vst [vmem:[%s8326_s1 + $0x2f8] sm:$0xff] %v3150_v29 }
  0xdc   :  { %4891 = vst [vmem:[%s8326_s1 + $0x5f8] sm:$0xff] %v3158_v30 }
  0xdd   :  { %4894 = vst [vmem:[%s8326_s1 + $0x8f8] sm:$0xff] %v3166_v31 }

// kernel: reverse.5
= control target key start
LH: loop header
LB: loop body
LE: loop exit
PB: predicated region body
PF: predicated region fallthrough
CT: control target
= control target key end

     0   :  { %s10166_s6 = smov 0   ;;  %s10168_s7 = smov 0   ;;  %s13587_s0 = inlined_call_operand.vmem [shape: f32[512,512,3,3], index: 0, kind: input, shape index: {}]   ;;  %s13588_s1 = inlined_call_operand.vmem [shape: bf16[512,512,3,3], index: 1, kind: output, shape index: {}]  }
   0x1   :  { %s10170_s8 = smov 0  }
   0x2 LB: > { %s25_s9 = sadd.s32 1, %s10150_s7  ;;  %p7794_p0 = scmp.ge.s32.totalorder %s10154_s8, 1  ;;  %s10154_s8 = sphi %s10170_s8, %s7_s8   ;;  %s10150_s7 = sphi %s10168_s7, %s13590_s7   ;;  %s10146_s6 = sphi %s10166_s6, %s13589_s6  }
   0x3   : > { %p27_p1 = scmp.ge.s32.totalorder %s25_s9, 2  ;;  %p77_p2 = scmp.lt.s32.totalorder %s10154_s8, 3 }
   0x5   : > { %s13592_s9 = smov (%p27_p1, %s25_s9), 0  ;;  %p78_p3 = pnand %p7794_p0, %p77_p2 }
   0x6   : > { %s7795_s10 = sshll.u32 (!%p78_p3), %s10146_s6, 5 }
   0x7   : > { %81 = sbr.rel (%p78_p3) target bundleno = 590 (0x24e), region = 20  ;;  %p139_p4 = scmp.lt.s32.totalorder (!%p78_p3), %s7795_s10, 63 }
   0xe   : > { %s13594_s10 = smov (!%p139_p4, %s7795_s10), 63 }
   0xf   : > { %s10106_s11 = sshll.u32 %s13594_s10, 5  ;;  %s10107_s15 = sshll.u32 %s13594_s10, 4 }
  0x10   : > { %s10187_s14 = scalar_lea.vmem %s13587_s0, %s10106_s11  ;;  %s10210_s18 = scalar_lea.vmem %s13588_s1, %s10107_s15 }
  0x11   : > { %v7801_v0 = vld [vmem:[%s10187_s14 + $0x4000] sm:$0xff]  ;;  %v8088_v15 = vld [vmem:[%s10187_s14 + $0x4008] sm:$0xff] }
  0x12   : > { %v7802_v1 = vld [vmem:[%s10187_s14 + $0x2800] sm:$0xff]  ;;  %v8091_v16 = vld [vmem:[%s10187_s14 + $0x2808] sm:$0xff]  ;;  %v1049_v21 = vpack.c.bf16 %v8088_v15, %v7801_v0 }
  0x13   : > { %v7803_v2 = vld [vmem:[%s10187_s14 + $0x1000] sm:$0xff]  ;;  %v8094_v17 = vld [vmem:[%s10187_s14 + $0x1008] sm:$0xff]  ;;  %v1057_v22 = vpack.c.bf16 %v8091_v16, %v7802_v1 }
  0x14   : > { %v7804_v3 = vld [vmem:[%s10187_s14 + $0x3800] sm:$0xff]  ;;  %v1065_v23 = vpack.c.bf16 %v8094_v17, %v7803_v2  ;;  %v8097_v24 = vld [vmem:[%s10187_s14 + $0x3808] sm:$0xff]  ;;  %8090 = vst [vmem:[%s10210_s18] sm:$0xff] %v1049_v21 }
  0x15   : > { %v7805_v4 = vld [vmem:[%s10187_s14 + $0x2000] sm:$0xff]  ;;  %v8100_v25 = vld [vmem:[%s10187_s14 + $0x2008] sm:$0xff]  ;;  %v1073_v30 = vpack.c.bf16 %v8097_v24, %v7804_v3  ;;  %8093 = vst [vmem:[%s10210_s18 + $0xc00] sm:$0xff] %v1057_v22 }
  0x16   : > { %v7806_v5 = vld [vmem:[%s10187_s14 + $0x800] sm:$0xff]  ;;  %v8103_v26 = vld [vmem:[%s10187_s14 + $0x808] sm:$0xff]  ;;  %v1081_v31 = vpack.c.bf16 %v8100_v25, %v7805_v4  ;;  %8096 = vst [vmem:[%s10210_s18 + $0x1800] sm:$0xff] %v1065_v23 }
  0x17   : > { %v7807_v6 = vld [vmem:[%s10187_s14 + $0x3000] sm:$0xff]  ;;  %v1089_v32 = vpack.c.bf16 %v8103_v26, %v7806_v5  ;;  %v8106_v33 = vld [vmem:[%s10187_s14 + $0x3008] sm:$0xff]  ;;  %8099 = vst [vmem:[%s10210_s18 + $0x400] sm:$0xff] %v1073_v30 }
  0x18   : > { %v7808_v7 = vld [vmem:[%s10187_s14 + $0x1800] sm:$0xff]  ;;  %v8109_v34 = vld [vmem:[%s10187_s14 + $0x1808] sm:$0xff]  ;;  %v1097_v39 = vpack.c.bf16 %v8106_v33, %v7807_v6  ;;  %8102 = vst [vmem:[%s10210_s18 + $0x1000] sm:$0xff] %v1081_v31 }
  0x19   : > { %v204_v8 = vld [vmem:[%s10187_s14] sm:$0xff]  ;;  %v8112_v35 = vld [vmem:[%s10187_s14 + $0x8] sm:$0xff]  ;;  %v1105_v40 = vpack.c.bf16 %v8109_v34, %v7808_v7  ;;  %8105 = vst [vmem:[%s10210_s18 + $0x1c00] sm:$0xff] %v1089_v32 }
  0x1a   : > { %v10199_v9 = vld [vmem:[%s10187_s14 + $0x4020] sm:$0xff]  ;;  %v1113_v41 = vpack.c.bf16 %v8112_v35, %v204_v8  ;;  %v8115_v42 = vld [vmem:[%s10187_s14 + $0x4028] sm:$0xff]  ;;  %8108 = vst [vmem:[%s10210_s18 + $0x800] sm:$0xff] %v1097_v39 }
  0x1b   : > { %v10202_v10 = vld [vmem:[%s10187_s14 + $0x2820] sm:$0xff]  ;;  %v8118_v43 = vld [vmem:[%s10187_s14 + $0x2828] sm:$0xff]  ;;  %v1121_v48 = vpack.c.bf16 %v8115_v42, %v10199_v9  ;;  %8111 = vst [vmem:[%s10210_s18 + $0x1400] sm:$0xff] %v1105_v40 }
  0x1c   : > { %v10205_v11 = vld [vmem:[%s10187_s14 + $0x1020] sm:$0xff]  ;;  %v8121_v44 = vld [vmem:[%s10187_s14 + $0x1028] sm:$0xff]  ;;  %v1129_v49 = vpack.c.bf16 %v8118_v43, %v10202_v10  ;;  %8114 = vst [vmem:[%s10210_s18 + $0x2000] sm:$0xff] %v1113_v41 }
  0x1d   : > { %v10213_v12 = vld [vmem:[%s10187_s14 + $0x3820] sm:$0xff]  ;;  %v1137_v50 = vpack.c.bf16 %v8121_v44, %v10205_v11  ;;  %v8124_v51 = vld [vmem:[%s10187_s14 + $0x3828] sm:$0xff]  ;;  %8117 = vst [vmem:[%s10210_s18 + $0x10] sm:$0xff] %v1121_v48 }
  0x1e   : > { %v10216_v13 = vld [vmem:[%s10187_s14 + $0x2020] sm:$0xff]  ;;  %v8127_v52 = vld [vmem:[%s10187_s14 + $0x2028] sm:$0xff]  ;;  %v1145_v57 = vpack.c.bf16 %v8124_v51, %v10213_v12  ;;  %8120 = vst [vmem:[%s10210_s18 + $0xc10] sm:$0xff] %v1129_v49 }
  0x1f   : > { %v10219_v14 = vld [vmem:[%s10187_s14 + $0x820] sm:$0xff]  ;;  %v8130_v53 = vld [vmem:[%s10187_s14 + $0x828] sm:$0xff]  ;;  %v1153_v58 = vpack.c.bf16 %v8127_v52, %v10216_v13  ;;  %8123 = vst [vmem:[%s10210_s18 + $0x1810] sm:$0xff] %v1137_v50 }
  0x20   : > { %v10225_v18 = vld [vmem:[%s10187_s14 + $0x3020] sm:$0xff]  ;;  %v1161_v59 = vpack.c.bf16 %v8130_v53, %v10219_v14  ;;  %v8133_v60 = vld [vmem:[%s10187_s14 + $0x3028] sm:$0xff]  ;;  %8126 = vst [vmem:[%s10210_s18 + $0x410] sm:$0xff] %v1145_v57 }
  0x21   : > { %v10228_v19 = vld [vmem:[%s10187_s14 + $0x1820] sm:$0xff]  ;;  %v8136_v61 = vld [vmem:[%s10187_s14 + $0x1828] sm:$0xff]  ;;  %v1169_v2 = vpack.c.bf16 %v8133_v60, %v10225_v18  ;;  %8129 = vst [vmem:[%s10210_s18 + $0x1010] sm:$0xff] %v1153_v58 }
  0x22   : > { %v10231_v20 = vld [vmem:[%s10187_s14 + $0x20] sm:$0xff]  ;;  %v8139_v62 = vld [vmem:[%s10187_s14 + $0x28] sm:$0xff]  ;;  %v1177_v3 = vpack.c.bf16 %v8136_v61, %v10228_v19  ;;  %8132 = vst [vmem:[%s10210_s18 + $0x1c10] sm:$0xff] %v1161_v59 }
  0x23   : > { %v10237_v27 = vld [vmem:[%s10187_s14 + $0x4040] sm:$0xff]  ;;  %v1185_v4 = vpack.c.bf16 %v8139_v62, %v10231_v20  ;;  %v8142_v5 = vld [vmem:[%s10187_s14 + $0x4048] sm:$0xff]  ;;  %8135 = vst [vmem:[%s10210_s18 + $0x810] sm:$0xff] %v1169_v2 }
  0x24   : > { %v10240_v28 = vld [vmem:[%s10187_s14 + $0x2840] sm:$0xff]  ;;  %v8145_v6 = vld [vmem:[%s10187_s14 + $0x2848] sm:$0xff]  ;;  %v1193_v11 = vpack.c.bf16 %v8142_v5, %v10237_v27  ;;  %8138 = vst [vmem:[%s10210_s18 + $0x1410] sm:$0xff] %v1177_v3 }
  0x25   : > { %v10243_v29 = vld [vmem:[%s10187_s14 + $0x1040] sm:$0xff]  ;;  %v8148_v7 = vld [vmem:[%s10187_s14 + $0x1048] sm:$0xff]  ;;  %v1201_v12 = vpack.c.bf16 %v8145_v6, %v10240_v28  ;;  %8141 = vst [vmem:[%s10210_s18 + $0x2010] sm:$0xff] %v1185_v4 }
  0x26   : > { %v10249_v36 = vld [vmem:[%s10187_s14 + $0x3840] sm:$0xff]  ;;  %v1209_v13 = vpack.c.bf16 %v8148_v7, %v10243_v29  ;;  %v8151_v14 = vld [vmem:[%s10187_s14 + $0x3848] sm:$0xff]  ;;  %8144 = vst [vmem:[%s10210_s18 + $0x20] sm:$0xff] %v1193_v11 }
  0x27   : > { %v10252_v37 = vld [vmem:[%s10187_s14 + $0x2040] sm:$0xff]  ;;  %v8154_v15 = vld [vmem:[%s10187_s14 + $0x2048] sm:$0xff]  ;;  %v1217_v20 = vpack.c.bf16 %v8151_v14, %v10249_v36  ;;  %8147 = vst [vmem:[%s10210_s18 + $0xc20] sm:$0xff] %v1201_v12 }
  0x28   : > { %v10255_v38 = vld [vmem:[%s10187_s14 + $0x840] sm:$0xff]  ;;  %v8157_v16 = vld [vmem:[%s10187_s14 + $0x848] sm:$0xff]  ;;  %v1225_v21 = vpack.c.bf16 %v8154_v15, %v10252_v37  ;;  %8150 = vst [vmem:[%s10210_s18 + $0x1820] sm:$0xff] %v1209_v13 }
  0x29   : > { %v10264_v45 = vld [vmem:[%s10187_s14 + $0x3040] sm:$0xff]  ;;  %v1233_v22 = vpack.c.bf16 %v8157_v16, %v10255_v38  ;;  %v8160_v23 = vld [vmem:[%s10187_s14 + $0x3048] sm:$0xff]  ;;  %8153 = vst [vmem:[%s10210_s18 + $0x420] sm:$0xff] %v1217_v20 }
  0x2a   : > { %v10267_v46 = vld [vmem:[%s10187_s14 + $0x1840] sm:$0xff]  ;;  %v8163_v24 = vld [vmem:[%s10187_s14 + $0x1848] sm:$0xff]  ;;  %v1241_v29 = vpack.c.bf16 %v8160_v23, %v10264_v45  ;;  %8156 = vst [vmem:[%s10210_s18 + $0x1020] sm:$0xff] %v1225_v21 }
  0x2b   : > { %v10270_v47 = vld [vmem:[%s10187_s14 + $0x40] sm:$0xff]  ;;  %v8166_v25 = vld [vmem:[%s10187_s14 + $0x48] sm:$0xff]  ;;  %v1249_v30 = vpack.c.bf16 %v8163_v24, %v10267_v46  ;;  %8159 = vst [vmem:[%s10210_s18 + $0x1c20] sm:$0xff] %v1233_v22 }
  0x2c   : > { %v10282_v54 = vld [vmem:[%s10187_s14 + $0x4060] sm:$0xff]  ;;  %v1257_v31 = vpack.c.bf16 %v8166_v25, %v10270_v47  ;;  %v8169_v32 = vld [vmem:[%s10187_s14 + $0x4068] sm:$0xff]  ;;  %8162 = vst [vmem:[%s10210_s18 + $0x820] sm:$0xff] %v1241_v29 }
  0x2d   : > { %v10285_v55 = vld [vmem:[%s10187_s14 + $0x2860] sm:$0xff]  ;;  %v8172_v33 = vld [vmem:[%s10187_s14 + $0x2868] sm:$0xff]  ;;  %v1265_v38 = vpack.c.bf16 %v8169_v32, %v10282_v54  ;;  %8165 = vst [vmem:[%s10210_s18 + $0x1420] sm:$0xff] %v1249_v30 }
  0x2e   : > { %v10288_v56 = vld [vmem:[%s10187_s14 + $0x1060] sm:$0xff]  ;;  %v8175_v34 = vld [vmem:[%s10187_s14 + $0x1068] sm:$0xff]  ;;  %v1273_v39 = vpack.c.bf16 %v8172_v33, %v10285_v55  ;;  %8168 = vst [vmem:[%s10210_s18 + $0x2020] sm:$0xff] %v1257_v31 }
  0x2f   : > { %v10300_v63 = vld [vmem:[%s10187_s14 + $0x3860] sm:$0xff]  ;;  %v1281_v40 = vpack.c.bf16 %v8175_v34, %v10288_v56  ;;  %v8178_v41 = vld [vmem:[%s10187_s14 + $0x3868] sm:$0xff]  ;;  %8171 = vst [vmem:[%s10210_s18 + $0x30] sm:$0xff] %v1265_v38 }
  0x30   : > { %v10303_v0 = vld [vmem:[%s10187_s14 + $0x2060] sm:$0xff]  ;;  %v8181_v42 = vld [vmem:[%s10187_s14 + $0x2068] sm:$0xff]  ;;  %v1289_v47 = vpack.c.bf16 %v8178_v41, %v10300_v63  ;;  %8174 = vst [vmem:[%s10210_s18 + $0xc30] sm:$0xff] %v1273_v39 }
  0x31   : > { %v10306_v1 = vld [vmem:[%s10187_s14 + $0x860] sm:$0xff]  ;;  %v8184_v43 = vld [vmem:[%s10187_s14 + $0x868] sm:$0xff]  ;;  %v1297_v48 = vpack.c.bf16 %v8181_v42, %v10303_v0  ;;  %8177 = vst [vmem:[%s10210_s18 + $0x1830] sm:$0xff] %v1281_v40 }
  0x32   : > { %v10318_v8 = vld [vmem:[%s10187_s14 + $0x3060] sm:$0xff]  ;;  %v1305_v49 = vpack.c.bf16 %v8184_v43, %v10306_v1  ;;  %v8187_v50 = vld [vmem:[%s10187_s14 + $0x3068] sm:$0xff]  ;;  %8180 = vst [vmem:[%s10210_s18 + $0x430] sm:$0xff] %v1289_v47 }
  0x33   : > { %v10321_v9 = vld [vmem:[%s10187_s14 + $0x1860] sm:$0xff]  ;;  %v8190_v51 = vld [vmem:[%s10187_s14 + $0x1868] sm:$0xff]  ;;  %v1313_v56 = vpack.c.bf16 %v8187_v50, %v10318_v8  ;;  %8183 = vst [vmem:[%s10210_s18 + $0x1030] sm:$0xff] %v1297_v48 }
  0x34   : > { %v10324_v10 = vld [vmem:[%s10187_s14 + $0x60] sm:$0xff]  ;;  %v8193_v52 = vld [vmem:[%s10187_s14 + $0x68] sm:$0xff]  ;;  %v1321_v57 = vpack.c.bf16 %v8190_v51, %v10321_v9  ;;  %8186 = vst [vmem:[%s10210_s18 + $0x1c30] sm:$0xff] %v1305_v49 }
  0x35   : > { %v10336_v17 = vld [vmem:[%s10187_s14 + $0x4080] sm:$0xff]  ;;  %v1329_v58 = vpack.c.bf16 %v8193_v52, %v10324_v10  ;;  %v8196_v59 = vld [vmem:[%s10187_s14 + $0x4088] sm:$0xff]  ;;  %8189 = vst [vmem:[%s10210_s18 + $0x830] sm:$0xff] %v1313_v56 }
  0x36   : > { %v10339_v18 = vld [vmem:[%s10187_s14 + $0x2880] sm:$0xff]  ;;  %v8199_v60 = vld [vmem:[%s10187_s14 + $0x2888] sm:$0xff]  ;;  %v1337_v1 = vpack.c.bf16 %v8196_v59, %v10336_v17  ;;  %8192 = vst [vmem:[%s10210_s18 + $0x1430] sm:$0xff] %v1321_v57 }
  0x37   : > { %v10342_v19 = vld [vmem:[%s10187_s14 + $0x1080] sm:$0xff]  ;;  %v8202_v61 = vld [vmem:[%s10187_s14 + $0x1088] sm:$0xff]  ;;  %v1345_v2 = vpack.c.bf16 %v8199_v60, %v10339_v18  ;;  %8195 = vst [vmem:[%s10210_s18 + $0x2030] sm:$0xff] %v1329_v58 }
  0x38   : > { %v10354_v26 = vld [vmem:[%s10187_s14 + $0x3880] sm:$0xff]  ;;  %v1353_v3 = vpack.c.bf16 %v8202_v61, %v10342_v19  ;;  %v8205_v4 = vld [vmem:[%s10187_s14 + $0x3888] sm:$0xff]  ;;  %8198 = vst [vmem:[%s10210_s18 + $0x40] sm:$0xff] %v1337_v1 }
  0x39   : > { %v10357_v27 = vld [vmem:[%s10187_s14 + $0x2080] sm:$0xff]  ;;  %v8208_v5 = vld [vmem:[%s10187_s14 + $0x2088] sm:$0xff]  ;;  %v1361_v10 = vpack.c.bf16 %v8205_v4, %v10354_v26  ;;  %8201 = vst [vmem:[%s10210_s18 + $0xc40] sm:$0xff] %v1345_v2 }
  0x3a   : > { %v10360_v28 = vld [vmem:[%s10187_s14 + $0x880] sm:$0xff]  ;;  %v8211_v6 = vld [vmem:[%s10187_s14 + $0x888] sm:$0xff]  ;;  %v1369_v11 = vpack.c.bf16 %v8208_v5, %v10357_v27  ;;  %8204 = vst [vmem:[%s10210_s18 + $0x1840] sm:$0xff] %v1353_v3 }
  0x3b   : > { %v10372_v35 = vld [vmem:[%s10187_s14 + $0x3080] sm:$0xff]  ;;  %v1377_v12 = vpack.c.bf16 %v8211_v6, %v10360_v28  ;;  %v8214_v13 = vld [vmem:[%s10187_s14 + $0x3088] sm:$0xff]  ;;  %8207 = vst [vmem:[%s10210_s18 + $0x440] sm:$0xff] %v1361_v10 }
  0x3c   : > { %v10375_v36 = vld [vmem:[%s10187_s14 + $0x1880] sm:$0xff]  ;;  %v8217_v14 = vld [vmem:[%s10187_s14 + $0x1888] sm:$0xff]  ;;  %v1385_v19 = vpack.c.bf16 %v8214_v13, %v10372_v35  ;;  %8210 = vst [vmem:[%s10210_s18 + $0x1040] sm:$0xff] %v1369_v11 }
  0x3d   : > { %v10378_v37 = vld [vmem:[%s10187_s14 + $0x80] sm:$0xff]  ;;  %v8220_v15 = vld [vmem:[%s10187_s14 + $0x88] sm:$0xff]  ;;  %v1393_v20 = vpack.c.bf16 %v8217_v14, %v10375_v36  ;;  %8213 = vst [vmem:[%s10210_s18 + $0x1c40] sm:$0xff] %v1377_v12 }
  0x3e   : > { %v10390_v44 = vld [vmem:[%s10187_s14 + $0x40a0] sm:$0xff]  ;;  %v1401_v21 = vpack.c.bf16 %v8220_v15, %v10378_v37  ;;  %v8223_v22 = vld [vmem:[%s10187_s14 + $0x40a8] sm:$0xff]  ;;  %8216 = vst [vmem:[%s10210_s18 + $0x840] sm:$0xff] %v1385_v19 }
  0x3f   : > { %v10393_v45 = vld [vmem:[%s10187_s14 + $0x28a0] sm:$0xff]  ;;  %v8226_v23 = vld [vmem:[%s10187_s14 + $0x28a8] sm:$0xff]  ;;  %v1409_v28 = vpack.c.bf16 %v8223_v22, %v10390_v44  ;;  %8219 = vst [vmem:[%s10210_s18 + $0x1440] sm:$0xff] %v1393_v20 }
  0x40   : > { %v10396_v46 = vld [vmem:[%s10187_s14 + $0x10a0] sm:$0xff]  ;;  %v8229_v24 = vld [vmem:[%s10187_s14 + $0x10a8] sm:$0xff]  ;;  %v1417_v29 = vpack.c.bf16 %v8226_v23, %v10393_v45  ;;  %8222 = vst [vmem:[%s10210_s18 + $0x2040] sm:$0xff] %v1401_v21 }
  0x41   : > { %v10408_v53 = vld [vmem:[%s10187_s14 + $0x38a0] sm:$0xff]  ;;  %v1425_v30 = vpack.c.bf16 %v8229_v24, %v10396_v46  ;;  %v8232_v31 = vld [vmem:[%s10187_s14 + $0x38a8] sm:$0xff]  ;;  %8225 = vst [vmem:[%s10210_s18 + $0x50] sm:$0xff] %v1409_v28 }
  0x42   : > { %v10411_v54 = vld [vmem:[%s10187_s14 + $0x20a0] sm:$0xff]  ;;  %v8235_v32 = vld [vmem:[%s10187_s14 + $0x20a8] sm:$0xff]  ;;  %v1433_v37 = vpack.c.bf16 %v8232_v31, %v10408_v53  ;;  %8228 = vst [vmem:[%s10210_s18 + $0xc50] sm:$0xff] %v1417_v29 }
  0x43   : > { %v10414_v55 = vld [vmem:[%s10187_s14 + $0x8a0] sm:$0xff]  ;;  %v8238_v33 = vld [vmem:[%s10187_s14 + $0x8a8] sm:$0xff]  ;;  %v1441_v38 = vpack.c.bf16 %v8235_v32, %v10411_v54  ;;  %8231 = vst [vmem:[%s10210_s18 + $0x1850] sm:$0xff] %v1425_v30 }
  0x44   : > { %v10426_v62 = vld [vmem:[%s10187_s14 + $0x30a0] sm:$0xff]  ;;  %v1449_v39 = vpack.c.bf16 %v8238_v33, %v10414_v55  ;;  %v8241_v40 = vld [vmem:[%s10187_s14 + $0x30a8] sm:$0xff]  ;;  %8234 = vst [vmem:[%s10210_s18 + $0x450] sm:$0xff] %v1433_v37 }
  0x45   : > { %v10429_v63 = vld [vmem:[%s10187_s14 + $0x18a0] sm:$0xff]  ;;  %v8244_v41 = vld [vmem:[%s10187_s14 + $0x18a8] sm:$0xff]  ;;  %v1457_v46 = vpack.c.bf16 %v8241_v40, %v10426_v62  ;;  %8237 = vst [vmem:[%s10210_s18 + $0x1050] sm:$0xff] %v1441_v38 }
  0x46   : > { %v10432_v0 = vld [vmem:[%s10187_s14 + $0xa0] sm:$0xff]  ;;  %v8247_v42 = vld [vmem:[%s10187_s14 + $0xa8] sm:$0xff]  ;;  %v1465_v47 = vpack.c.bf16 %v8244_v41, %v10429_v63  ;;  %8240 = vst [vmem:[%s10210_s18 + $0x1c50] sm:$0xff] %v1449_v39 }
  0x47   : > { %v10444_v7 = vld [vmem:[%s10187_s14 + $0x40c0] sm:$0xff]  ;;  %v1473_v48 = vpack.c.bf16 %v8247_v42, %v10432_v0  ;;  %v8250_v49 = vld [vmem:[%s10187_s14 + $0x40c8] sm:$0xff]  ;;  %8243 = vst [vmem:[%s10210_s18 + $0x850] sm:$0xff] %v1457_v46 }
  0x48   : > { %v10447_v8 = vld [vmem:[%s10187_s14 + $0x28c0] sm:$0xff]  ;;  %v8253_v50 = vld [vmem:[%s10187_s14 + $0x28c8] sm:$0xff]  ;;  %v1481_v55 = vpack.c.bf16 %v8250_v49, %v10444_v7  ;;  %8246 = vst [vmem:[%s10210_s18 + $0x1450] sm:$0xff] %v1465_v47 }
  0x49   : > { %v10450_v9 = vld [vmem:[%s10187_s14 + $0x10c0] sm:$0xff]  ;;  %v8256_v51 = vld [vmem:[%s10187_s14 + $0x10c8] sm:$0xff]  ;;  %v1489_v56 = vpack.c.bf16 %v8253_v50, %v10447_v8  ;;  %8249 = vst [vmem:[%s10210_s18 + $0x2050] sm:$0xff] %v1473_v48 }
  0x4a   : > { %v10462_v16 = vld [vmem:[%s10187_s14 + $0x38c0] sm:$0xff]  ;;  %v1497_v57 = vpack.c.bf16 %v8256_v51, %v10450_v9  ;;  %v8259_v58 = vld [vmem:[%s10187_s14 + $0x38c8] sm:$0xff]  ;;  %8252 = vst [vmem:[%s10210_s18 + $0x60] sm:$0xff] %v1481_v55 }
  0x4b   : > { %v10465_v17 = vld [vmem:[%s10187_s14 + $0x20c0] sm:$0xff]  ;;  %v8262_v59 = vld [vmem:[%s10187_s14 + $0x20c8] sm:$0xff]  ;;  %v1505_v0 = vpack.c.bf16 %v8259_v58, %v10462_v16  ;;  %8255 = vst [vmem:[%s10210_s18 + $0xc60] sm:$0xff] %v1489_v56 }
  0x4c   : > { %v10468_v18 = vld [vmem:[%s10187_s14 + $0x8c0] sm:$0xff]  ;;  %v8265_v60 = vld [vmem:[%s10187_s14 + $0x8c8] sm:$0xff]  ;;  %v1513_v1 = vpack.c.bf16 %v8262_v59, %v10465_v17  ;;  %8258 = vst [vmem:[%s10210_s18 + $0x1860] sm:$0xff] %v1497_v57 }
  0x4d   : > { %v10480_v25 = vld [vmem:[%s10187_s14 + $0x30c0] sm:$0xff]  ;;  %v1521_v2 = vpack.c.bf16 %v8265_v60, %v10468_v18  ;;  %v8268_v3 = vld [vmem:[%s10187_s14 + $0x30c8] sm:$0xff]  ;;  %8261 = vst [vmem:[%s10210_s18 + $0x460] sm:$0xff] %v1505_v0 }
  0x4e   : > { %v10483_v26 = vld [vmem:[%s10187_s14 + $0x18c0] sm:$0xff]  ;;  %v8271_v4 = vld [vmem:[%s10187_s14 + $0x18c8] sm:$0xff]  ;;  %v1529_v9 = vpack.c.bf16 %v8268_v3, %v10480_v25  ;;  %8264 = vst [vmem:[%s10210_s18 + $0x1060] sm:$0xff] %v1513_v1 }
  0x4f   : > { %v10486_v27 = vld [vmem:[%s10187_s14 + $0xc0] sm:$0xff]  ;;  %v8274_v5 = vld [vmem:[%s10187_s14 + $0xc8] sm:$0xff]  ;;  %v1537_v10 = vpack.c.bf16 %v8271_v4, %v10483_v26  ;;  %8267 = vst [vmem:[%s10210_s18 + $0x1c60] sm:$0xff] %v1521_v2 }
  0x50   : > { %v10498_v34 = vld [vmem:[%s10187_s14 + $0x40e0] sm:$0xff]  ;;  %v1545_v11 = vpack.c.bf16 %v8274_v5, %v10486_v27  ;;  %v8277_v12 = vld [vmem:[%s10187_s14 + $0x40e8] sm:$0xff]  ;;  %8270 = vst [vmem:[%s10210_s18 + $0x860] sm:$0xff] %v1529_v9 }
  0x51   : > { %v10501_v35 = vld [vmem:[%s10187_s14 + $0x28e0] sm:$0xff]  ;;  %v8280_v13 = vld [vmem:[%s10187_s14 + $0x28e8] sm:$0xff]  ;;  %v1553_v18 = vpack.c.bf16 %v8277_v12, %v10498_v34  ;;  %8273 = vst [vmem:[%s10210_s18 + $0x1460] sm:$0xff] %v1537_v10 }
  0x52   : > { %v10504_v36 = vld [vmem:[%s10187_s14 + $0x10e0] sm:$0xff]  ;;  %v8283_v14 = vld [vmem:[%s10187_s14 + $0x10e8] sm:$0xff]  ;;  %v1561_v19 = vpack.c.bf16 %v8280_v13, %v10501_v35  ;;  %8276 = vst [vmem:[%s10210_s18 + $0x2060] sm:$0xff] %v1545_v11 }
  0x53   : > { %v10516_v43 = vld [vmem:[%s10187_s14 + $0x38e0] sm:$0xff]  ;;  %v1569_v20 = vpack.c.bf16 %v8283_v14, %v10504_v36  ;;  %v8286_v21 = vld [vmem:[%s10187_s14 + $0x38e8] sm:$0xff]  ;;  %8279 = vst [vmem:[%s10210_s18 + $0x70] sm:$0xff] %v1553_v18 }
  0x54   : > { %v10519_v44 = vld [vmem:[%s10187_s14 + $0x20e0] sm:$0xff]  ;;  %v8289_v22 = vld [vmem:[%s10187_s14 + $0x20e8] sm:$0xff]  ;;  %v1577_v27 = vpack.c.bf16 %v8286_v21, %v10516_v43  ;;  %8282 = vst [vmem:[%s10210_s18 + $0xc70] sm:$0xff] %v1561_v19 }
  0x55   : > { %v10522_v45 = vld [vmem:[%s10187_s14 + $0x8e0] sm:$0xff]  ;;  %v8292_v23 = vld [vmem:[%s10187_s14 + $0x8e8] sm:$0xff]  ;;  %v1585_v28 = vpack.c.bf16 %v8289_v22, %v10519_v44  ;;  %8285 = vst [vmem:[%s10210_s18 + $0x1870] sm:$0xff] %v1569_v20 }
  0x56   : > { %v10534_v52 = vld [vmem:[%s10187_s14 + $0x30e0] sm:$0xff]  ;;  %v1593_v29 = vpack.c.bf16 %v8292_v23, %v10522_v45  ;;  %v8295_v30 = vld [vmem:[%s10187_s14 + $0x30e8] sm:$0xff]  ;;  %8288 = vst [vmem:[%s10210_s18 + $0x470] sm:$0xff] %v1577_v27 }
  0x57   : > { %v10537_v53 = vld [vmem:[%s10187_s14 + $0x18e0] sm:$0xff]  ;;  %v8298_v31 = vld [vmem:[%s10187_s14 + $0x18e8] sm:$0xff]  ;;  %v1601_v36 = vpack.c.bf16 %v8295_v30, %v10534_v52  ;;  %8291 = vst [vmem:[%s10210_s18 + $0x1070] sm:$0xff] %v1585_v28 }
  0x58   : > { %v10540_v54 = vld [vmem:[%s10187_s14 + $0xe0] sm:$0xff]  ;;  %v8301_v32 = vld [vmem:[%s10187_s14 + $0xe8] sm:$0xff]  ;;  %v1609_v37 = vpack.c.bf16 %v8298_v31, %v10537_v53  ;;  %8294 = vst [vmem:[%s10210_s18 + $0x1c70] sm:$0xff] %v1593_v29 }
  0x59   : > { %v10552_v61 = vld [vmem:[%s10187_s14 + $0x4100] sm:$0xff]  ;;  %v1617_v38 = vpack.c.bf16 %v8301_v32, %v10540_v54  ;;  %v8304_v39 = vld [vmem:[%s10187_s14 + $0x4108] sm:$0xff]  ;;  %8297 = vst [vmem:[%s10210_s18 + $0x870] sm:$0xff] %v1601_v36 }
  0x5a   : > { %v10555_v62 = vld [vmem:[%s10187_s14 + $0x2900] sm:$0xff]  ;;  %v8307_v40 = vld [vmem:[%s10187_s14 + $0x2908] sm:$0xff]  ;;  %v1625_v45 = vpack.c.bf16 %v8304_v39, %v10552_v61  ;;  %8300 = vst [vmem:[%s10210_s18 + $0x1470] sm:$0xff] %v1609_v37 }
  0x5b   : > { %v10558_v63 = vld [vmem:[%s10187_s14 + $0x1100] sm:$0xff]  ;;  %v8310_v41 = vld [vmem:[%s10187_s14 + $0x1108] sm:$0xff]  ;;  %v1633_v46 = vpack.c.bf16 %v8307_v40, %v10555_v62  ;;  %8303 = vst [vmem:[%s10210_s18 + $0x2070] sm:$0xff] %v1617_v38 }
  0x5c   : > { %v10570_v6 = vld [vmem:[%s10187_s14 + $0x3900] sm:$0xff]  ;;  %v1641_v47 = vpack.c.bf16 %v8310_v41, %v10558_v63  ;;  %v8313_v48 = vld [vmem:[%s10187_s14 + $0x3908] sm:$0xff]  ;;  %8306 = vst [vmem:[%s10210_s18 + $0x80] sm:$0xff] %v1625_v45 }
  0x5d   : > { %v10573_v7 = vld [vmem:[%s10187_s14 + $0x2100] sm:$0xff]  ;;  %v8316_v49 = vld [vmem:[%s10187_s14 + $0x2108] sm:$0xff]  ;;  %v1649_v54 = vpack.c.bf16 %v8313_v48, %v10570_v6  ;;  %8309 = vst [vmem:[%s10210_s18 + $0xc80] sm:$0xff] %v1633_v46 }
  0x5e   : > { %v10576_v8 = vld [vmem:[%s10187_s14 + $0x900] sm:$0xff]  ;;  %v8319_v50 = vld [vmem:[%s10187_s14 + $0x908] sm:$0xff]  ;;  %v1657_v55 = vpack.c.bf16 %v8316_v49, %v10573_v7  ;;  %8312 = vst [vmem:[%s10210_s18 + $0x1880] sm:$0xff] %v1641_v47 }
  0x5f   : > { %v10588_v15 = vld [vmem:[%s10187_s14 + $0x3100] sm:$0xff]  ;;  %v1665_v56 = vpack.c.bf16 %v8319_v50, %v10576_v8  ;;  %v8322_v57 = vld [vmem:[%s10187_s14 + $0x3108] sm:$0xff]  ;;  %8315 = vst [vmem:[%s10210_s18 + $0x480] sm:$0xff] %v1649_v54 }
  0x60   : > { %v10591_v16 = vld [vmem:[%s10187_s14 + $0x1900] sm:$0xff]  ;;  %v8325_v58 = vld [vmem:[%s10187_s14 + $0x1908] sm:$0xff]  ;;  %v1673_v63 = vpack.c.bf16 %v8322_v57, %v10588_v15  ;;  %8318 = vst [vmem:[%s10210_s18 + $0x1080] sm:$0xff] %v1657_v55 }
  0x61   : > { %v10594_v17 = vld [vmem:[%s10187_s14 + $0x100] sm:$0xff]  ;;  %v8328_v59 = vld [vmem:[%s10187_s14 + $0x108] sm:$0xff]  ;;  %v1681_v0 = vpack.c.bf16 %v8325_v58, %v10591_v16  ;;  %8321 = vst [vmem:[%s10210_s18 + $0x1c80] sm:$0xff] %v1665_v56 }
  0x62   : > { %v10606_v24 = vld [vmem:[%s10187_s14 + $0x4120] sm:$0xff]  ;;  %v1689_v1 = vpack.c.bf16 %v8328_v59, %v10594_v17  ;;  %v8331_v2 = vld [vmem:[%s10187_s14 + $0x4128] sm:$0xff]  ;;  %8324 = vst [vmem:[%s10210_s18 + $0x880] sm:$0xff] %v1673_v63 }
  0x63   : > { %v10609_v25 = vld [vmem:[%s10187_s14 + $0x2920] sm:$0xff]  ;;  %v8334_v3 = vld [vmem:[%s10187_s14 + $0x2928] sm:$0xff]  ;;  %v1697_v8 = vpack.c.bf16 %v8331_v2, %v10606_v24  ;;  %8327 = vst [vmem:[%s10210_s18 + $0x1480] sm:$0xff] %v1681_v0 }
  0x64   : > { %v10612_v26 = vld [vmem:[%s10187_s14 + $0x1120] sm:$0xff]  ;;  %v8337_v4 = vld [vmem:[%s10187_s14 + $0x1128] sm:$0xff]  ;;  %v1705_v9 = vpack.c.bf16 %v8334_v3, %v10609_v25  ;;  %8330 = vst [vmem:[%s10210_s18 + $0x2080] sm:$0xff] %v1689_v1 }
  0x65   : > { %v10624_v33 = vld [vmem:[%s10187_s14 + $0x3920] sm:$0xff]  ;;  %v1713_v10 = vpack.c.bf16 %v8337_v4, %v10612_v26  ;;  %v8340_v11 = vld [vmem:[%s10187_s14 + $0x3928] sm:$0xff]  ;;  %8333 = vst [vmem:[%s10210_s18 + $0x90] sm:$0xff] %v1697_v8 }
  0x66   : > { %v10627_v34 = vld [vmem:[%s10187_s14 + $0x2120] sm:$0xff]  ;;  %v8343_v12 = vld [vmem:[%s10187_s14 + $0x2128] sm:$0xff]  ;;  %v1721_v17 = vpack.c.bf16 %v8340_v11, %v10624_v33  ;;  %8336 = vst [vmem:[%s10210_s18 + $0xc90] sm:$0xff] %v1705_v9 }
  0x67   : > { %v10630_v35 = vld [vmem:[%s10187_s14 + $0x920] sm:$0xff]  ;;  %v8346_v13 = vld [vmem:[%s10187_s14 + $0x928] sm:$0xff]  ;;  %v1729_v18 = vpack.c.bf16 %v8343_v12, %v10627_v34  ;;  %8339 = vst [vmem:[%s10210_s18 + $0x1890] sm:$0xff] %v1713_v10 }
  0x68   : > { %v10642_v42 = vld [vmem:[%s10187_s14 + $0x3120] sm:$0xff]  ;;  %v1737_v19 = vpack.c.bf16 %v8346_v13, %v10630_v35  ;;  %v8349_v20 = vld [vmem:[%s10187_s14 + $0x3128] sm:$0xff]  ;;  %8342 = vst [vmem:[%s10210_s18 + $0x490] sm:$0xff] %v1721_v17 }
  0x69   : > { %v10645_v43 = vld [vmem:[%s10187_s14 + $0x1920] sm:$0xff]  ;;  %v8352_v21 = vld [vmem:[%s10187_s14 + $0x1928] sm:$0xff]  ;;  %v1745_v26 = vpack.c.bf16 %v8349_v20, %v10642_v42  ;;  %8345 = vst [vmem:[%s10210_s18 + $0x1090] sm:$0xff] %v1729_v18 }
  0x6a   : > { %v10648_v44 = vld [vmem:[%s10187_s14 + $0x120] sm:$0xff]  ;;  %v8355_v22 = vld [vmem:[%s10187_s14 + $0x128] sm:$0xff]  ;;  %v1753_v27 = vpack.c.bf16 %v8352_v21, %v10645_v43  ;;  %8348 = vst [vmem:[%s10210_s18 + $0x1c90] sm:$0xff] %v1737_v19 }
  0x6b   : > { %v10660_v51 = vld [vmem:[%s10187_s14 + $0x4140] sm:$0xff]  ;;  %v1761_v28 = vpack.c.bf16 %v8355_v22, %v10648_v44  ;;  %v8358_v29 = vld [vmem:[%s10187_s14 + $0x4148] sm:$0xff]  ;;  %8351 = vst [vmem:[%s10210_s18 + $0x890] sm:$0xff] %v1745_v26 }
  0x6c   : > { %v10663_v52 = vld [vmem:[%s10187_s14 + $0x2940] sm:$0xff]  ;;  %v8361_v30 = vld [vmem:[%s10187_s14 + $0x2948] sm:$0xff]  ;;  %v1769_v35 = vpack.c.bf16 %v8358_v29, %v10660_v51  ;;  %8354 = vst [vmem:[%s10210_s18 + $0x1490] sm:$0xff] %v1753_v27 }
  0x6d   : > { %v10666_v53 = vld [vmem:[%s10187_s14 + $0x1140] sm:$0xff]  ;;  %v8364_v31 = vld [vmem:[%s10187_s14 + $0x1148] sm:$0xff]  ;;  %v1777_v36 = vpack.c.bf16 %v8361_v30, %v10663_v52  ;;  %8357 = vst [vmem:[%s10210_s18 + $0x2090] sm:$0xff] %v1761_v28 }
  0x6e   : > { %v10678_v60 = vld [vmem:[%s10187_s14 + $0x3940] sm:$0xff]  ;;  %v1785_v37 = vpack.c.bf16 %v8364_v31, %v10666_v53  ;;  %v8367_v38 = vld [vmem:[%s10187_s14 + $0x3948] sm:$0xff]  ;;  %8360 = vst [vmem:[%s10210_s18 + $0xa0] sm:$0xff] %v1769_v35 }
  0x6f   : > { %v10681_v61 = vld [vmem:[%s10187_s14 + $0x2140] sm:$0xff]  ;;  %v8370_v39 = vld [vmem:[%s10187_s14 + $0x2148] sm:$0xff]  ;;  %v1793_v44 = vpack.c.bf16 %v8367_v38, %v10678_v60  ;;  %8363 = vst [vmem:[%s10210_s18 + $0xca0] sm:$0xff] %v1777_v36 }
  0x70   : > { %v10684_v62 = vld [vmem:[%s10187_s14 + $0x940] sm:$0xff]  ;;  %v8373_v40 = vld [vmem:[%s10187_s14 + $0x948] sm:$0xff]  ;;  %v1801_v45 = vpack.c.bf16 %v8370_v39, %v10681_v61  ;;  %8366 = vst [vmem:[%s10210_s18 + $0x18a0] sm:$0xff] %v1785_v37 }
  0x71   : > { %v10696_v5 = vld [vmem:[%s10187_s14 + $0x3140] sm:$0xff]  ;;  %v1809_v46 = vpack.c.bf16 %v8373_v40, %v10684_v62  ;;  %v8376_v47 = vld [vmem:[%s10187_s14 + $0x3148] sm:$0xff]  ;;  %8369 = vst [vmem:[%s10210_s18 + $0x4a0] sm:$0xff] %v1793_v44 }
  0x72   : > { %v10699_v6 = vld [vmem:[%s10187_s14 + $0x1940] sm:$0xff]  ;;  %v8379_v48 = vld [vmem:[%s10187_s14 + $0x1948] sm:$0xff]  ;;  %v1817_v53 = vpack.c.bf16 %v8376_v47, %v10696_v5  ;;  %8372 = vst [vmem:[%s10210_s18 + $0x10a0] sm:$0xff] %v1801_v45 }
  0x73   : > { %v10702_v7 = vld [vmem:[%s10187_s14 + $0x140] sm:$0xff]  ;;  %v8382_v49 = vld [vmem:[%s10187_s14 + $0x148] sm:$0xff]  ;;  %v1825_v54 = vpack.c.bf16 %v8379_v48, %v10699_v6  ;;  %8375 = vst [vmem:[%s10210_s18 + $0x1ca0] sm:$0xff] %v1809_v46 }
  0x74   : > { %v10714_v14 = vld [vmem:[%s10187_s14 + $0x4160] sm:$0xff]  ;;  %v1833_v55 = vpack.c.bf16 %v8382_v49, %v10702_v7  ;;  %v8385_v56 = vld [vmem:[%s10187_s14 + $0x4168] sm:$0xff]  ;;  %8378 = vst [vmem:[%s10210_s18 + $0x8a0] sm:$0xff] %v1817_v53 }
  0x75   : > { %v10717_v15 = vld [vmem:[%s10187_s14 + $0x2960] sm:$0xff]  ;;  %v8388_v57 = vld [vmem:[%s10187_s14 + $0x2968] sm:$0xff]  ;;  %v1841_v62 = vpack.c.bf16 %v8385_v56, %v10714_v14  ;;  %8381 = vst [vmem:[%s10210_s18 + $0x14a0] sm:$0xff] %v1825_v54 }
  0x76   : > { %v10720_v16 = vld [vmem:[%s10187_s14 + $0x1160] sm:$0xff]  ;;  %v8391_v58 = vld [vmem:[%s10187_s14 + $0x1168] sm:$0xff]  ;;  %v1849_v63 = vpack.c.bf16 %v8388_v57, %v10717_v15  ;;  %8384 = vst [vmem:[%s10210_s18 + $0x20a0] sm:$0xff] %v1833_v55 }
  0x77   : > { %v10732_v23 = vld [vmem:[%s10187_s14 + $0x3960] sm:$0xff]  ;;  %v1857_v0 = vpack.c.bf16 %v8391_v58, %v10720_v16  ;;  %v8394_v1 = vld [vmem:[%s10187_s14 + $0x3968] sm:$0xff]  ;;  %8387 = vst [vmem:[%s10210_s18 + $0xb0] sm:$0xff] %v1841_v62 }
  0x78   : > { %v10735_v24 = vld [vmem:[%s10187_s14 + $0x2160] sm:$0xff]  ;;  %v8397_v2 = vld [vmem:[%s10187_s14 + $0x2168] sm:$0xff]  ;;  %v1865_v7 = vpack.c.bf16 %v8394_v1, %v10732_v23  ;;  %8390 = vst [vmem:[%s10210_s18 + $0xcb0] sm:$0xff] %v1849_v63 }
  0x79   : > { %v10738_v25 = vld [vmem:[%s10187_s14 + $0x960] sm:$0xff]  ;;  %v8400_v3 = vld [vmem:[%s10187_s14 + $0x968] sm:$0xff]  ;;  %v1873_v8 = vpack.c.bf16 %v8397_v2, %v10735_v24  ;;  %8393 = vst [vmem:[%s10210_s18 + $0x18b0] sm:$0xff] %v1857_v0 }
  0x7a   : > { %v10750_v32 = vld [vmem:[%s10187_s14 + $0x3160] sm:$0xff]  ;;  %v1881_v9 = vpack.c.bf16 %v8400_v3, %v10738_v25  ;;  %v8403_v10 = vld [vmem:[%s10187_s14 + $0x3168] sm:$0xff]  ;;  %8396 = vst [vmem:[%s10210_s18 + $0x4b0] sm:$0xff] %v1865_v7 }
  0x7b   : > { %v10753_v33 = vld [vmem:[%s10187_s14 + $0x1960] sm:$0xff]  ;;  %v8406_v11 = vld [vmem:[%s10187_s14 + $0x1968] sm:$0xff]  ;;  %v1889_v16 = vpack.c.bf16 %v8403_v10, %v10750_v32  ;;  %8399 = vst [vmem:[%s10210_s18 + $0x10b0] sm:$0xff] %v1873_v8 }
  0x7c   : > { %v10756_v34 = vld [vmem:[%s10187_s14 + $0x160] sm:$0xff]  ;;  %v8409_v12 = vld [vmem:[%s10187_s14 + $0x168] sm:$0xff]  ;;  %v1897_v17 = vpack.c.bf16 %v8406_v11, %v10753_v33  ;;  %8402 = vst [vmem:[%s10210_s18 + $0x1cb0] sm:$0xff] %v1881_v9 }
  0x7d   : > { %v10768_v41 = vld [vmem:[%s10187_s14 + $0x4180] sm:$0xff]  ;;  %v1905_v18 = vpack.c.bf16 %v8409_v12, %v10756_v34  ;;  %v8412_v19 = vld [vmem:[%s10187_s14 + $0x4188] sm:$0xff]  ;;  %8405 = vst [vmem:[%s10210_s18 + $0x8b0] sm:$0xff] %v1889_v16 }
  0x7e   : > { %v10771_v42 = vld [vmem:[%s10187_s14 + $0x2980] sm:$0xff]  ;;  %v8415_v20 = vld [vmem:[%s10187_s14 + $0x2988] sm:$0xff]  ;;  %v1913_v25 = vpack.c.bf16 %v8412_v19, %v10768_v41  ;;  %8408 = vst [vmem:[%s10210_s18 + $0x14b0] sm:$0xff] %v1897_v17 }
  0x7f   : > { %v10774_v43 = vld [vmem:[%s10187_s14 + $0x1180] sm:$0xff]  ;;  %v8418_v21 = vld [vmem:[%s10187_s14 + $0x1188] sm:$0xff]  ;;  %v1921_v26 = vpack.c.bf16 %v8415_v20, %v10771_v42  ;;  %8411 = vst [vmem:[%s10210_s18 + $0x20b0] sm:$0xff] %v1905_v18 }
  0x80   : > { %v10786_v50 = vld [vmem:[%s10187_s14 + $0x3980] sm:$0xff]  ;;  %v1929_v27 = vpack.c.bf16 %v8418_v21, %v10774_v43  ;;  %v8421_v28 = vld [vmem:[%s10187_s14 + $0x3988] sm:$0xff]  ;;  %8414 = vst [vmem:[%s10210_s18 + $0xc0] sm:$0xff] %v1913_v25 }
  0x81   : > { %v10789_v51 = vld [vmem:[%s10187_s14 + $0x2180] sm:$0xff]  ;;  %v8424_v29 = vld [vmem:[%s10187_s14 + $0x2188] sm:$0xff]  ;;  %v1937_v34 = vpack.c.bf16 %v8421_v28, %v10786_v50  ;;  %8417 = vst [vmem:[%s10210_s18 + $0xcc0] sm:$0xff] %v1921_v26 }
  0x82   : > { %v10792_v52 = vld [vmem:[%s10187_s14 + $0x980] sm:$0xff]  ;;  %v8427_v30 = vld [vmem:[%s10187_s14 + $0x988] sm:$0xff]  ;;  %v1945_v35 = vpack.c.bf16 %v8424_v29, %v10789_v51  ;;  %8420 = vst [vmem:[%s10210_s18 + $0x18c0] sm:$0xff] %v1929_v27 }
  0x83   : > { %v10804_v59 = vld [vmem:[%s10187_s14 + $0x3180] sm:$0xff]  ;;  %v1953_v36 = vpack.c.bf16 %v8427_v30, %v10792_v52  ;;  %v8430_v37 = vld [vmem:[%s10187_s14 + $0x3188] sm:$0xff]  ;;  %8423 = vst [vmem:[%s10210_s18 + $0x4c0] sm:$0xff] %v1937_v34 }
  0x84   : > { %v10807_v60 = vld [vmem:[%s10187_s14 + $0x1980] sm:$0xff]  ;;  %v8433_v38 = vld [vmem:[%s10187_s14 + $0x1988] sm:$0xff]  ;;  %v1961_v43 = vpack.c.bf16 %v8430_v37, %v10804_v59  ;;  %8426 = vst [vmem:[%s10210_s18 + $0x10c0] sm:$0xff] %v1945_v35 }
  0x85   : > { %v10810_v61 = vld [vmem:[%s10187_s14 + $0x180] sm:$0xff]  ;;  %v8436_v39 = vld [vmem:[%s10187_s14 + $0x188] sm:$0xff]  ;;  %v1969_v44 = vpack.c.bf16 %v8433_v38, %v10807_v60  ;;  %8429 = vst [vmem:[%s10210_s18 + $0x1cc0] sm:$0xff] %v1953_v36 }
  0x86   : > { %v10822_v4 = vld [vmem:[%s10187_s14 + $0x41a0] sm:$0xff]  ;;  %v1977_v45 = vpack.c.bf16 %v8436_v39, %v10810_v61  ;;  %v8439_v46 = vld [vmem:[%s10187_s14 + $0x41a8] sm:$0xff]  ;;  %8432 = vst [vmem:[%s10210_s18 + $0x8c0] sm:$0xff] %v1961_v43 }
  0x87   : > { %v10825_v5 = vld [vmem:[%s10187_s14 + $0x29a0] sm:$0xff]  ;;  %v8442_v47 = vld [vmem:[%s10187_s14 + $0x29a8] sm:$0xff]  ;;  %v1985_v52 = vpack.c.bf16 %v8439_v46, %v10822_v4  ;;  %8435 = vst [vmem:[%s10210_s18 + $0x14c0] sm:$0xff] %v1969_v44 }
  0x88   : > { %v10828_v6 = vld [vmem:[%s10187_s14 + $0x11a0] sm:$0xff]  ;;  %v8445_v48 = vld [vmem:[%s10187_s14 + $0x11a8] sm:$0xff]  ;;  %v1993_v53 = vpack.c.bf16 %v8442_v47, %v10825_v5  ;;  %8438 = vst [vmem:[%s10210_s18 + $0x20c0] sm:$0xff] %v1977_v45 }
  0x89   : > { %v10840_v13 = vld [vmem:[%s10187_s14 + $0x39a0] sm:$0xff]  ;;  %v2001_v54 = vpack.c.bf16 %v8445_v48, %v10828_v6  ;;  %v8448_v55 = vld [vmem:[%s10187_s14 + $0x39a8] sm:$0xff]  ;;  %8441 = vst [vmem:[%s10210_s18 + $0xd0] sm:$0xff] %v1985_v52 }
  0x8a   : > { %v10843_v14 = vld [vmem:[%s10187_s14 + $0x21a0] sm:$0xff]  ;;  %v8451_v56 = vld [vmem:[%s10187_s14 + $0x21a8] sm:$0xff]  ;;  %v2009_v61 = vpack.c.bf16 %v8448_v55, %v10840_v13  ;;  %8444 = vst [vmem:[%s10210_s18 + $0xcd0] sm:$0xff] %v1993_v53 }
  0x8b   : > { %v10846_v15 = vld [vmem:[%s10187_s14 + $0x9a0] sm:$0xff]  ;;  %v8454_v57 = vld [vmem:[%s10187_s14 + $0x9a8] sm:$0xff]  ;;  %v2017_v62 = vpack.c.bf16 %v8451_v56, %v10843_v14  ;;  %8447 = vst [vmem:[%s10210_s18 + $0x18d0] sm:$0xff] %v2001_v54 }
  0x8c   : > { %v10858_v22 = vld [vmem:[%s10187_s14 + $0x31a0] sm:$0xff]  ;;  %v2025_v63 = vpack.c.bf16 %v8454_v57, %v10846_v15  ;;  %v8457_v0 = vld [vmem:[%s10187_s14 + $0x31a8] sm:$0xff]  ;;  %8450 = vst [vmem:[%s10210_s18 + $0x4d0] sm:$0xff] %v2009_v61 }
  0x8d   : > { %v10861_v23 = vld [vmem:[%s10187_s14 + $0x19a0] sm:$0xff]  ;;  %v8460_v1 = vld [vmem:[%s10187_s14 + $0x19a8] sm:$0xff]  ;;  %v2033_v6 = vpack.c.bf16 %v8457_v0, %v10858_v22  ;;  %8453 = vst [vmem:[%s10210_s18 + $0x10d0] sm:$0xff] %v2017_v62 }
  0x8e   : > { %v10864_v24 = vld [vmem:[%s10187_s14 + $0x1a0] sm:$0xff]  ;;  %v8463_v2 = vld [vmem:[%s10187_s14 + $0x1a8] sm:$0xff]  ;;  %v2041_v7 = vpack.c.bf16 %v8460_v1, %v10861_v23  ;;  %8456 = vst [vmem:[%s10210_s18 + $0x1cd0] sm:$0xff] %v2025_v63 }
  0x8f   : > { %v10876_v31 = vld [vmem:[%s10187_s14 + $0x41c0] sm:$0xff]  ;;  %v2049_v8 = vpack.c.bf16 %v8463_v2, %v10864_v24  ;;  %v8466_v9 = vld [vmem:[%s10187_s14 + $0x41c8] sm:$0xff]  ;;  %8459 = vst [vmem:[%s10210_s18 + $0x8d0] sm:$0xff] %v2033_v6 }
  0x90   : > { %v10879_v32 = vld [vmem:[%s10187_s14 + $0x29c0] sm:$0xff]  ;;  %v8469_v10 = vld [vmem:[%s10187_s14 + $0x29c8] sm:$0xff]  ;;  %v2057_v15 = vpack.c.bf16 %v8466_v9, %v10876_v31  ;;  %8462 = vst [vmem:[%s10210_s18 + $0x14d0] sm:$0xff] %v2041_v7 }
  0x91   : > { %v10882_v33 = vld [vmem:[%s10187_s14 + $0x11c0] sm:$0xff]  ;;  %v8472_v11 = vld [vmem:[%s10187_s14 + $0x11c8] sm:$0xff]  ;;  %v2065_v16 = vpack.c.bf16 %v8469_v10, %v10879_v32  ;;  %8465 = vst [vmem:[%s10210_s18 + $0x20d0] sm:$0xff] %v2049_v8 }
  0x92   : > { %v10894_v40 = vld [vmem:[%s10187_s14 + $0x39c0] sm:$0xff]  ;;  %v2073_v17 = vpack.c.bf16 %v8472_v11, %v10882_v33  ;;  %v8475_v18 = vld [vmem:[%s10187_s14 + $0x39c8] sm:$0xff]  ;;  %8468 = vst [vmem:[%s10210_s18 + $0xe0] sm:$0xff] %v2057_v15 }
  0x93   : > { %v10897_v41 = vld [vmem:[%s10187_s14 + $0x21c0] sm:$0xff]  ;;  %v8478_v19 = vld [vmem:[%s10187_s14 + $0x21c8] sm:$0xff]  ;;  %v2081_v24 = vpack.c.bf16 %v8475_v18, %v10894_v40  ;;  %8471 = vst [vmem:[%s10210_s18 + $0xce0] sm:$0xff] %v2065_v16 }
  0x94   : > { %v10900_v42 = vld [vmem:[%s10187_s14 + $0x9c0] sm:$0xff]  ;;  %v8481_v20 = vld [vmem:[%s10187_s14 + $0x9c8] sm:$0xff]  ;;  %v2089_v25 = vpack.c.bf16 %v8478_v19, %v10897_v41  ;;  %8474 = vst [vmem:[%s10210_s18 + $0x18e0] sm:$0xff] %v2073_v17 }
  0x95   : > { %v10912_v49 = vld [vmem:[%s10187_s14 + $0x31c0] sm:$0xff]  ;;  %v2097_v26 = vpack.c.bf16 %v8481_v20, %v10900_v42  ;;  %v8484_v27 = vld [vmem:[%s10187_s14 + $0x31c8] sm:$0xff]  ;;  %8477 = vst [vmem:[%s10210_s18 + $0x4e0] sm:$0xff] %v2081_v24 }
  0x96   : > { %v10915_v50 = vld [vmem:[%s10187_s14 + $0x19c0] sm:$0xff]  ;;  %v8487_v28 = vld [vmem:[%s10187_s14 + $0x19c8] sm:$0xff]  ;;  %v2105_v33 = vpack.c.bf16 %v8484_v27, %v10912_v49  ;;  %8480 = vst [vmem:[%s10210_s18 + $0x10e0] sm:$0xff] %v2089_v25 }
  0x97   : > { %v10918_v51 = vld [vmem:[%s10187_s14 + $0x1c0] sm:$0xff]  ;;  %v8490_v29 = vld [vmem:[%s10187_s14 + $0x1c8] sm:$0xff]  ;;  %v2113_v34 = vpack.c.bf16 %v8487_v28, %v10915_v50  ;;  %8483 = vst [vmem:[%s10210_s18 + $0x1ce0] sm:$0xff] %v2097_v26 }
  0x98   : > { %v10930_v58 = vld [vmem:[%s10187_s14 + $0x41e0] sm:$0xff]  ;;  %v2121_v35 = vpack.c.bf16 %v8490_v29, %v10918_v51  ;;  %v8493_v36 = vld [vmem:[%s10187_s14 + $0x41e8] sm:$0xff]  ;;  %8486 = vst [vmem:[%s10210_s18 + $0x8e0] sm:$0xff] %v2105_v33 }
  0x99   : > { %v10933_v59 = vld [vmem:[%s10187_s14 + $0x29e0] sm:$0xff]  ;;  %v8496_v37 = vld [vmem:[%s10187_s14 + $0x29e8] sm:$0xff]  ;;  %v2129_v42 = vpack.c.bf16 %v8493_v36, %v10930_v58  ;;  %8489 = vst [vmem:[%s10210_s18 + $0x14e0] sm:$0xff] %v2113_v34 }
  0x9a   : > { %v10936_v60 = vld [vmem:[%s10187_s14 + $0x11e0] sm:$0xff]  ;;  %v8499_v38 = vld [vmem:[%s10187_s14 + $0x11e8] sm:$0xff]  ;;  %v2137_v43 = vpack.c.bf16 %v8496_v37, %v10933_v59  ;;  %8492 = vst [vmem:[%s10210_s18 + $0x20e0] sm:$0xff] %v2121_v35 }
  0x9b   : > { %v10948_v3 = vld [vmem:[%s10187_s14 + $0x39e0] sm:$0xff]  ;;  %v2145_v44 = vpack.c.bf16 %v8499_v38, %v10936_v60  ;;  %v8502_v45 = vld [vmem:[%s10187_s14 + $0x39e8] sm:$0xff]  ;;  %8495 = vst [vmem:[%s10210_s18 + $0xf0] sm:$0xff] %v2129_v42 }
  0x9c   : > { %v10951_v4 = vld [vmem:[%s10187_s14 + $0x21e0] sm:$0xff]  ;;  %v8505_v46 = vld [vmem:[%s10187_s14 + $0x21e8] sm:$0xff]  ;;  %v2153_v51 = vpack.c.bf16 %v8502_v45, %v10948_v3  ;;  %8498 = vst [vmem:[%s10210_s18 + $0xcf0] sm:$0xff] %v2137_v43 }
  0x9d   : > { %v10954_v5 = vld [vmem:[%s10187_s14 + $0x9e0] sm:$0xff]  ;;  %v8508_v47 = vld [vmem:[%s10187_s14 + $0x9e8] sm:$0xff]  ;;  %v2161_v52 = vpack.c.bf16 %v8505_v46, %v10951_v4  ;;  %8501 = vst [vmem:[%s10210_s18 + $0x18f0] sm:$0xff] %v2145_v44 }
  0x9e   : > { %v10966_v12 = vld [vmem:[%s10187_s14 + $0x31e0] sm:$0xff]  ;;  %v2169_v53 = vpack.c.bf16 %v8508_v47, %v10954_v5  ;;  %v8511_v54 = vld [vmem:[%s10187_s14 + $0x31e8] sm:$0xff]  ;;  %8504 = vst [vmem:[%s10210_s18 + $0x4f0] sm:$0xff] %v2153_v51 }
  0x9f   : > { %v10969_v13 = vld [vmem:[%s10187_s14 + $0x19e0] sm:$0xff]  ;;  %v8514_v55 = vld [vmem:[%s10187_s14 + $0x19e8] sm:$0xff]  ;;  %v2177_v60 = vpack.c.bf16 %v8511_v54, %v10966_v12  ;;  %8507 = vst [vmem:[%s10210_s18 + $0x10f0] sm:$0xff] %v2161_v52 }
  0xa0   : > { %v10972_v14 = vld [vmem:[%s10187_s14 + $0x1e0] sm:$0xff]  ;;  %v8517_v56 = vld [vmem:[%s10187_s14 + $0x1e8] sm:$0xff]  ;;  %v2185_v61 = vpack.c.bf16 %v8514_v55, %v10969_v13  ;;  %8510 = vst [vmem:[%s10210_s18 + $0x1cf0] sm:$0xff] %v2169_v53 }
  0xa1   : > { %v10984_v21 = vld [vmem:[%s10187_s14 + $0x4200] sm:$0xff]  ;;  %v2193_v62 = vpack.c.bf16 %v8517_v56, %v10972_v14  ;;  %v8520_v63 = vld [vmem:[%s10187_s14 + $0x4208] sm:$0xff]  ;;  %8513 = vst [vmem:[%s10210_s18 + $0x8f0] sm:$0xff] %v2177_v60 }
  0xa2   : > { %v10987_v22 = vld [vmem:[%s10187_s14 + $0x2a00] sm:$0xff]  ;;  %v8523_v0 = vld [vmem:[%s10187_s14 + $0x2a08] sm:$0xff]  ;;  %v2201_v5 = vpack.c.bf16 %v8520_v63, %v10984_v21  ;;  %8516 = vst [vmem:[%s10210_s18 + $0x14f0] sm:$0xff] %v2185_v61 }
  0xa3   : > { %v10990_v23 = vld [vmem:[%s10187_s14 + $0x1200] sm:$0xff]  ;;  %v8526_v1 = vld [vmem:[%s10187_s14 + $0x1208] sm:$0xff]  ;;  %v2209_v6 = vpack.c.bf16 %v8523_v0, %v10987_v22  ;;  %8519 = vst [vmem:[%s10210_s18 + $0x20f0] sm:$0xff] %v2193_v62 }
  0xa4   : > { %v11002_v30 = vld [vmem:[%s10187_s14 + $0x3a00] sm:$0xff]  ;;  %v2217_v7 = vpack.c.bf16 %v8526_v1, %v10990_v23  ;;  %v8529_v8 = vld [vmem:[%s10187_s14 + $0x3a08] sm:$0xff]  ;;  %8522 = vst [vmem:[%s10210_s18 + $0x100] sm:$0xff] %v2201_v5 }
  0xa5   : > { %v11005_v31 = vld [vmem:[%s10187_s14 + $0x2200] sm:$0xff]  ;;  %v8532_v9 = vld [vmem:[%s10187_s14 + $0x2208] sm:$0xff]  ;;  %v2225_v14 = vpack.c.bf16 %v8529_v8, %v11002_v30  ;;  %8525 = vst [vmem:[%s10210_s18 + $0xd00] sm:$0xff] %v2209_v6 }
  0xa6   : > { %v11008_v32 = vld [vmem:[%s10187_s14 + $0xa00] sm:$0xff]  ;;  %v8535_v10 = vld [vmem:[%s10187_s14 + $0xa08] sm:$0xff]  ;;  %v2233_v15 = vpack.c.bf16 %v8532_v9, %v11005_v31  ;;  %8528 = vst [vmem:[%s10210_s18 + $0x1900] sm:$0xff] %v2217_v7 }
  0xa7   : > { %v11020_v39 = vld [vmem:[%s10187_s14 + $0x3200] sm:$0xff]  ;;  %v2241_v16 = vpack.c.bf16 %v8535_v10, %v11008_v32  ;;  %v8538_v17 = vld [vmem:[%s10187_s14 + $0x3208] sm:$0xff]  ;;  %8531 = vst [vmem:[%s10210_s18 + $0x500] sm:$0xff] %v2225_v14 }
  0xa8   : > { %v11023_v40 = vld [vmem:[%s10187_s14 + $0x1a00] sm:$0xff]  ;;  %v8541_v18 = vld [vmem:[%s10187_s14 + $0x1a08] sm:$0xff]  ;;  %v2249_v23 = vpack.c.bf16 %v8538_v17, %v11020_v39  ;;  %8534 = vst [vmem:[%s10210_s18 + $0x1100] sm:$0xff] %v2233_v15 }
  0xa9   : > { %v11026_v41 = vld [vmem:[%s10187_s14 + $0x200] sm:$0xff]  ;;  %v8544_v19 = vld [vmem:[%s10187_s14 + $0x208] sm:$0xff]  ;;  %v2257_v24 = vpack.c.bf16 %v8541_v18, %v11023_v40  ;;  %8537 = vst [vmem:[%s10210_s18 + $0x1d00] sm:$0xff] %v2241_v16 }
  0xaa   : > { %v11038_v48 = vld [vmem:[%s10187_s14 + $0x4220] sm:$0xff]  ;;  %v2265_v25 = vpack.c.bf16 %v8544_v19, %v11026_v41  ;;  %v8547_v26 = vld [vmem:[%s10187_s14 + $0x4228] sm:$0xff]  ;;  %8540 = vst [vmem:[%s10210_s18 + $0x900] sm:$0xff] %v2249_v23 }
  0xab   : > { %v11041_v49 = vld [vmem:[%s10187_s14 + $0x2a20] sm:$0xff]  ;;  %v8550_v27 = vld [vmem:[%s10187_s14 + $0x2a28] sm:$0xff]  ;;  %v2273_v32 = vpack.c.bf16 %v8547_v26, %v11038_v48  ;;  %8543 = vst [vmem:[%s10210_s18 + $0x1500] sm:$0xff] %v2257_v24 }
  0xac   : > { %v11044_v50 = vld [vmem:[%s10187_s14 + $0x1220] sm:$0xff]  ;;  %v8553_v28 = vld [vmem:[%s10187_s14 + $0x1228] sm:$0xff]  ;;  %v2281_v33 = vpack.c.bf16 %v8550_v27, %v11041_v49  ;;  %8546 = vst [vmem:[%s10210_s18 + $0x2100] sm:$0xff] %v2265_v25 }
  0xad   : > { %v11056_v57 = vld [vmem:[%s10187_s14 + $0x3a20] sm:$0xff]  ;;  %v2289_v34 = vpack.c.bf16 %v8553_v28, %v11044_v50  ;;  %v8556_v35 = vld [vmem:[%s10187_s14 + $0x3a28] sm:$0xff]  ;;  %8549 = vst [vmem:[%s10210_s18 + $0x110] sm:$0xff] %v2273_v32 }
  0xae   : > { %v11059_v58 = vld [vmem:[%s10187_s14 + $0x2220] sm:$0xff]  ;;  %v8559_v36 = vld [vmem:[%s10187_s14 + $0x2228] sm:$0xff]  ;;  %v2297_v41 = vpack.c.bf16 %v8556_v35, %v11056_v57  ;;  %8552 = vst [vmem:[%s10210_s18 + $0xd10] sm:$0xff] %v2281_v33 }
  0xaf   : > { %v11062_v59 = vld [vmem:[%s10187_s14 + $0xa20] sm:$0xff]  ;;  %v8562_v37 = vld [vmem:[%s10187_s14 + $0xa28] sm:$0xff]  ;;  %v2305_v42 = vpack.c.bf16 %v8559_v36, %v11059_v58  ;;  %8555 = vst [vmem:[%s10210_s18 + $0x1910] sm:$0xff] %v2289_v34 }
  0xb0   : > { %v11074_v2 = vld [vmem:[%s10187_s14 + $0x3220] sm:$0xff]  ;;  %v2313_v43 = vpack.c.bf16 %v8562_v37, %v11062_v59  ;;  %v8565_v44 = vld [vmem:[%s10187_s14 + $0x3228] sm:$0xff]  ;;  %8558 = vst [vmem:[%s10210_s18 + $0x510] sm:$0xff] %v2297_v41 }
  0xb1   : > { %v11077_v3 = vld [vmem:[%s10187_s14 + $0x1a20] sm:$0xff]  ;;  %v8568_v45 = vld [vmem:[%s10187_s14 + $0x1a28] sm:$0xff]  ;;  %v2321_v50 = vpack.c.bf16 %v8565_v44, %v11074_v2  ;;  %8561 = vst [vmem:[%s10210_s18 + $0x1110] sm:$0xff] %v2305_v42 }
  0xb2   : > { %v11080_v4 = vld [vmem:[%s10187_s14 + $0x220] sm:$0xff]  ;;  %v8571_v46 = vld [vmem:[%s10187_s14 + $0x228] sm:$0xff]  ;;  %v2329_v51 = vpack.c.bf16 %v8568_v45, %v11077_v3  ;;  %8564 = vst [vmem:[%s10210_s18 + $0x1d10] sm:$0xff] %v2313_v43 }
  0xb3   : > { %v11092_v11 = vld [vmem:[%s10187_s14 + $0x4240] sm:$0xff]  ;;  %v2337_v52 = vpack.c.bf16 %v8571_v46, %v11080_v4  ;;  %v8574_v53 = vld [vmem:[%s10187_s14 + $0x4248] sm:$0xff]  ;;  %8567 = vst [vmem:[%s10210_s18 + $0x910] sm:$0xff] %v2321_v50 }
  0xb4   : > { %v11095_v12 = vld [vmem:[%s10187_s14 + $0x2a40] sm:$0xff]  ;;  %v8577_v54 = vld [vmem:[%s10187_s14 + $0x2a48] sm:$0xff]  ;;  %v2345_v59 = vpack.c.bf16 %v8574_v53, %v11092_v11  ;;  %8570 = vst [vmem:[%s10210_s18 + $0x1510] sm:$0xff] %v2329_v51 }
  0xb5   : > { %v11098_v13 = vld [vmem:[%s10187_s14 + $0x1240] sm:$0xff]  ;;  %v8580_v55 = vld [vmem:[%s10187_s14 + $0x1248] sm:$0xff]  ;;  %v2353_v60 = vpack.c.bf16 %v8577_v54, %v11095_v12  ;;  %8573 = vst [vmem:[%s10210_s18 + $0x2110] sm:$0xff] %v2337_v52 }
  0xb6   : > { %v11110_v20 = vld [vmem:[%s10187_s14 + $0x3a40] sm:$0xff]  ;;  %v2361_v61 = vpack.c.bf16 %v8580_v55, %v11098_v13  ;;  %v8583_v62 = vld [vmem:[%s10187_s14 + $0x3a48] sm:$0xff]  ;;  %8576 = vst [vmem:[%s10210_s18 + $0x120] sm:$0xff] %v2345_v59 }
  0xb7   : > { %v11113_v21 = vld [vmem:[%s10187_s14 + $0x2240] sm:$0xff]  ;;  %v8586_v63 = vld [vmem:[%s10187_s14 + $0x2248] sm:$0xff]  ;;  %v2369_v4 = vpack.c.bf16 %v8583_v62, %v11110_v20  ;;  %8579 = vst [vmem:[%s10210_s18 + $0xd20] sm:$0xff] %v2353_v60 }
  0xb8   : > { %v11116_v22 = vld [vmem:[%s10187_s14 + $0xa40] sm:$0xff]  ;;  %v8589_v0 = vld [vmem:[%s10187_s14 + $0xa48] sm:$0xff]  ;;  %v2377_v5 = vpack.c.bf16 %v8586_v63, %v11113_v21  ;;  %8582 = vst [vmem:[%s10210_s18 + $0x1920] sm:$0xff] %v2361_v61 }
  0xb9   : > { %v11128_v29 = vld [vmem:[%s10187_s14 + $0x3240] sm:$0xff]  ;;  %v2385_v6 = vpack.c.bf16 %v8589_v0, %v11116_v22  ;;  %v8592_v7 = vld [vmem:[%s10187_s14 + $0x3248] sm:$0xff]  ;;  %8585 = vst [vmem:[%s10210_s18 + $0x520] sm:$0xff] %v2369_v4 }
  0xba   : > { %v11131_v30 = vld [vmem:[%s10187_s14 + $0x1a40] sm:$0xff]  ;;  %v8595_v8 = vld [vmem:[%s10187_s14 + $0x1a48] sm:$0xff]  ;;  %v2393_v13 = vpack.c.bf16 %v8592_v7, %v11128_v29  ;;  %8588 = vst [vmem:[%s10210_s18 + $0x1120] sm:$0xff] %v2377_v5 }
  0xbb   : > { %v11134_v31 = vld [vmem:[%s10187_s14 + $0x240] sm:$0xff]  ;;  %v8598_v9 = vld [vmem:[%s10187_s14 + $0x248] sm:$0xff]  ;;  %v2401_v14 = vpack.c.bf16 %v8595_v8, %v11131_v30  ;;  %8591 = vst [vmem:[%s10210_s18 + $0x1d20] sm:$0xff] %v2385_v6 }
  0xbc   : > { %v11146_v38 = vld [vmem:[%s10187_s14 + $0x4260] sm:$0xff]  ;;  %v2409_v15 = vpack.c.bf16 %v8598_v9, %v11134_v31  ;;  %v8601_v16 = vld [vmem:[%s10187_s14 + $0x4268] sm:$0xff]  ;;  %8594 = vst [vmem:[%s10210_s18 + $0x920] sm:$0xff] %v2393_v13 }
  0xbd   : > { %v11149_v39 = vld [vmem:[%s10187_s14 + $0x2a60] sm:$0xff]  ;;  %v8604_v17 = vld [vmem:[%s10187_s14 + $0x2a68] sm:$0xff]  ;;  %v2417_v22 = vpack.c.bf16 %v8601_v16, %v11146_v38  ;;  %8597 = vst [vmem:[%s10210_s18 + $0x1520] sm:$0xff] %v2401_v14 }
  0xbe   : > { %v11152_v40 = vld [vmem:[%s10187_s14 + $0x1260] sm:$0xff]  ;;  %v8607_v18 = vld [vmem:[%s10187_s14 + $0x1268] sm:$0xff]  ;;  %v2425_v23 = vpack.c.bf16 %v8604_v17, %v11149_v39  ;;  %8600 = vst [vmem:[%s10210_s18 + $0x2120] sm:$0xff] %v2409_v15 }
  0xbf   : > { %v11164_v47 = vld [vmem:[%s10187_s14 + $0x3a60] sm:$0xff]  ;;  %v2433_v24 = vpack.c.bf16 %v8607_v18, %v11152_v40  ;;  %v8610_v25 = vld [vmem:[%s10187_s14 + $0x3a68] sm:$0xff]  ;;  %8603 = vst [vmem:[%s10210_s18 + $0x130] sm:$0xff] %v2417_v22 }
  0xc0   : > { %v11167_v48 = vld [vmem:[%s10187_s14 + $0x2260] sm:$0xff]  ;;  %v8613_v26 = vld [vmem:[%s10187_s14 + $0x2268] sm:$0xff]  ;;  %v2441_v31 = vpack.c.bf16 %v8610_v25, %v11164_v47  ;;  %8606 = vst [vmem:[%s10210_s18 + $0xd30] sm:$0xff] %v2425_v23 }
  0xc1   : > { %v11170_v49 = vld [vmem:[%s10187_s14 + $0xa60] sm:$0xff]  ;;  %v8616_v27 = vld [vmem:[%s10187_s14 + $0xa68] sm:$0xff]  ;;  %v2449_v32 = vpack.c.bf16 %v8613_v26, %v11167_v48  ;;  %8609 = vst [vmem:[%s10210_s18 + $0x1930] sm:$0xff] %v2433_v24 }
  0xc2   : > { %v11182_v56 = vld [vmem:[%s10187_s14 + $0x3260] sm:$0xff]  ;;  %v2457_v33 = vpack.c.bf16 %v8616_v27, %v11170_v49  ;;  %v8619_v34 = vld [vmem:[%s10187_s14 + $0x3268] sm:$0xff]  ;;  %8612 = vst [vmem:[%s10210_s18 + $0x530] sm:$0xff] %v2441_v31 }
  0xc3   : > { %v11185_v57 = vld [vmem:[%s10187_s14 + $0x1a60] sm:$0xff]  ;;  %v8622_v35 = vld [vmem:[%s10187_s14 + $0x1a68] sm:$0xff]  ;;  %v2465_v40 = vpack.c.bf16 %v8619_v34, %v11182_v56  ;;  %8615 = vst [vmem:[%s10210_s18 + $0x1130] sm:$0xff] %v2449_v32 }
  0xc4   : > { %v11188_v58 = vld [vmem:[%s10187_s14 + $0x260] sm:$0xff]  ;;  %v8625_v36 = vld [vmem:[%s10187_s14 + $0x268] sm:$0xff]  ;;  %v2473_v41 = vpack.c.bf16 %v8622_v35, %v11185_v57  ;;  %8618 = vst [vmem:[%s10210_s18 + $0x1d30] sm:$0xff] %v2457_v33 }
  0xc5   : > { %v11200_v1 = vld [vmem:[%s10187_s14 + $0x4280] sm:$0xff]  ;;  %v2481_v42 = vpack.c.bf16 %v8625_v36, %v11188_v58  ;;  %v8628_v43 = vld [vmem:[%s10187_s14 + $0x4288] sm:$0xff]  ;;  %8621 = vst [vmem:[%s10210_s18 + $0x930] sm:$0xff] %v2465_v40 }
  0xc6   : > { %v11203_v2 = vld [vmem:[%s10187_s14 + $0x2a80] sm:$0xff]  ;;  %v8631_v44 = vld [vmem:[%s10187_s14 + $0x2a88] sm:$0xff]  ;;  %v2489_v49 = vpack.c.bf16 %v8628_v43, %v11200_v1  ;;  %8624 = vst [vmem:[%s10210_s18 + $0x1530] sm:$0xff] %v2473_v41 }
  0xc7   : > { %v11206_v3 = vld [vmem:[%s10187_s14 + $0x1280] sm:$0xff]  ;;  %v8634_v45 = vld [vmem:[%s10187_s14 + $0x1288] sm:$0xff]  ;;  %v2497_v50 = vpack.c.bf16 %v8631_v44, %v11203_v2  ;;  %8627 = vst [vmem:[%s10210_s18 + $0x2130] sm:$0xff] %v2481_v42 }
  0xc8   : > { %v11218_v10 = vld [vmem:[%s10187_s14 + $0x3a80] sm:$0xff]  ;;  %v2505_v51 = vpack.c.bf16 %v8634_v45, %v11206_v3  ;;  %v8637_v52 = vld [vmem:[%s10187_s14 + $0x3a88] sm:$0xff]  ;;  %8630 = vst [vmem:[%s10210_s18 + $0x140] sm:$0xff] %v2489_v49 }
  0xc9   : > { %v11221_v11 = vld [vmem:[%s10187_s14 + $0x2280] sm:$0xff]  ;;  %v8640_v53 = vld [vmem:[%s10187_s14 + $0x2288] sm:$0xff]  ;;  %v2513_v58 = vpack.c.bf16 %v8637_v52, %v11218_v10  ;;  %8633 = vst [vmem:[%s10210_s18 + $0xd40] sm:$0xff] %v2497_v50 }
  0xca   : > { %v11224_v12 = vld [vmem:[%s10187_s14 + $0xa80] sm:$0xff]  ;;  %v8643_v54 = vld [vmem:[%s10187_s14 + $0xa88] sm:$0xff]  ;;  %v2521_v59 = vpack.c.bf16 %v8640_v53, %v11221_v11  ;;  %8636 = vst [vmem:[%s10210_s18 + $0x1940] sm:$0xff] %v2505_v51 }
  0xcb   : > { %v11236_v19 = vld [vmem:[%s10187_s14 + $0x3280] sm:$0xff]  ;;  %v2529_v60 = vpack.c.bf16 %v8643_v54, %v11224_v12  ;;  %v8646_v61 = vld [vmem:[%s10187_s14 + $0x3288] sm:$0xff]  ;;  %8639 = vst [vmem:[%s10210_s18 + $0x540] sm:$0xff] %v2513_v58 }
  0xcc   : > { %v11239_v20 = vld [vmem:[%s10187_s14 + $0x1a80] sm:$0xff]  ;;  %v8649_v62 = vld [vmem:[%s10187_s14 + $0x1a88] sm:$0xff]  ;;  %v2537_v3 = vpack.c.bf16 %v8646_v61, %v11236_v19  ;;  %8642 = vst [vmem:[%s10210_s18 + $0x1140] sm:$0xff] %v2521_v59 }
  0xcd   : > { %v11242_v21 = vld [vmem:[%s10187_s14 + $0x280] sm:$0xff]  ;;  %v8652_v63 = vld [vmem:[%s10187_s14 + $0x288] sm:$0xff]  ;;  %v2545_v4 = vpack.c.bf16 %v8649_v62, %v11239_v20  ;;  %8645 = vst [vmem:[%s10210_s18 + $0x1d40] sm:$0xff] %v2529_v60 }
  0xce   : > { %v11254_v28 = vld [vmem:[%s10187_s14 + $0x42a0] sm:$0xff]  ;;  %v2553_v5 = vpack.c.bf16 %v8652_v63, %v11242_v21  ;;  %v8655_v6 = vld [vmem:[%s10187_s14 + $0x42a8] sm:$0xff]  ;;  %8648 = vst [vmem:[%s10210_s18 + $0x940] sm:$0xff] %v2537_v3 }
  0xcf   : > { %v11257_v29 = vld [vmem:[%s10187_s14 + $0x2aa0] sm:$0xff]  ;;  %v8658_v7 = vld [vmem:[%s10187_s14 + $0x2aa8] sm:$0xff]  ;;  %v2561_v12 = vpack.c.bf16 %v8655_v6, %v11254_v28  ;;  %8651 = vst [vmem:[%s10210_s18 + $0x1540] sm:$0xff] %v2545_v4 }
  0xd0   : > { %v11260_v30 = vld [vmem:[%s10187_s14 + $0x12a0] sm:$0xff]  ;;  %v8661_v8 = vld [vmem:[%s10187_s14 + $0x12a8] sm:$0xff]  ;;  %v2569_v13 = vpack.c.bf16 %v8658_v7, %v11257_v29  ;;  %8654 = vst [vmem:[%s10210_s18 + $0x2140] sm:$0xff] %v2553_v5 }
  0xd1   : > { %v11272_v37 = vld [vmem:[%s10187_s14 + $0x3aa0] sm:$0xff]  ;;  %v2577_v14 = vpack.c.bf16 %v8661_v8, %v11260_v30  ;;  %v8664_v15 = vld [vmem:[%s10187_s14 + $0x3aa8] sm:$0xff]  ;;  %8657 = vst [vmem:[%s10210_s18 + $0x150] sm:$0xff] %v2561_v12 }
  0xd2   : > { %v11275_v38 = vld [vmem:[%s10187_s14 + $0x22a0] sm:$0xff]  ;;  %v8667_v16 = vld [vmem:[%s10187_s14 + $0x22a8] sm:$0xff]  ;;  %v2585_v21 = vpack.c.bf16 %v8664_v15, %v11272_v37  ;;  %8660 = vst [vmem:[%s10210_s18 + $0xd50] sm:$0xff] %v2569_v13 }
  0xd3   : > { %v11278_v39 = vld [vmem:[%s10187_s14 + $0xaa0] sm:$0xff]  ;;  %v8670_v17 = vld [vmem:[%s10187_s14 + $0xaa8] sm:$0xff]  ;;  %v2593_v22 = vpack.c.bf16 %v8667_v16, %v11275_v38  ;;  %8663 = vst [vmem:[%s10210_s18 + $0x1950] sm:$0xff] %v2577_v14 }
  0xd4   : > { %v11290_v46 = vld [vmem:[%s10187_s14 + $0x32a0] sm:$0xff]  ;;  %v2601_v23 = vpack.c.bf16 %v8670_v17, %v11278_v39  ;;  %v8673_v24 = vld [vmem:[%s10187_s14 + $0x32a8] sm:$0xff]  ;;  %8666 = vst [vmem:[%s10210_s18 + $0x550] sm:$0xff] %v2585_v21 }
  0xd5   : > { %v11293_v47 = vld [vmem:[%s10187_s14 + $0x1aa0] sm:$0xff]  ;;  %v8676_v25 = vld [vmem:[%s10187_s14 + $0x1aa8] sm:$0xff]  ;;  %v2609_v30 = vpack.c.bf16 %v8673_v24, %v11290_v46  ;;  %8669 = vst [vmem:[%s10210_s18 + $0x1150] sm:$0xff] %v2593_v22 }
  0xd6   : > { %v11296_v48 = vld [vmem:[%s10187_s14 + $0x2a0] sm:$0xff]  ;;  %v8679_v26 = vld [vmem:[%s10187_s14 + $0x2a8] sm:$0xff]  ;;  %v2617_v31 = vpack.c.bf16 %v8676_v25, %v11293_v47  ;;  %8672 = vst [vmem:[%s10210_s18 + $0x1d50] sm:$0xff] %v2601_v23 }
  0xd7   : > { %v11308_v55 = vld [vmem:[%s10187_s14 + $0x42c0] sm:$0xff]  ;;  %v2625_v32 = vpack.c.bf16 %v8679_v26, %v11296_v48  ;;  %v8682_v33 = vld [vmem:[%s10187_s14 + $0x42c8] sm:$0xff]  ;;  %8675 = vst [vmem:[%s10210_s18 + $0x950] sm:$0xff] %v2609_v30 }
  0xd8   : > { %v11311_v56 = vld [vmem:[%s10187_s14 + $0x2ac0] sm:$0xff]  ;;  %v8685_v34 = vld [vmem:[%s10187_s14 + $0x2ac8] sm:$0xff]  ;;  %v2633_v39 = vpack.c.bf16 %v8682_v33, %v11308_v55  ;;  %8678 = vst [vmem:[%s10210_s18 + $0x1550] sm:$0xff] %v2617_v31 }
  0xd9   : > { %v11314_v57 = vld [vmem:[%s10187_s14 + $0x12c0] sm:$0xff]  ;;  %v8688_v35 = vld [vmem:[%s10187_s14 + $0x12c8] sm:$0xff]  ;;  %v2641_v40 = vpack.c.bf16 %v8685_v34, %v11311_v56  ;;  %8681 = vst [vmem:[%s10210_s18 + $0x2150] sm:$0xff] %v2625_v32 }
  0xda   : > { %v11326_v0 = vld [vmem:[%s10187_s14 + $0x3ac0] sm:$0xff]  ;;  %v2649_v41 = vpack.c.bf16 %v8688_v35, %v11314_v57  ;;  %v8691_v42 = vld [vmem:[%s10187_s14 + $0x3ac8] sm:$0xff]  ;;  %8684 = vst [vmem:[%s10210_s18 + $0x160] sm:$0xff] %v2633_v39 }
  0xdb   : > { %v11329_v1 = vld [vmem:[%s10187_s14 + $0x22c0] sm:$0xff]  ;;  %v8694_v43 = vld [vmem:[%s10187_s14 + $0x22c8] sm:$0xff]  ;;  %v2657_v48 = vpack.c.bf16 %v8691_v42, %v11326_v0  ;;  %8687 = vst [vmem:[%s10210_s18 + $0xd60] sm:$0xff] %v2641_v40 }
  0xdc   : > { %v11332_v2 = vld [vmem:[%s10187_s14 + $0xac0] sm:$0xff]  ;;  %v8697_v44 = vld [vmem:[%s10187_s14 + $0xac8] sm:$0xff]  ;;  %v2665_v49 = vpack.c.bf16 %v8694_v43, %v11329_v1  ;;  %8690 = vst [vmem:[%s10210_s18 + $0x1960] sm:$0xff] %v2649_v41 }
  0xdd   : > { %v11344_v9 = vld [vmem:[%s10187_s14 + $0x32c0] sm:$0xff]  ;;  %v2673_v50 = vpack.c.bf16 %v8697_v44, %v11332_v2  ;;  %v8700_v51 = vld [vmem:[%s10187_s14 + $0x32c8] sm:$0xff]  ;;  %8693 = vst [vmem:[%s10210_s18 + $0x560] sm:$0xff] %v2657_v48 }
  0xde   : > { %v11347_v10 = vld [vmem:[%s10187_s14 + $0x1ac0] sm:$0xff]  ;;  %v8703_v52 = vld [vmem:[%s10187_s14 + $0x1ac8] sm:$0xff]  ;;  %v2681_v57 = vpack.c.bf16 %v8700_v51, %v11344_v9  ;;  %8696 = vst [vmem:[%s10210_s18 + $0x1160] sm:$0xff] %v2665_v49 }
  0xdf   : > { %v11350_v11 = vld [vmem:[%s10187_s14 + $0x2c0] sm:$0xff]  ;;  %v8706_v53 = vld [vmem:[%s10187_s14 + $0x2c8] sm:$0xff]  ;;  %v2689_v58 = vpack.c.bf16 %v8703_v52, %v11347_v10  ;;  %8699 = vst [vmem:[%s10210_s18 + $0x1d60] sm:$0xff] %v2673_v50 }
  0xe0   : > { %v11362_v18 = vld [vmem:[%s10187_s14 + $0x42e0] sm:$0xff]  ;;  %v2697_v59 = vpack.c.bf16 %v8706_v53, %v11350_v11  ;;  %v8709_v60 = vld [vmem:[%s10187_s14 + $0x42e8] sm:$0xff]  ;;  %8702 = vst [vmem:[%s10210_s18 + $0x960] sm:$0xff] %v2681_v57 }
  0xe1   : > { %v11365_v19 = vld [vmem:[%s10187_s14 + $0x2ae0] sm:$0xff]  ;;  %v8712_v61 = vld [vmem:[%s10187_s14 + $0x2ae8] sm:$0xff]  ;;  %v2705_v2 = vpack.c.bf16 %v8709_v60, %v11362_v18  ;;  %8705 = vst [vmem:[%s10210_s18 + $0x1560] sm:$0xff] %v2689_v58 }
  0xe2   : > { %v11368_v20 = vld [vmem:[%s10187_s14 + $0x12e0] sm:$0xff]  ;;  %v8715_v62 = vld [vmem:[%s10187_s14 + $0x12e8] sm:$0xff]  ;;  %v2713_v3 = vpack.c.bf16 %v8712_v61, %v11365_v19  ;;  %8708 = vst [vmem:[%s10210_s18 + $0x2160] sm:$0xff] %v2697_v59 }
  0xe3   : > { %v11380_v27 = vld [vmem:[%s10187_s14 + $0x3ae0] sm:$0xff]  ;;  %v2721_v4 = vpack.c.bf16 %v8715_v62, %v11368_v20  ;;  %v8718_v5 = vld [vmem:[%s10187_s14 + $0x3ae8] sm:$0xff]  ;;  %8711 = vst [vmem:[%s10210_s18 + $0x170] sm:$0xff] %v2705_v2 }
  0xe4   : > { %v11383_v28 = vld [vmem:[%s10187_s14 + $0x22e0] sm:$0xff]  ;;  %v8721_v6 = vld [vmem:[%s10187_s14 + $0x22e8] sm:$0xff]  ;;  %v2729_v11 = vpack.c.bf16 %v8718_v5, %v11380_v27  ;;  %8714 = vst [vmem:[%s10210_s18 + $0xd70] sm:$0xff] %v2713_v3 }
  0xe5   : > { %v11386_v29 = vld [vmem:[%s10187_s14 + $0xae0] sm:$0xff]  ;;  %v8724_v7 = vld [vmem:[%s10187_s14 + $0xae8] sm:$0xff]  ;;  %v2737_v12 = vpack.c.bf16 %v8721_v6, %v11383_v28  ;;  %8717 = vst [vmem:[%s10210_s18 + $0x1970] sm:$0xff] %v2721_v4 }
  0xe6   : > { %v11398_v36 = vld [vmem:[%s10187_s14 + $0x32e0] sm:$0xff]  ;;  %v2745_v13 = vpack.c.bf16 %v8724_v7, %v11386_v29  ;;  %v8727_v14 = vld [vmem:[%s10187_s14 + $0x32e8] sm:$0xff]  ;;  %8720 = vst [vmem:[%s10210_s18 + $0x570] sm:$0xff] %v2729_v11 }
  0xe7   : > { %v11401_v37 = vld [vmem:[%s10187_s14 + $0x1ae0] sm:$0xff]  ;;  %v8730_v15 = vld [vmem:[%s10187_s14 + $0x1ae8] sm:$0xff]  ;;  %v2753_v20 = vpack.c.bf16 %v8727_v14, %v11398_v36  ;;  %8723 = vst [vmem:[%s10210_s18 + $0x1170] sm:$0xff] %v2737_v12 }
  0xe8   : > { %v11404_v38 = vld [vmem:[%s10187_s14 + $0x2e0] sm:$0xff]  ;;  %v8733_v16 = vld [vmem:[%s10187_s14 + $0x2e8] sm:$0xff]  ;;  %v2761_v21 = vpack.c.bf16 %v8730_v15, %v11401_v37  ;;  %8726 = vst [vmem:[%s10210_s18 + $0x1d70] sm:$0xff] %v2745_v13 }
  0xe9   : > { %v11416_v45 = vld [vmem:[%s10187_s14 + $0x4300] sm:$0xff]  ;;  %v2769_v22 = vpack.c.bf16 %v8733_v16, %v11404_v38  ;;  %v8736_v23 = vld [vmem:[%s10187_s14 + $0x4308] sm:$0xff]  ;;  %8729 = vst [vmem:[%s10210_s18 + $0x970] sm:$0xff] %v2753_v20 }
  0xea   : > { %v11419_v46 = vld [vmem:[%s10187_s14 + $0x2b00] sm:$0xff]  ;;  %v8739_v24 = vld [vmem:[%s10187_s14 + $0x2b08] sm:$0xff]  ;;  %v2777_v29 = vpack.c.bf16 %v8736_v23, %v11416_v45  ;;  %8732 = vst [vmem:[%s10210_s18 + $0x1570] sm:$0xff] %v2761_v21 }
  0xeb   : > { %v11422_v47 = vld [vmem:[%s10187_s14 + $0x1300] sm:$0xff]  ;;  %v8742_v25 = vld [vmem:[%s10187_s14 + $0x1308] sm:$0xff]  ;;  %v2785_v30 = vpack.c.bf16 %v8739_v24, %v11419_v46  ;;  %8735 = vst [vmem:[%s10210_s18 + $0x2170] sm:$0xff] %v2769_v22 }
  0xec   : > { %v11434_v54 = vld [vmem:[%s10187_s14 + $0x3b00] sm:$0xff]  ;;  %v2793_v31 = vpack.c.bf16 %v8742_v25, %v11422_v47  ;;  %v8745_v32 = vld [vmem:[%s10187_s14 + $0x3b08] sm:$0xff]  ;;  %8738 = vst [vmem:[%s10210_s18 + $0x180] sm:$0xff] %v2777_v29 }
  0xed   : > { %v11437_v55 = vld [vmem:[%s10187_s14 + $0x2300] sm:$0xff]  ;;  %v8748_v33 = vld [vmem:[%s10187_s14 + $0x2308] sm:$0xff]  ;;  %v2801_v38 = vpack.c.bf16 %v8745_v32, %v11434_v54  ;;  %8741 = vst [vmem:[%s10210_s18 + $0xd80] sm:$0xff] %v2785_v30 }
  0xee   : > { %v11440_v56 = vld [vmem:[%s10187_s14 + $0xb00] sm:$0xff]  ;;  %v8751_v34 = vld [vmem:[%s10187_s14 + $0xb08] sm:$0xff]  ;;  %v2809_v39 = vpack.c.bf16 %v8748_v33, %v11437_v55  ;;  %8744 = vst [vmem:[%s10210_s18 + $0x1980] sm:$0xff] %v2793_v31 }
  0xef   : > { %v11452_v63 = vld [vmem:[%s10187_s14 + $0x3300] sm:$0xff]  ;;  %v2817_v40 = vpack.c.bf16 %v8751_v34, %v11440_v56  ;;  %v8754_v41 = vld [vmem:[%s10187_s14 + $0x3308] sm:$0xff]  ;;  %8747 = vst [vmem:[%s10210_s18 + $0x580] sm:$0xff] %v2801_v38 }
  0xf0   : > { %v11455_v0 = vld [vmem:[%s10187_s14 + $0x1b00] sm:$0xff]  ;;  %v8757_v42 = vld [vmem:[%s10187_s14 + $0x1b08] sm:$0xff]  ;;  %v2825_v47 = vpack.c.bf16 %v8754_v41, %v11452_v63  ;;  %8750 = vst [vmem:[%s10210_s18 + $0x1180] sm:$0xff] %v2809_v39 }
  0xf1   : > { %v11458_v1 = vld [vmem:[%s10187_s14 + $0x300] sm:$0xff]  ;;  %v8760_v43 = vld [vmem:[%s10187_s14 + $0x308] sm:$0xff]  ;;  %v2833_v48 = vpack.c.bf16 %v8757_v42, %v11455_v0  ;;  %8753 = vst [vmem:[%s10210_s18 + $0x1d80] sm:$0xff] %v2817_v40 }
  0xf2   : > { %v11470_v8 = vld [vmem:[%s10187_s14 + $0x4320] sm:$0xff]  ;;  %v2841_v49 = vpack.c.bf16 %v8760_v43, %v11458_v1  ;;  %v8763_v50 = vld [vmem:[%s10187_s14 + $0x4328] sm:$0xff]  ;;  %8756 = vst [vmem:[%s10210_s18 + $0x980] sm:$0xff] %v2825_v47 }
  0xf3   : > { %v11473_v9 = vld [vmem:[%s10187_s14 + $0x2b20] sm:$0xff]  ;;  %v8766_v51 = vld [vmem:[%s10187_s14 + $0x2b28] sm:$0xff]  ;;  %v2849_v56 = vpack.c.bf16 %v8763_v50, %v11470_v8  ;;  %8759 = vst [vmem:[%s10210_s18 + $0x1580] sm:$0xff] %v2833_v48 }
  0xf4   : > { %v11476_v10 = vld [vmem:[%s10187_s14 + $0x1320] sm:$0xff]  ;;  %v8769_v52 = vld [vmem:[%s10187_s14 + $0x1328] sm:$0xff]  ;;  %v2857_v57 = vpack.c.bf16 %v8766_v51, %v11473_v9  ;;  %8762 = vst [vmem:[%s10210_s18 + $0x2180] sm:$0xff] %v2841_v49 }
  0xf5   : > { %v11488_v17 = vld [vmem:[%s10187_s14 + $0x3b20] sm:$0xff]  ;;  %v2865_v58 = vpack.c.bf16 %v8769_v52, %v11476_v10  ;;  %v8772_v59 = vld [vmem:[%s10187_s14 + $0x3b28] sm:$0xff]  ;;  %8765 = vst [vmem:[%s10210_s18 + $0x190] sm:$0xff] %v2849_v56 }
  0xf6   : > { %v11491_v18 = vld [vmem:[%s10187_s14 + $0x2320] sm:$0xff]  ;;  %v8775_v60 = vld [vmem:[%s10187_s14 + $0x2328] sm:$0xff]  ;;  %v2873_v1 = vpack.c.bf16 %v8772_v59, %v11488_v17  ;;  %8768 = vst [vmem:[%s10210_s18 + $0xd90] sm:$0xff] %v2857_v57 }
  0xf7   : > { %v11494_v19 = vld [vmem:[%s10187_s14 + $0xb20] sm:$0xff]  ;;  %v8778_v61 = vld [vmem:[%s10187_s14 + $0xb28] sm:$0xff]  ;;  %v2881_v2 = vpack.c.bf16 %v8775_v60, %v11491_v18  ;;  %8771 = vst [vmem:[%s10210_s18 + $0x1990] sm:$0xff] %v2865_v58 }
  0xf8   : > { %v11506_v26 = vld [vmem:[%s10187_s14 + $0x3320] sm:$0xff]  ;;  %v2889_v3 = vpack.c.bf16 %v8778_v61, %v11494_v19  ;;  %v8781_v4 = vld [vmem:[%s10187_s14 + $0x3328] sm:$0xff]  ;;  %8774 = vst [vmem:[%s10210_s18 + $0x590] sm:$0xff] %v2873_v1 }
  0xf9   : > { %v11509_v27 = vld [vmem:[%s10187_s14 + $0x1b20] sm:$0xff]  ;;  %v8784_v5 = vld [vmem:[%s10187_s14 + $0x1b28] sm:$0xff]  ;;  %v2897_v10 = vpack.c.bf16 %v8781_v4, %v11506_v26  ;;  %8777 = vst [vmem:[%s10210_s18 + $0x1190] sm:$0xff] %v2881_v2 }
  0xfa   : > { %v11512_v28 = vld [vmem:[%s10187_s14 + $0x320] sm:$0xff]  ;;  %v8787_v6 = vld [vmem:[%s10187_s14 + $0x328] sm:$0xff]  ;;  %v2905_v11 = vpack.c.bf16 %v8784_v5, %v11509_v27  ;;  %8780 = vst [vmem:[%s10210_s18 + $0x1d90] sm:$0xff] %v2889_v3 }
  0xfb   : > { %v11524_v35 = vld [vmem:[%s10187_s14 + $0x4340] sm:$0xff]  ;;  %v2913_v12 = vpack.c.bf16 %v8787_v6, %v11512_v28  ;;  %v8790_v13 = vld [vmem:[%s10187_s14 + $0x4348] sm:$0xff]  ;;  %8783 = vst [vmem:[%s10210_s18 + $0x990] sm:$0xff] %v2897_v10 }
  0xfc   : > { %v11527_v36 = vld [vmem:[%s10187_s14 + $0x2b40] sm:$0xff]  ;;  %v8793_v14 = vld [vmem:[%s10187_s14 + $0x2b48] sm:$0xff]  ;;  %v2921_v19 = vpack.c.bf16 %v8790_v13, %v11524_v35  ;;  %8786 = vst [vmem:[%s10210_s18 + $0x1590] sm:$0xff] %v2905_v11 }
  0xfd   : > { %v11530_v37 = vld [vmem:[%s10187_s14 + $0x1340] sm:$0xff]  ;;  %v8796_v15 = vld [vmem:[%s10187_s14 + $0x1348] sm:$0xff]  ;;  %v2929_v20 = vpack.c.bf16 %v8793_v14, %v11527_v36  ;;  %8789 = vst [vmem:[%s10210_s18 + $0x2190] sm:$0xff] %v2913_v12 }
  0xfe   : > { %v11542_v44 = vld [vmem:[%s10187_s14 + $0x3b40] sm:$0xff]  ;;  %v2937_v21 = vpack.c.bf16 %v8796_v15, %v11530_v37  ;;  %v8799_v22 = vld [vmem:[%s10187_s14 + $0x3b48] sm:$0xff]  ;;  %8792 = vst [vmem:[%s10210_s18 + $0x1a0] sm:$0xff] %v2921_v19 }
  0xff   : > { %v11545_v45 = vld [vmem:[%s10187_s14 + $0x2340] sm:$0xff]  ;;  %v8802_v23 = vld [vmem:[%s10187_s14 + $0x2348] sm:$0xff]  ;;  %v2945_v28 = vpack.c.bf16 %v8799_v22, %v11542_v44  ;;  %8795 = vst [vmem:[%s10210_s18 + $0xda0] sm:$0xff] %v2929_v20 }
 0x100   : > { %v11548_v46 = vld [vmem:[%s10187_s14 + $0xb40] sm:$0xff]  ;;  %v8805_v24 = vld [vmem:[%s10187_s14 + $0xb48] sm:$0xff]  ;;  %v2953_v29 = vpack.c.bf16 %v8802_v23, %v11545_v45  ;;  %8798 = vst [vmem:[%s10210_s18 + $0x19a0] sm:$0xff] %v2937_v21 }
 0x101   : > { %v11560_v53 = vld [vmem:[%s10187_s14 + $0x3340] sm:$0xff]  ;;  %v2961_v30 = vpack.c.bf16 %v8805_v24, %v11548_v46  ;;  %v8808_v31 = vld [vmem:[%s10187_s14 + $0x3348] sm:$0xff]  ;;  %8801 = vst [vmem:[%s10210_s18 + $0x5a0] sm:$0xff] %v2945_v28 }
 0x102   : > { %v11563_v54 = vld [vmem:[%s10187_s14 + $0x1b40] sm:$0xff]  ;;  %v8811_v32 = vld [vmem:[%s10187_s14 + $0x1b48] sm:$0xff]  ;;  %v2969_v37 = vpack.c.bf16 %v8808_v31, %v11560_v53  ;;  %8804 = vst [vmem:[%s10210_s18 + $0x11a0] sm:$0xff] %v2953_v29 }
 0x103   : > { %v11566_v55 = vld [vmem:[%s10187_s14 + $0x340] sm:$0xff]  ;;  %v8814_v33 = vld [vmem:[%s10187_s14 + $0x348] sm:$0xff]  ;;  %v2977_v38 = vpack.c.bf16 %v8811_v32, %v11563_v54  ;;  %8807 = vst [vmem:[%s10210_s18 + $0x1da0] sm:$0xff] %v2961_v30 }
 0x104   : > { %v11578_v62 = vld [vmem:[%s10187_s14 + $0x4360] sm:$0xff]  ;;  %v2985_v39 = vpack.c.bf16 %v8814_v33, %v11566_v55  ;;  %v8817_v40 = vld [vmem:[%s10187_s14 + $0x4368] sm:$0xff]  ;;  %8810 = vst [vmem:[%s10210_s18 + $0x9a0] sm:$0xff] %v2969_v37 }
 0x105   : > { %v11581_v63 = vld [vmem:[%s10187_s14 + $0x2b60] sm:$0xff]  ;;  %v8820_v41 = vld [vmem:[%s10187_s14 + $0x2b68] sm:$0xff]  ;;  %v2993_v46 = vpack.c.bf16 %v8817_v40, %v11578_v62  ;;  %8813 = vst [vmem:[%s10210_s18 + $0x15a0] sm:$0xff] %v2977_v38 }
 0x106   : > { %v11584_v0 = vld [vmem:[%s10187_s14 + $0x1360] sm:$0xff]  ;;  %v8823_v42 = vld [vmem:[%s10187_s14 + $0x1368] sm:$0xff]  ;;  %v3001_v47 = vpack.c.bf16 %v8820_v41, %v11581_v63  ;;  %8816 = vst [vmem:[%s10210_s18 + $0x21a0] sm:$0xff] %v2985_v39 }
 0x107   : > { %v11596_v7 = vld [vmem:[%s10187_s14 + $0x3b60] sm:$0xff]  ;;  %v3009_v48 = vpack.c.bf16 %v8823_v42, %v11584_v0  ;;  %v8826_v49 = vld [vmem:[%s10187_s14 + $0x3b68] sm:$0xff]  ;;  %8819 = vst [vmem:[%s10210_s18 + $0x1b0] sm:$0xff] %v2993_v46 }
 0x108   : > { %v11599_v8 = vld [vmem:[%s10187_s14 + $0x2360] sm:$0xff]  ;;  %v8829_v50 = vld [vmem:[%s10187_s14 + $0x2368] sm:$0xff]  ;;  %v3017_v55 = vpack.c.bf16 %v8826_v49, %v11596_v7  ;;  %8822 = vst [vmem:[%s10210_s18 + $0xdb0] sm:$0xff] %v3001_v47 }
 0x109   : > { %v11602_v9 = vld [vmem:[%s10187_s14 + $0xb60] sm:$0xff]  ;;  %v8832_v51 = vld [vmem:[%s10187_s14 + $0xb68] sm:$0xff]  ;;  %v3025_v56 = vpack.c.bf16 %v8829_v50, %v11599_v8  ;;  %8825 = vst [vmem:[%s10210_s18 + $0x19b0] sm:$0xff] %v3009_v48 }
 0x10a   : > { %v11614_v16 = vld [vmem:[%s10187_s14 + $0x3360] sm:$0xff]  ;;  %v3033_v57 = vpack.c.bf16 %v8832_v51, %v11602_v9  ;;  %v8835_v58 = vld [vmem:[%s10187_s14 + $0x3368] sm:$0xff]  ;;  %8828 = vst [vmem:[%s10210_s18 + $0x5b0] sm:$0xff] %v3017_v55 }
 0x10b   : > { %v11617_v17 = vld [vmem:[%s10187_s14 + $0x1b60] sm:$0xff]  ;;  %v8838_v59 = vld [vmem:[%s10187_s14 + $0x1b68] sm:$0xff]  ;;  %v3041_v0 = vpack.c.bf16 %v8835_v58, %v11614_v16  ;;  %8831 = vst [vmem:[%s10210_s18 + $0x11b0] sm:$0xff] %v3025_v56 }
 0x10c   : > { %v11620_v18 = vld [vmem:[%s10187_s14 + $0x360] sm:$0xff]  ;;  %v8841_v60 = vld [vmem:[%s10187_s14 + $0x368] sm:$0xff]  ;;  %v3049_v1 = vpack.c.bf16 %v8838_v59, %v11617_v17  ;;  %8834 = vst [vmem:[%s10210_s18 + $0x1db0] sm:$0xff] %v3033_v57 }
 0x10d   : > { %v11632_v25 = vld [vmem:[%s10187_s14 + $0x4380] sm:$0xff]  ;;  %v3057_v2 = vpack.c.bf16 %v8841_v60, %v11620_v18  ;;  %v8844_v3 = vld [vmem:[%s10187_s14 + $0x4388] sm:$0xff]  ;;  %8837 = vst [vmem:[%s10210_s18 + $0x9b0] sm:$0xff] %v3041_v0 }
 0x10e   : > { %v11635_v26 = vld [vmem:[%s10187_s14 + $0x2b80] sm:$0xff]  ;;  %v8847_v4 = vld [vmem:[%s10187_s14 + $0x2b88] sm:$0xff]  ;;  %v3065_v9 = vpack.c.bf16 %v8844_v3, %v11632_v25  ;;  %8840 = vst [vmem:[%s10210_s18 + $0x15b0] sm:$0xff] %v3049_v1 }
 0x10f   : > { %v11638_v27 = vld [vmem:[%s10187_s14 + $0x1380] sm:$0xff]  ;;  %v8850_v5 = vld [vmem:[%s10187_s14 + $0x1388] sm:$0xff]  ;;  %v3073_v10 = vpack.c.bf16 %v8847_v4, %v11635_v26  ;;  %8843 = vst [vmem:[%s10210_s18 + $0x21b0] sm:$0xff] %v3057_v2 }
 0x110   : > { %v11650_v34 = vld [vmem:[%s10187_s14 + $0x3b80] sm:$0xff]  ;;  %v3081_v11 = vpack.c.bf16 %v8850_v5, %v11638_v27  ;;  %v8853_v12 = vld [vmem:[%s10187_s14 + $0x3b88] sm:$0xff]  ;;  %8846 = vst [vmem:[%s10210_s18 + $0x1c0] sm:$0xff] %v3065_v9 }
 0x111   : > { %v11653_v35 = vld [vmem:[%s10187_s14 + $0x2380] sm:$0xff]  ;;  %v8856_v13 = vld [vmem:[%s10187_s14 + $0x2388] sm:$0xff]  ;;  %v3089_v18 = vpack.c.bf16 %v8853_v12, %v11650_v34  ;;  %8849 = vst [vmem:[%s10210_s18 + $0xdc0] sm:$0xff] %v3073_v10 }
 0x112   : > { %v11656_v36 = vld [vmem:[%s10187_s14 + $0xb80] sm:$0xff]  ;;  %v8859_v14 = vld [vmem:[%s10187_s14 + $0xb88] sm:$0xff]  ;;  %v3097_v19 = vpack.c.bf16 %v8856_v13, %v11653_v35  ;;  %8852 = vst [vmem:[%s10210_s18 + $0x19c0] sm:$0xff] %v3081_v11 }
 0x113   : > { %v11668_v43 = vld [vmem:[%s10187_s14 + $0x3380] sm:$0xff]  ;;  %v3105_v20 = vpack.c.bf16 %v8859_v14, %v11656_v36  ;;  %v8862_v21 = vld [vmem:[%s10187_s14 + $0x3388] sm:$0xff]  ;;  %8855 = vst [vmem:[%s10210_s18 + $0x5c0] sm:$0xff] %v3089_v18 }
 0x114   : > { %v11671_v44 = vld [vmem:[%s10187_s14 + $0x1b80] sm:$0xff]  ;;  %v8865_v22 = vld [vmem:[%s10187_s14 + $0x1b88] sm:$0xff]  ;;  %v3113_v27 = vpack.c.bf16 %v8862_v21, %v11668_v43  ;;  %8858 = vst [vmem:[%s10210_s18 + $0x11c0] sm:$0xff] %v3097_v19 }
 0x115   : > { %v11674_v45 = vld [vmem:[%s10187_s14 + $0x380] sm:$0xff]  ;;  %v8868_v23 = vld [vmem:[%s10187_s14 + $0x388] sm:$0xff]  ;;  %v3121_v28 = vpack.c.bf16 %v8865_v22, %v11671_v44  ;;  %8861 = vst [vmem:[%s10210_s18 + $0x1dc0] sm:$0xff] %v3105_v20 }
 0x116   : > { %v11686_v52 = vld [vmem:[%s10187_s14 + $0x43a0] sm:$0xff]  ;;  %v3129_v29 = vpack.c.bf16 %v8868_v23, %v11674_v45  ;;  %v8871_v30 = vld [vmem:[%s10187_s14 + $0x43a8] sm:$0xff]  ;;  %8864 = vst [vmem:[%s10210_s18 + $0x9c0] sm:$0xff] %v3113_v27 }
 0x117   : > { %v11689_v53 = vld [vmem:[%s10187_s14 + $0x2ba0] sm:$0xff]  ;;  %v8874_v31 = vld [vmem:[%s10187_s14 + $0x2ba8] sm:$0xff]  ;;  %v3137_v36 = vpack.c.bf16 %v8871_v30, %v11686_v52  ;;  %8867 = vst [vmem:[%s10210_s18 + $0x15c0] sm:$0xff] %v3121_v28 }
 0x118   : > { %v11692_v54 = vld [vmem:[%s10187_s14 + $0x13a0] sm:$0xff]  ;;  %v8877_v32 = vld [vmem:[%s10187_s14 + $0x13a8] sm:$0xff]  ;;  %v3145_v37 = vpack.c.bf16 %v8874_v31, %v11689_v53  ;;  %8870 = vst [vmem:[%s10210_s18 + $0x21c0] sm:$0xff] %v3129_v29 }
 0x119   : > { %v11704_v61 = vld [vmem:[%s10187_s14 + $0x3ba0] sm:$0xff]  ;;  %v3153_v38 = vpack.c.bf16 %v8877_v32, %v11692_v54  ;;  %v8880_v39 = vld [vmem:[%s10187_s14 + $0x3ba8] sm:$0xff]  ;;  %8873 = vst [vmem:[%s10210_s18 + $0x1d0] sm:$0xff] %v3137_v36  ;;  %v8952_v32 = vld [vmem:[%s10187_s14 + $0x4010] sm:$0xff] }
 0x11a   : > { %v11707_v62 = vld [vmem:[%s10187_s14 + $0x23a0] sm:$0xff]  ;;  %v8883_v40 = vld [vmem:[%s10187_s14 + $0x23a8] sm:$0xff]  ;;  %v3161_v45 = vpack.c.bf16 %v8880_v39, %v11704_v61  ;;  %8876 = vst [vmem:[%s10210_s18 + $0xdd0] sm:$0xff] %v3145_v37  ;;  %v8956_v36 = vld [vmem:[%s10187_s14 + $0x2010] sm:$0xff] }
 0x11b   : > { %v11710_v63 = vld [vmem:[%s10187_s14 + $0xba0] sm:$0xff]  ;;  %v8886_v41 = vld [vmem:[%s10187_s14 + $0xba8] sm:$0xff]  ;;  %v3169_v46 = vpack.c.bf16 %v8883_v40, %v11707_v62  ;;  %8879 = vst [vmem:[%s10210_s18 + $0x19d0] sm:$0xff] %v3153_v38  ;;  %v8957_v37 = vld [vmem:[%s10187_s14 + $0x810] sm:$0xff] }
 0x11c   : > { %v11722_v6 = vld [vmem:[%s10187_s14 + $0x33a0] sm:$0xff]  ;;  %v3177_v47 = vpack.c.bf16 %v8886_v41, %v11710_v63  ;;  %v8889_v48 = vld [vmem:[%s10187_s14 + $0x33a8] sm:$0xff]  ;;  %8882 = vst [vmem:[%s10210_s18 + $0x5d0] sm:$0xff] %v3161_v45  ;;  %v8958_v38 = vld [vmem:[%s10187_s14 + $0x3010] sm:$0xff] }
 0x11d   : > { %v11725_v7 = vld [vmem:[%s10187_s14 + $0x1ba0] sm:$0xff]  ;;  %v8892_v49 = vld [vmem:[%s10187_s14 + $0x1ba8] sm:$0xff]  ;;  %v3185_v54 = vpack.c.bf16 %v8889_v48, %v11722_v6  ;;  %8885 = vst [vmem:[%s10210_s18 + $0x11d0] sm:$0xff] %v3169_v46  ;;  %v8959_v39 = vld [vmem:[%s10187_s14 + $0x1810] sm:$0xff] }
 0x11e   : > { %v11728_v8 = vld [vmem:[%s10187_s14 + $0x3a0] sm:$0xff]  ;;  %v8895_v50 = vld [vmem:[%s10187_s14 + $0x3a8] sm:$0xff]  ;;  %v3193_v55 = vpack.c.bf16 %v8892_v49, %v11725_v7  ;;  %8888 = vst [vmem:[%s10210_s18 + $0x1dd0] sm:$0xff] %v3177_v47  ;;  %v8960_v40 = vld [vmem:[%s10187_s14 + $0x10] sm:$0xff] }
 0x11f   : > { %v11740_v15 = vld [vmem:[%s10187_s14 + $0x43c0] sm:$0xff]  ;;  %v3201_v56 = vpack.c.bf16 %v8895_v50, %v11728_v8  ;;  %v8898_v57 = vld [vmem:[%s10187_s14 + $0x43c8] sm:$0xff]  ;;  %8891 = vst [vmem:[%s10210_s18 + $0x9d0] sm:$0xff] %v3185_v54  ;;  %v11896_v41 = vld [vmem:[%s10187_s14 + $0x4030] sm:$0xff] }
 0x120   : > { %v11743_v16 = vld [vmem:[%s10187_s14 + $0x2bc0] sm:$0xff]  ;;  %v8901_v58 = vld [vmem:[%s10187_s14 + $0x2bc8] sm:$0xff]  ;;  %v3209_v63 = vpack.c.bf16 %v8898_v57, %v11740_v15  ;;  %8894 = vst [vmem:[%s10210_s18 + $0x15d0] sm:$0xff] %v3193_v55  ;;  %v11908_v45 = vld [vmem:[%s10187_s14 + $0x2030] sm:$0xff] }
 0x121   : > { %v11746_v17 = vld [vmem:[%s10187_s14 + $0x13c0] sm:$0xff]  ;;  %v8904_v59 = vld [vmem:[%s10187_s14 + $0x13c8] sm:$0xff]  ;;  %v3217_v0 = vpack.c.bf16 %v8901_v58, %v11743_v16  ;;  %8897 = vst [vmem:[%s10210_s18 + $0x21d0] sm:$0xff] %v3201_v56  ;;  %v11911_v46 = vld [vmem:[%s10187_s14 + $0x830] sm:$0xff] }
 0x122   : > { %v11758_v24 = vld [vmem:[%s10187_s14 + $0x3bc0] sm:$0xff]  ;;  %v3225_v1 = vpack.c.bf16 %v8904_v59, %v11746_v17  ;;  %v8907_v2 = vld [vmem:[%s10187_s14 + $0x3bc8] sm:$0xff]  ;;  %8900 = vst [vmem:[%s10210_s18 + $0x1e0] sm:$0xff] %v3209_v63  ;;  %v9240_v47 = vld [vmem:[%s10187_s14 + $0x4018] sm:$0xff] }
 0x123   : > { %v11761_v25 = vld [vmem:[%s10187_s14 + $0x23c0] sm:$0xff]  ;;  %v8910_v3 = vld [vmem:[%s10187_s14 + $0x23c8] sm:$0xff]  ;;  %v3233_v5 = vpack.c.bf16 %v8907_v2, %v11758_v24  ;;  %8903 = vst [vmem:[%s10210_s18 + $0xde0] sm:$0xff] %v3217_v0  ;;  %v9243_v48 = vld [vmem:[%s10187_s14 + $0x2818] sm:$0xff] }
 0x124   : > { %v11764_v26 = vld [vmem:[%s10187_s14 + $0xbc0] sm:$0xff]  ;;  %v8913_v4 = vld [vmem:[%s10187_s14 + $0xbc8] sm:$0xff]  ;;  %v3241_v6 = vpack.c.bf16 %v8910_v3, %v11761_v25  ;;  %8906 = vst [vmem:[%s10210_s18 + $0x19e0] sm:$0xff] %v3225_v1  ;;  %v9246_v49 = vld [vmem:[%s10187_s14 + $0x1018] sm:$0xff] }
 0x125   : > { %v11776_v33 = vld [vmem:[%s10187_s14 + $0x33c0] sm:$0xff]  ;;  %v3249_v7 = vpack.c.bf16 %v8913_v4, %v11764_v26  ;;  %v8916_v8 = vld [vmem:[%s10187_s14 + $0x33c8] sm:$0xff]  ;;  %8909 = vst [vmem:[%s10210_s18 + $0x5e0] sm:$0xff] %v3233_v5  ;;  %v11917_v50 = vld [vmem:[%s10187_s14 + $0x3030] sm:$0xff] }
 0x126   : > { %v11779_v34 = vld [vmem:[%s10187_s14 + $0x1bc0] sm:$0xff]  ;;  %v8919_v9 = vld [vmem:[%s10187_s14 + $0x1bc8] sm:$0xff]  ;;  %v3257_v11 = vpack.c.bf16 %v8916_v8, %v11776_v33  ;;  %8912 = vst [vmem:[%s10210_s18 + $0x11e0] sm:$0xff] %v3241_v6  ;;  %v8953_v33 = vld [vmem:[%s10187_s14 + $0x2810] sm:$0xff] }
 0x127   : > { %v11782_v35 = vld [vmem:[%s10187_s14 + $0x3c0] sm:$0xff]  ;;  %v8922_v10 = vld [vmem:[%s10187_s14 + $0x3c8] sm:$0xff]  ;;  %v3265_v12 = vpack.c.bf16 %v8919_v9, %v11779_v34  ;;  %8915 = vst [vmem:[%s10210_s18 + $0x1de0] sm:$0xff] %v3249_v7  ;;  %v8954_v34 = vld [vmem:[%s10187_s14 + $0x1010] sm:$0xff]  ;;  %v4225_v54 = vpack.c.bf16 %v9243_v48, %v8953_v33 }
 0x128   : > { %v11794_v42 = vld [vmem:[%s10187_s14 + $0x43e0] sm:$0xff]  ;;  %v3273_v13 = vpack.c.bf16 %v8922_v10, %v11782_v35  ;;  %v8925_v14 = vld [vmem:[%s10187_s14 + $0x43e8] sm:$0xff]  ;;  %8918 = vst [vmem:[%s10210_s18 + $0x9e0] sm:$0xff] %v3257_v11  ;;  %v8955_v35 = vld [vmem:[%s10187_s14 + $0x3810] sm:$0xff]  ;;  %v4233_v55 = vpack.c.bf16 %v9246_v49, %v8954_v34 }
 0x129   : > { %v11797_v43 = vld [vmem:[%s10187_s14 + $0x2be0] sm:$0xff]  ;;  %v8928_v15 = vld [vmem:[%s10187_s14 + $0x2be8] sm:$0xff]  ;;  %v3281_v17 = vpack.c.bf16 %v8925_v14, %v11794_v42  ;;  %8921 = vst [vmem:[%s10210_s18 + $0x15e0] sm:$0xff] %v3265_v12  ;;  %v11899_v42 = vld [vmem:[%s10187_s14 + $0x2830] sm:$0xff] }
 0x12a   : > { %v11800_v44 = vld [vmem:[%s10187_s14 + $0x13e0] sm:$0xff]  ;;  %v8931_v16 = vld [vmem:[%s10187_s14 + $0x13e8] sm:$0xff]  ;;  %v3289_v18 = vpack.c.bf16 %v8928_v15, %v11797_v43  ;;  %8924 = vst [vmem:[%s10210_s18 + $0x21e0] sm:$0xff] %v3273_v13  ;;  %v11902_v43 = vld [vmem:[%s10187_s14 + $0x1030] sm:$0xff] }
 0x12b   : > { %v11812_v51 = vld [vmem:[%s10187_s14 + $0x3be0] sm:$0xff]  ;;  %v3297_v19 = vpack.c.bf16 %v8931_v16, %v11800_v44  ;;  %v8934_v20 = vld [vmem:[%s10187_s14 + $0x3be8] sm:$0xff]  ;;  %8927 = vst [vmem:[%s10210_s18 + $0x1f0] sm:$0xff] %v3281_v17  ;;  %v11905_v44 = vld [vmem:[%s10187_s14 + $0x3830] sm:$0xff] }
 0x12c   : > { %v11815_v52 = vld [vmem:[%s10187_s14 + $0x23e0] sm:$0xff]  ;;  %v8937_v21 = vld [vmem:[%s10187_s14 + $0x23e8] sm:$0xff]  ;;  %v3305_v23 = vpack.c.bf16 %v8934_v20, %v11812_v51  ;;  %8930 = vst [vmem:[%s10210_s18 + $0xdf0] sm:$0xff] %v3289_v18  ;;  %v11920_v51 = vld [vmem:[%s10187_s14 + $0x1830] sm:$0xff] }
 0x12d   : > { %v11818_v53 = vld [vmem:[%s10187_s14 + $0xbe0] sm:$0xff]  ;;  %v8940_v22 = vld [vmem:[%s10187_s14 + $0xbe8] sm:$0xff]  ;;  %v3313_v24 = vpack.c.bf16 %v8937_v21, %v11815_v52  ;;  %8933 = vst [vmem:[%s10210_s18 + $0x19f0] sm:$0xff] %v3297_v19  ;;  %v11923_v52 = vld [vmem:[%s10187_s14 + $0x30] sm:$0xff] }
 0x12e   : > { %v8085_v60 = vld [vmem:[%s10187_s14 + $0x33e0] sm:$0xff]  ;;  %v3321_v25 = vpack.c.bf16 %v8940_v22, %v11818_v53  ;;  %v8943_v26 = vld [vmem:[%s10187_s14 + $0x33e8] sm:$0xff]  ;;  %8936 = vst [vmem:[%s10210_s18 + $0x5f0] sm:$0xff] %v3305_v23  ;;  %v4217_v53 = vpack.c.bf16 %v9240_v47, %v8952_v32  ;;  %v9249_v56 = vld [vmem:[%s10187_s14 + $0x3818] sm:$0xff] }
 0x12f   : > { %v8086_v61 = vld [vmem:[%s10187_s14 + $0x1be0] sm:$0xff]  ;;  %v8946_v27 = vld [vmem:[%s10187_s14 + $0x1be8] sm:$0xff]  ;;  %v3329_v29 = vpack.c.bf16 %v8943_v26, %v8085_v60  ;;  %8939 = vst [vmem:[%s10210_s18 + $0x11f0] sm:$0xff] %v3313_v24  ;;  %v9252_v57 = vld [vmem:[%s10187_s14 + $0x2018] sm:$0xff] }
 0x130   : > { %v8087_v62 = vld [vmem:[%s10187_s14 + $0x3e0] sm:$0xff]  ;;  %v8949_v28 = vld [vmem:[%s10187_s14 + $0x3e8] sm:$0xff]  ;;  %v3337_v30 = vpack.c.bf16 %v8946_v27, %v8086_v61  ;;  %8942 = vst [vmem:[%s10210_s18 + $0x1df0] sm:$0xff] %v3321_v25  ;;  %v9255_v58 = vld [vmem:[%s10187_s14 + $0x818] sm:$0xff]  ;;  %v4249_v63 = vpack.c.bf16 %v9252_v57, %v8956_v36 }
 0x131   : > { %v3345_v31 = vpack.c.bf16 %v8949_v28, %v8087_v62  ;;  %8945 = vst [vmem:[%s10210_s18 + $0x9f0] sm:$0xff] %v3329_v29  ;;  %v11929_v59 = vld [vmem:[%s10187_s14 + $0x4050] sm:$0xff]  ;;  %v4241_v62 = vpack.c.bf16 %v9249_v56, %v8955_v35  ;;  %v4257_v0 = vpack.c.bf16 %v9255_v58, %v8957_v37  ;;  %v9258_v1 = vld [vmem:[%s10187_s14 + $0x3018] sm:$0xff]  ;;  %9242 = vst [vmem:[%s10210_s18 + $0x8] sm:$0xff] %v4217_v53 }
 0x132   : > { %8948 = vst [vmem:[%s10210_s18 + $0x15f0] sm:$0xff] %v3337_v30  ;;  %v11932_v60 = vld [vmem:[%s10187_s14 + $0x2850] sm:$0xff]  ;;  %v9261_v2 = vld [vmem:[%s10187_s14 + $0x1818] sm:$0xff]  ;;  %9245 = vst [vmem:[%s10210_s18 + $0xc08] sm:$0xff] %v4225_v54  ;;  %v4265_v7 = vpack.c.bf16 %v9258_v1, %v8958_v38 }
 0x133   : > { %8951 = vst [vmem:[%s10210_s18 + $0x21f0] sm:$0xff] %v3345_v31  ;;  %v11935_v61 = vld [vmem:[%s10187_s14 + $0x1050] sm:$0xff]  ;;  %v9264_v3 = vld [vmem:[%s10187_s14 + $0x18] sm:$0xff]  ;;  %9248 = vst [vmem:[%s10210_s18 + $0x1808] sm:$0xff] %v4233_v55  ;;  %v4273_v8 = vpack.c.bf16 %v9261_v2, %v8959_v39 }
 0x134   : > { %v11941_v4 = vld [vmem:[%s10187_s14 + $0x3850] sm:$0xff]  ;;  %v4281_v9 = vpack.c.bf16 %v9264_v3, %v8960_v40  ;;  %v9267_v10 = vld [vmem:[%s10187_s14 + $0x4038] sm:$0xff]  ;;  %9251 = vst [vmem:[%s10210_s18 + $0x408] sm:$0xff] %v4241_v62  ;;  %9254 = vst [vmem:[%s10210_s18 + $0x1008] sm:$0xff] %v4249_v63 }
 0x135   : > { %v11944_v5 = vld [vmem:[%s10187_s14 + $0x2050] sm:$0xff]  ;;  %v9270_v11 = vld [vmem:[%s10187_s14 + $0x2838] sm:$0xff]  ;;  %9257 = vst [vmem:[%s10210_s18 + $0x1c08] sm:$0xff] %v4257_v0  ;;  %v4289_v16 = vpack.c.bf16 %v9267_v10, %v11896_v41  ;;  %9260 = vst [vmem:[%s10210_s18 + $0x808] sm:$0xff] %v4265_v7 }
 0x136   : > { %v11947_v6 = vld [vmem:[%s10187_s14 + $0x850] sm:$0xff]  ;;  %v9273_v12 = vld [vmem:[%s10187_s14 + $0x1038] sm:$0xff]  ;;  %v4297_v17 = vpack.c.bf16 %v9270_v11, %v11899_v42  ;;  %9263 = vst [vmem:[%s10210_s18 + $0x1408] sm:$0xff] %v4273_v8  ;;  %9266 = vst [vmem:[%s10210_s18 + $0x2008] sm:$0xff] %v4281_v9 }
 0x137   : > { %v11956_v13 = vld [vmem:[%s10187_s14 + $0x3050] sm:$0xff]  ;;  %v4305_v18 = vpack.c.bf16 %v9273_v12, %v11902_v43  ;;  %v9276_v19 = vld [vmem:[%s10187_s14 + $0x3838] sm:$0xff]  ;;  %9269 = vst [vmem:[%s10210_s18 + $0x18] sm:$0xff] %v4289_v16 }
 0x138   : > { %v11959_v14 = vld [vmem:[%s10187_s14 + $0x1850] sm:$0xff]  ;;  %v9279_v20 = vld [vmem:[%s10187_s14 + $0x2038] sm:$0xff]  ;;  %v4313_v25 = vpack.c.bf16 %v9276_v19, %v11905_v44  ;;  %9272 = vst [vmem:[%s10210_s18 + $0xc18] sm:$0xff] %v4297_v17 }
 0x139   : > { %v11962_v15 = vld [vmem:[%s10187_s14 + $0x50] sm:$0xff]  ;;  %v9282_v21 = vld [vmem:[%s10187_s14 + $0x838] sm:$0xff]  ;;  %v4321_v26 = vpack.c.bf16 %v9279_v20, %v11908_v45  ;;  %9275 = vst [vmem:[%s10210_s18 + $0x1818] sm:$0xff] %v4305_v18 }
 0x13a   : > { %v11974_v22 = vld [vmem:[%s10187_s14 + $0x4070] sm:$0xff]  ;;  %v4329_v27 = vpack.c.bf16 %v9282_v21, %v11911_v46  ;;  %v9285_v28 = vld [vmem:[%s10187_s14 + $0x3038] sm:$0xff]  ;;  %9278 = vst [vmem:[%s10210_s18 + $0x418] sm:$0xff] %v4313_v25 }
 0x13b   : > { %v11977_v23 = vld [vmem:[%s10187_s14 + $0x2870] sm:$0xff]  ;;  %v9288_v29 = vld [vmem:[%s10187_s14 + $0x1838] sm:$0xff]  ;;  %v4337_v34 = vpack.c.bf16 %v9285_v28, %v11917_v50  ;;  %9281 = vst [vmem:[%s10210_s18 + $0x1018] sm:$0xff] %v4321_v26 }
 0x13c   : > { %v11980_v24 = vld [vmem:[%s10187_s14 + $0x1070] sm:$0xff]  ;;  %v9291_v30 = vld [vmem:[%s10187_s14 + $0x38] sm:$0xff]  ;;  %v4345_v35 = vpack.c.bf16 %v9288_v29, %v11920_v51  ;;  %9284 = vst [vmem:[%s10210_s18 + $0x1c18] sm:$0xff] %v4329_v27 }
 0x13d   : > { %v11992_v31 = vld [vmem:[%s10187_s14 + $0x3870] sm:$0xff]  ;;  %v4353_v36 = vpack.c.bf16 %v9291_v30, %v11923_v52  ;;  %v9294_v37 = vld [vmem:[%s10187_s14 + $0x4058] sm:$0xff]  ;;  %9287 = vst [vmem:[%s10210_s18 + $0x818] sm:$0xff] %v4337_v34 }
 0x13e   : > { %v11995_v32 = vld [vmem:[%s10187_s14 + $0x2070] sm:$0xff]  ;;  %v9297_v38 = vld [vmem:[%s10187_s14 + $0x2858] sm:$0xff]  ;;  %v4361_v43 = vpack.c.bf16 %v9294_v37, %v11929_v59  ;;  %9290 = vst [vmem:[%s10210_s18 + $0x1418] sm:$0xff] %v4345_v35 }
 0x13f   : > { %v11998_v33 = vld [vmem:[%s10187_s14 + $0x870] sm:$0xff]  ;;  %v9300_v39 = vld [vmem:[%s10187_s14 + $0x1058] sm:$0xff]  ;;  %v4369_v44 = vpack.c.bf16 %v9297_v38, %v11932_v60  ;;  %9293 = vst [vmem:[%s10210_s18 + $0x2018] sm:$0xff] %v4353_v36 }
 0x140   : > { %v12010_v40 = vld [vmem:[%s10187_s14 + $0x3070] sm:$0xff]  ;;  %v4377_v45 = vpack.c.bf16 %v9300_v39, %v11935_v61  ;;  %v9303_v46 = vld [vmem:[%s10187_s14 + $0x3858] sm:$0xff]  ;;  %9296 = vst [vmem:[%s10210_s18 + $0x28] sm:$0xff] %v4361_v43 }
 0x141   : > { %v12013_v41 = vld [vmem:[%s10187_s14 + $0x1870] sm:$0xff]  ;;  %v9306_v47 = vld [vmem:[%s10187_s14 + $0x2058] sm:$0xff]  ;;  %v4385_v52 = vpack.c.bf16 %v9303_v46, %v11941_v4  ;;  %9299 = vst [vmem:[%s10210_s18 + $0xc28] sm:$0xff] %v4369_v44 }
 0x142   : > { %v12016_v42 = vld [vmem:[%s10187_s14 + $0x70] sm:$0xff]  ;;  %v9309_v48 = vld [vmem:[%s10187_s14 + $0x858] sm:$0xff]  ;;  %v4393_v53 = vpack.c.bf16 %v9306_v47, %v11944_v5  ;;  %9302 = vst [vmem:[%s10210_s18 + $0x1828] sm:$0xff] %v4377_v45 }
 0x143   : > { %v12028_v49 = vld [vmem:[%s10187_s14 + $0x4090] sm:$0xff]  ;;  %v4401_v54 = vpack.c.bf16 %v9309_v48, %v11947_v6  ;;  %v9312_v55 = vld [vmem:[%s10187_s14 + $0x3058] sm:$0xff]  ;;  %9305 = vst [vmem:[%s10210_s18 + $0x428] sm:$0xff] %v4385_v52 }
 0x144   : > { %v12031_v50 = vld [vmem:[%s10187_s14 + $0x2890] sm:$0xff]  ;;  %v9315_v56 = vld [vmem:[%s10187_s14 + $0x1858] sm:$0xff]  ;;  %v4409_v61 = vpack.c.bf16 %v9312_v55, %v11956_v13  ;;  %9308 = vst [vmem:[%s10210_s18 + $0x1028] sm:$0xff] %v4393_v53 }
 0x145   : > { %v12034_v51 = vld [vmem:[%s10187_s14 + $0x1090] sm:$0xff]  ;;  %v9318_v57 = vld [vmem:[%s10187_s14 + $0x58] sm:$0xff]  ;;  %v4417_v62 = vpack.c.bf16 %v9315_v56, %v11959_v14  ;;  %9311 = vst [vmem:[%s10210_s18 + $0x1c28] sm:$0xff] %v4401_v54 }
 0x146   : > { %v12046_v58 = vld [vmem:[%s10187_s14 + $0x3890] sm:$0xff]  ;;  %v4425_v63 = vpack.c.bf16 %v9318_v57, %v11962_v15  ;;  %v9321_v0 = vld [vmem:[%s10187_s14 + $0x4078] sm:$0xff]  ;;  %9314 = vst [vmem:[%s10210_s18 + $0x828] sm:$0xff] %v4409_v61 }
 0x147   : > { %v12049_v59 = vld [vmem:[%s10187_s14 + $0x2090] sm:$0xff]  ;;  %v9324_v1 = vld [vmem:[%s10187_s14 + $0x2878] sm:$0xff]  ;;  %v4433_v6 = vpack.c.bf16 %v9321_v0, %v11974_v22  ;;  %9317 = vst [vmem:[%s10210_s18 + $0x1428] sm:$0xff] %v4417_v62 }
 0x148   : > { %v12052_v60 = vld [vmem:[%s10187_s14 + $0x890] sm:$0xff]  ;;  %v9327_v2 = vld [vmem:[%s10187_s14 + $0x1078] sm:$0xff]  ;;  %v4441_v7 = vpack.c.bf16 %v9324_v1, %v11977_v23  ;;  %9320 = vst [vmem:[%s10210_s18 + $0x2028] sm:$0xff] %v4425_v63 }
 0x149   : > { %v12064_v3 = vld [vmem:[%s10187_s14 + $0x3090] sm:$0xff]  ;;  %v4449_v8 = vpack.c.bf16 %v9327_v2, %v11980_v24  ;;  %v9330_v9 = vld [vmem:[%s10187_s14 + $0x3878] sm:$0xff]  ;;  %9323 = vst [vmem:[%s10210_s18 + $0x38] sm:$0xff] %v4433_v6 }
 0x14a   : > { %v12067_v4 = vld [vmem:[%s10187_s14 + $0x1890] sm:$0xff]  ;;  %v9333_v10 = vld [vmem:[%s10187_s14 + $0x2078] sm:$0xff]  ;;  %v4457_v15 = vpack.c.bf16 %v9330_v9, %v11992_v31  ;;  %9326 = vst [vmem:[%s10210_s18 + $0xc38] sm:$0xff] %v4441_v7 }
 0x14b   : > { %v12070_v5 = vld [vmem:[%s10187_s14 + $0x90] sm:$0xff]  ;;  %v9336_v11 = vld [vmem:[%s10187_s14 + $0x878] sm:$0xff]  ;;  %v4465_v16 = vpack.c.bf16 %v9333_v10, %v11995_v32  ;;  %9329 = vst [vmem:[%s10210_s18 + $0x1838] sm:$0xff] %v4449_v8 }
 0x14c   : > { %v12082_v12 = vld [vmem:[%s10187_s14 + $0x40b0] sm:$0xff]  ;;  %v4473_v17 = vpack.c.bf16 %v9336_v11, %v11998_v33  ;;  %v9339_v18 = vld [vmem:[%s10187_s14 + $0x3078] sm:$0xff]  ;;  %9332 = vst [vmem:[%s10210_s18 + $0x438] sm:$0xff] %v4457_v15 }
 0x14d   : > { %v12085_v13 = vld [vmem:[%s10187_s14 + $0x28b0] sm:$0xff]  ;;  %v9342_v19 = vld [vmem:[%s10187_s14 + $0x1878] sm:$0xff]  ;;  %v4481_v24 = vpack.c.bf16 %v9339_v18, %v12010_v40  ;;  %9335 = vst [vmem:[%s10210_s18 + $0x1038] sm:$0xff] %v4465_v16 }
 0x14e   : > { %v12088_v14 = vld [vmem:[%s10187_s14 + $0x10b0] sm:$0xff]  ;;  %v9345_v20 = vld [vmem:[%s10187_s14 + $0x78] sm:$0xff]  ;;  %v4489_v25 = vpack.c.bf16 %v9342_v19, %v12013_v41  ;;  %9338 = vst [vmem:[%s10210_s18 + $0x1c38] sm:$0xff] %v4473_v17 }
 0x14f   : > { %v12100_v21 = vld [vmem:[%s10187_s14 + $0x38b0] sm:$0xff]  ;;  %v4497_v26 = vpack.c.bf16 %v9345_v20, %v12016_v42  ;;  %v9348_v27 = vld [vmem:[%s10187_s14 + $0x4098] sm:$0xff]  ;;  %9341 = vst [vmem:[%s10210_s18 + $0x838] sm:$0xff] %v4481_v24 }
 0x150   : > { %v12103_v22 = vld [vmem:[%s10187_s14 + $0x20b0] sm:$0xff]  ;;  %v9351_v28 = vld [vmem:[%s10187_s14 + $0x2898] sm:$0xff]  ;;  %v4505_v33 = vpack.c.bf16 %v9348_v27, %v12028_v49  ;;  %9344 = vst [vmem:[%s10210_s18 + $0x1438] sm:$0xff] %v4489_v25 }
 0x151   : > { %v12106_v23 = vld [vmem:[%s10187_s14 + $0x8b0] sm:$0xff]  ;;  %v9354_v29 = vld [vmem:[%s10187_s14 + $0x1098] sm:$0xff]  ;;  %v4513_v34 = vpack.c.bf16 %v9351_v28, %v12031_v50  ;;  %9347 = vst [vmem:[%s10210_s18 + $0x2038] sm:$0xff] %v4497_v26 }
 0x152   : > { %v12118_v30 = vld [vmem:[%s10187_s14 + $0x30b0] sm:$0xff]  ;;  %v4521_v35 = vpack.c.bf16 %v9354_v29, %v12034_v51  ;;  %v9357_v36 = vld [vmem:[%s10187_s14 + $0x3898] sm:$0xff]  ;;  %9350 = vst [vmem:[%s10210_s18 + $0x48] sm:$0xff] %v4505_v33 }
 0x153   : > { %v12121_v31 = vld [vmem:[%s10187_s14 + $0x18b0] sm:$0xff]  ;;  %v9360_v37 = vld [vmem:[%s10187_s14 + $0x2098] sm:$0xff]  ;;  %v4529_v42 = vpack.c.bf16 %v9357_v36, %v12046_v58  ;;  %9353 = vst [vmem:[%s10210_s18 + $0xc48] sm:$0xff] %v4513_v34 }
 0x154   : > { %v12124_v32 = vld [vmem:[%s10187_s14 + $0xb0] sm:$0xff]  ;;  %v9363_v38 = vld [vmem:[%s10187_s14 + $0x898] sm:$0xff]  ;;  %v4537_v43 = vpack.c.bf16 %v9360_v37, %v12049_v59  ;;  %9356 = vst [vmem:[%s10210_s18 + $0x1848] sm:$0xff] %v4521_v35 }
 0x155   : > { %v12136_v39 = vld [vmem:[%s10187_s14 + $0x40d0] sm:$0xff]  ;;  %v4545_v44 = vpack.c.bf16 %v9363_v38, %v12052_v60  ;;  %v9366_v45 = vld [vmem:[%s10187_s14 + $0x3098] sm:$0xff]  ;;  %9359 = vst [vmem:[%s10210_s18 + $0x448] sm:$0xff] %v4529_v42 }
 0x156   : > { %v12139_v40 = vld [vmem:[%s10187_s14 + $0x28d0] sm:$0xff]  ;;  %v9369_v46 = vld [vmem:[%s10187_s14 + $0x1898] sm:$0xff]  ;;  %v4553_v51 = vpack.c.bf16 %v9366_v45, %v12064_v3  ;;  %9362 = vst [vmem:[%s10210_s18 + $0x1048] sm:$0xff] %v4537_v43 }
 0x157   : > { %v12142_v41 = vld [vmem:[%s10187_s14 + $0x10d0] sm:$0xff]  ;;  %v9372_v47 = vld [vmem:[%s10187_s14 + $0x98] sm:$0xff]  ;;  %v4561_v52 = vpack.c.bf16 %v9369_v46, %v12067_v4  ;;  %9365 = vst [vmem:[%s10210_s18 + $0x1c48] sm:$0xff] %v4545_v44 }
 0x158   : > { %v12154_v48 = vld [vmem:[%s10187_s14 + $0x38d0] sm:$0xff]  ;;  %v4569_v53 = vpack.c.bf16 %v9372_v47, %v12070_v5  ;;  %v9375_v54 = vld [vmem:[%s10187_s14 + $0x40b8] sm:$0xff]  ;;  %9368 = vst [vmem:[%s10210_s18 + $0x848] sm:$0xff] %v4553_v51 }
 0x159   : > { %v12157_v49 = vld [vmem:[%s10187_s14 + $0x20d0] sm:$0xff]  ;;  %v9378_v55 = vld [vmem:[%s10187_s14 + $0x28b8] sm:$0xff]  ;;  %v4577_v60 = vpack.c.bf16 %v9375_v54, %v12082_v12  ;;  %9371 = vst [vmem:[%s10210_s18 + $0x1448] sm:$0xff] %v4561_v52 }
 0x15a   : > { %v12160_v50 = vld [vmem:[%s10187_s14 + $0x8d0] sm:$0xff]  ;;  %v9381_v56 = vld [vmem:[%s10187_s14 + $0x10b8] sm:$0xff]  ;;  %v4585_v61 = vpack.c.bf16 %v9378_v55, %v12085_v13  ;;  %9374 = vst [vmem:[%s10210_s18 + $0x2048] sm:$0xff] %v4569_v53 }
 0x15b   : > { %v12172_v57 = vld [vmem:[%s10187_s14 + $0x30d0] sm:$0xff]  ;;  %v4593_v62 = vpack.c.bf16 %v9381_v56, %v12088_v14  ;;  %v9384_v63 = vld [vmem:[%s10187_s14 + $0x38b8] sm:$0xff]  ;;  %9377 = vst [vmem:[%s10210_s18 + $0x58] sm:$0xff] %v4577_v60 }
 0x15c   : > { %v12175_v58 = vld [vmem:[%s10187_s14 + $0x18d0] sm:$0xff]  ;;  %v9387_v0 = vld [vmem:[%s10187_s14 + $0x20b8] sm:$0xff]  ;;  %v4601_v5 = vpack.c.bf16 %v9384_v63, %v12100_v21  ;;  %9380 = vst [vmem:[%s10210_s18 + $0xc58] sm:$0xff] %v4585_v61 }
 0x15d   : > { %v12178_v59 = vld [vmem:[%s10187_s14 + $0xd0] sm:$0xff]  ;;  %v9390_v1 = vld [vmem:[%s10187_s14 + $0x8b8] sm:$0xff]  ;;  %v4609_v6 = vpack.c.bf16 %v9387_v0, %v12103_v22  ;;  %9383 = vst [vmem:[%s10210_s18 + $0x1858] sm:$0xff] %v4593_v62 }
 0x15e   : > { %v12190_v2 = vld [vmem:[%s10187_s14 + $0x40f0] sm:$0xff]  ;;  %v4617_v7 = vpack.c.bf16 %v9390_v1, %v12106_v23  ;;  %v9393_v8 = vld [vmem:[%s10187_s14 + $0x30b8] sm:$0xff]  ;;  %9386 = vst [vmem:[%s10210_s18 + $0x458] sm:$0xff] %v4601_v5 }
 0x15f   : > { %v12193_v3 = vld [vmem:[%s10187_s14 + $0x28f0] sm:$0xff]  ;;  %v9396_v9 = vld [vmem:[%s10187_s14 + $0x18b8] sm:$0xff]  ;;  %v4625_v14 = vpack.c.bf16 %v9393_v8, %v12118_v30  ;;  %9389 = vst [vmem:[%s10210_s18 + $0x1058] sm:$0xff] %v4609_v6 }
 0x160   : > { %v12196_v4 = vld [vmem:[%s10187_s14 + $0x10f0] sm:$0xff]  ;;  %v9399_v10 = vld [vmem:[%s10187_s14 + $0xb8] sm:$0xff]  ;;  %v4633_v15 = vpack.c.bf16 %v9396_v9, %v12121_v31  ;;  %9392 = vst [vmem:[%s10210_s18 + $0x1c58] sm:$0xff] %v4617_v7 }
 0x161   : > { %v12208_v11 = vld [vmem:[%s10187_s14 + $0x38f0] sm:$0xff]  ;;  %v4641_v16 = vpack.c.bf16 %v9399_v10, %v12124_v32  ;;  %v9402_v17 = vld [vmem:[%s10187_s14 + $0x40d8] sm:$0xff]  ;;  %9395 = vst [vmem:[%s10210_s18 + $0x858] sm:$0xff] %v4625_v14 }
 0x162   : > { %v12211_v12 = vld [vmem:[%s10187_s14 + $0x20f0] sm:$0xff]  ;;  %v9405_v18 = vld [vmem:[%s10187_s14 + $0x28d8] sm:$0xff]  ;;  %v4649_v23 = vpack.c.bf16 %v9402_v17, %v12136_v39  ;;  %9398 = vst [vmem:[%s10210_s18 + $0x1458] sm:$0xff] %v4633_v15 }
 0x163   : > { %v12214_v13 = vld [vmem:[%s10187_s14 + $0x8f0] sm:$0xff]  ;;  %v9408_v19 = vld [vmem:[%s10187_s14 + $0x10d8] sm:$0xff]  ;;  %v4657_v24 = vpack.c.bf16 %v9405_v18, %v12139_v40  ;;  %9401 = vst [vmem:[%s10210_s18 + $0x2058] sm:$0xff] %v4641_v16 }
 0x164   : > { %v12226_v20 = vld [vmem:[%s10187_s14 + $0x30f0] sm:$0xff]  ;;  %v4665_v25 = vpack.c.bf16 %v9408_v19, %v12142_v41  ;;  %v9411_v26 = vld [vmem:[%s10187_s14 + $0x38d8] sm:$0xff]  ;;  %9404 = vst [vmem:[%s10210_s18 + $0x68] sm:$0xff] %v4649_v23 }
 0x165   : > { %v12229_v21 = vld [vmem:[%s10187_s14 + $0x18f0] sm:$0xff]  ;;  %v9414_v27 = vld [vmem:[%s10187_s14 + $0x20d8] sm:$0xff]  ;;  %v4673_v32 = vpack.c.bf16 %v9411_v26, %v12154_v48  ;;  %9407 = vst [vmem:[%s10210_s18 + $0xc68] sm:$0xff] %v4657_v24 }
 0x166   : > { %v12232_v22 = vld [vmem:[%s10187_s14 + $0xf0] sm:$0xff]  ;;  %v9417_v28 = vld [vmem:[%s10187_s14 + $0x8d8] sm:$0xff]  ;;  %v4681_v33 = vpack.c.bf16 %v9414_v27, %v12157_v49  ;;  %9410 = vst [vmem:[%s10210_s18 + $0x1868] sm:$0xff] %v4665_v25 }
 0x167   : > { %v12244_v29 = vld [vmem:[%s10187_s14 + $0x4110] sm:$0xff]  ;;  %v4689_v34 = vpack.c.bf16 %v9417_v28, %v12160_v50  ;;  %v9420_v35 = vld [vmem:[%s10187_s14 + $0x30d8] sm:$0xff]  ;;  %9413 = vst [vmem:[%s10210_s18 + $0x468] sm:$0xff] %v4673_v32 }
 0x168   : > { %v12247_v30 = vld [vmem:[%s10187_s14 + $0x2910] sm:$0xff]  ;;  %v9423_v36 = vld [vmem:[%s10187_s14 + $0x18d8] sm:$0xff]  ;;  %v4697_v41 = vpack.c.bf16 %v9420_v35, %v12172_v57  ;;  %9416 = vst [vmem:[%s10210_s18 + $0x1068] sm:$0xff] %v4681_v33 }
 0x169   : > { %v12250_v31 = vld [vmem:[%s10187_s14 + $0x1110] sm:$0xff]  ;;  %v9426_v37 = vld [vmem:[%s10187_s14 + $0xd8] sm:$0xff]  ;;  %v4705_v42 = vpack.c.bf16 %v9423_v36, %v12175_v58  ;;  %9419 = vst [vmem:[%s10210_s18 + $0x1c68] sm:$0xff] %v4689_v34 }
 0x16a   : > { %v12262_v38 = vld [vmem:[%s10187_s14 + $0x3910] sm:$0xff]  ;;  %v4713_v43 = vpack.c.bf16 %v9426_v37, %v12178_v59  ;;  %v9429_v44 = vld [vmem:[%s10187_s14 + $0x40f8] sm:$0xff]  ;;  %9422 = vst [vmem:[%s10210_s18 + $0x868] sm:$0xff] %v4697_v41 }
 0x16b   : > { %v12265_v39 = vld [vmem:[%s10187_s14 + $0x2110] sm:$0xff]  ;;  %v9432_v45 = vld [vmem:[%s10187_s14 + $0x28f8] sm:$0xff]  ;;  %v4721_v50 = vpack.c.bf16 %v9429_v44, %v12190_v2  ;;  %9425 = vst [vmem:[%s10210_s18 + $0x1468] sm:$0xff] %v4705_v42 }
 0x16c   : > { %v12268_v40 = vld [vmem:[%s10187_s14 + $0x910] sm:$0xff]  ;;  %v9435_v46 = vld [vmem:[%s10187_s14 + $0x10f8] sm:$0xff]  ;;  %v4729_v51 = vpack.c.bf16 %v9432_v45, %v12193_v3  ;;  %9428 = vst [vmem:[%s10210_s18 + $0x2068] sm:$0xff] %v4713_v43 }
 0x16d   : > { %v12280_v47 = vld [vmem:[%s10187_s14 + $0x3110] sm:$0xff]  ;;  %v4737_v52 = vpack.c.bf16 %v9435_v46, %v12196_v4  ;;  %v9438_v53 = vld [vmem:[%s10187_s14 + $0x38f8] sm:$0xff]  ;;  %9431 = vst [vmem:[%s10210_s18 + $0x78] sm:$0xff] %v4721_v50 }
 0x16e   : > { %v12283_v48 = vld [vmem:[%s10187_s14 + $0x1910] sm:$0xff]  ;;  %v9441_v54 = vld [vmem:[%s10187_s14 + $0x20f8] sm:$0xff]  ;;  %v4745_v59 = vpack.c.bf16 %v9438_v53, %v12208_v11  ;;  %9434 = vst [vmem:[%s10210_s18 + $0xc78] sm:$0xff] %v4729_v51 }
 0x16f   : > { %v12286_v49 = vld [vmem:[%s10187_s14 + $0x110] sm:$0xff]  ;;  %v9444_v55 = vld [vmem:[%s10187_s14 + $0x8f8] sm:$0xff]  ;;  %v4753_v60 = vpack.c.bf16 %v9441_v54, %v12211_v12  ;;  %9437 = vst [vmem:[%s10210_s18 + $0x1878] sm:$0xff] %v4737_v52 }
 0x170   : > { %v12298_v56 = vld [vmem:[%s10187_s14 + $0x4130] sm:$0xff]  ;;  %v4761_v61 = vpack.c.bf16 %v9444_v55, %v12214_v13  ;;  %v9447_v62 = vld [vmem:[%s10187_s14 + $0x30f8] sm:$0xff]  ;;  %9440 = vst [vmem:[%s10210_s18 + $0x478] sm:$0xff] %v4745_v59 }
 0x171   : > { %v12301_v57 = vld [vmem:[%s10187_s14 + $0x2930] sm:$0xff]  ;;  %v9450_v63 = vld [vmem:[%s10187_s14 + $0x18f8] sm:$0xff]  ;;  %v4769_v4 = vpack.c.bf16 %v9447_v62, %v12226_v20  ;;  %9443 = vst [vmem:[%s10210_s18 + $0x1078] sm:$0xff] %v4753_v60 }
 0x172   : > { %v12304_v58 = vld [vmem:[%s10187_s14 + $0x1130] sm:$0xff]  ;;  %v9453_v0 = vld [vmem:[%s10187_s14 + $0xf8] sm:$0xff]  ;;  %v4777_v5 = vpack.c.bf16 %v9450_v63, %v12229_v21  ;;  %9446 = vst [vmem:[%s10210_s18 + $0x1c78] sm:$0xff] %v4761_v61 }
 0x173   : > { %v12316_v1 = vld [vmem:[%s10187_s14 + $0x3930] sm:$0xff]  ;;  %v4785_v6 = vpack.c.bf16 %v9453_v0, %v12232_v22  ;;  %v9456_v7 = vld [vmem:[%s10187_s14 + $0x4118] sm:$0xff]  ;;  %9449 = vst [vmem:[%s10210_s18 + $0x878] sm:$0xff] %v4769_v4 }
 0x174   : > { %v12319_v2 = vld [vmem:[%s10187_s14 + $0x2130] sm:$0xff]  ;;  %v9459_v8 = vld [vmem:[%s10187_s14 + $0x2918] sm:$0xff]  ;;  %v4793_v13 = vpack.c.bf16 %v9456_v7, %v12244_v29  ;;  %9452 = vst [vmem:[%s10210_s18 + $0x1478] sm:$0xff] %v4777_v5 }
 0x175   : > { %v12322_v3 = vld [vmem:[%s10187_s14 + $0x930] sm:$0xff]  ;;  %v9462_v9 = vld [vmem:[%s10187_s14 + $0x1118] sm:$0xff]  ;;  %v4801_v14 = vpack.c.bf16 %v9459_v8, %v12247_v30  ;;  %9455 = vst [vmem:[%s10210_s18 + $0x2078] sm:$0xff] %v4785_v6 }
 0x176   : > { %v12334_v10 = vld [vmem:[%s10187_s14 + $0x3130] sm:$0xff]  ;;  %v4809_v15 = vpack.c.bf16 %v9462_v9, %v12250_v31  ;;  %v9465_v16 = vld [vmem:[%s10187_s14 + $0x3918] sm:$0xff]  ;;  %9458 = vst [vmem:[%s10210_s18 + $0x88] sm:$0xff] %v4793_v13 }
 0x177   : > { %v12337_v11 = vld [vmem:[%s10187_s14 + $0x1930] sm:$0xff]  ;;  %v9468_v17 = vld [vmem:[%s10187_s14 + $0x2118] sm:$0xff]  ;;  %v4817_v22 = vpack.c.bf16 %v9465_v16, %v12262_v38  ;;  %9461 = vst [vmem:[%s10210_s18 + $0xc88] sm:$0xff] %v4801_v14 }
 0x178   : > { %v12340_v12 = vld [vmem:[%s10187_s14 + $0x130] sm:$0xff]  ;;  %v9471_v18 = vld [vmem:[%s10187_s14 + $0x918] sm:$0xff]  ;;  %v4825_v23 = vpack.c.bf16 %v9468_v17, %v12265_v39  ;;  %9464 = vst [vmem:[%s10210_s18 + $0x1888] sm:$0xff] %v4809_v15 }
 0x179   : > { %v12352_v19 = vld [vmem:[%s10187_s14 + $0x4150] sm:$0xff]  ;;  %v4833_v24 = vpack.c.bf16 %v9471_v18, %v12268_v40  ;;  %v9474_v25 = vld [vmem:[%s10187_s14 + $0x3118] sm:$0xff]  ;;  %9467 = vst [vmem:[%s10210_s18 + $0x488] sm:$0xff] %v4817_v22 }
 0x17a   : > { %v12355_v20 = vld [vmem:[%s10187_s14 + $0x2950] sm:$0xff]  ;;  %v9477_v26 = vld [vmem:[%s10187_s14 + $0x1918] sm:$0xff]  ;;  %v4841_v31 = vpack.c.bf16 %v9474_v25, %v12280_v47  ;;  %9470 = vst [vmem:[%s10210_s18 + $0x1088] sm:$0xff] %v4825_v23 }
 0x17b   : > { %v12358_v21 = vld [vmem:[%s10187_s14 + $0x1150] sm:$0xff]  ;;  %v9480_v27 = vld [vmem:[%s10187_s14 + $0x118] sm:$0xff]  ;;  %v4849_v32 = vpack.c.bf16 %v9477_v26, %v12283_v48  ;;  %9473 = vst [vmem:[%s10210_s18 + $0x1c88] sm:$0xff] %v4833_v24 }
 0x17c   : > { %v12370_v28 = vld [vmem:[%s10187_s14 + $0x3950] sm:$0xff]  ;;  %v4857_v33 = vpack.c.bf16 %v9480_v27, %v12286_v49  ;;  %v9483_v34 = vld [vmem:[%s10187_s14 + $0x4138] sm:$0xff]  ;;  %9476 = vst [vmem:[%s10210_s18 + $0x888] sm:$0xff] %v4841_v31 }
 0x17d   : > { %v12373_v29 = vld [vmem:[%s10187_s14 + $0x2150] sm:$0xff]  ;;  %v9486_v35 = vld [vmem:[%s10187_s14 + $0x2938] sm:$0xff]  ;;  %v4865_v40 = vpack.c.bf16 %v9483_v34, %v12298_v56  ;;  %9479 = vst [vmem:[%s10210_s18 + $0x1488] sm:$0xff] %v4849_v32 }
 0x17e   : > { %v12376_v30 = vld [vmem:[%s10187_s14 + $0x950] sm:$0xff]  ;;  %v9489_v36 = vld [vmem:[%s10187_s14 + $0x1138] sm:$0xff]  ;;  %v4873_v41 = vpack.c.bf16 %v9486_v35, %v12301_v57  ;;  %9482 = vst [vmem:[%s10210_s18 + $0x2088] sm:$0xff] %v4857_v33 }
 0x17f   : > { %v12388_v37 = vld [vmem:[%s10187_s14 + $0x3150] sm:$0xff]  ;;  %v4881_v42 = vpack.c.bf16 %v9489_v36, %v12304_v58  ;;  %v9492_v43 = vld [vmem:[%s10187_s14 + $0x3938] sm:$0xff]  ;;  %9485 = vst [vmem:[%s10210_s18 + $0x98] sm:$0xff] %v4865_v40 }
 0x180   : > { %v12391_v38 = vld [vmem:[%s10187_s14 + $0x1950] sm:$0xff]  ;;  %v9495_v44 = vld [vmem:[%s10187_s14 + $0x2138] sm:$0xff]  ;;  %v4889_v49 = vpack.c.bf16 %v9492_v43, %v12316_v1  ;;  %9488 = vst [vmem:[%s10210_s18 + $0xc98] sm:$0xff] %v4873_v41 }
 0x181   : > { %v12394_v39 = vld [vmem:[%s10187_s14 + $0x150] sm:$0xff]  ;;  %v9498_v45 = vld [vmem:[%s10187_s14 + $0x938] sm:$0xff]  ;;  %v4897_v50 = vpack.c.bf16 %v9495_v44, %v12319_v2  ;;  %9491 = vst [vmem:[%s10210_s18 + $0x1898] sm:$0xff] %v4881_v42 }
 0x182   : > { %v12406_v46 = vld [vmem:[%s10187_s14 + $0x4170] sm:$0xff]  ;;  %v4905_v51 = vpack.c.bf16 %v9498_v45, %v12322_v3  ;;  %v9501_v52 = vld [vmem:[%s10187_s14 + $0x3138] sm:$0xff]  ;;  %9494 = vst [vmem:[%s10210_s18 + $0x498] sm:$0xff] %v4889_v49 }
 0x183   : > { %v12409_v47 = vld [vmem:[%s10187_s14 + $0x2970] sm:$0xff]  ;;  %v9504_v53 = vld [vmem:[%s10187_s14 + $0x1938] sm:$0xff]  ;;  %v4913_v58 = vpack.c.bf16 %v9501_v52, %v12334_v10  ;;  %9497 = vst [vmem:[%s10210_s18 + $0x1098] sm:$0xff] %v4897_v50 }
 0x184   : > { %v12412_v48 = vld [vmem:[%s10187_s14 + $0x1170] sm:$0xff]  ;;  %v9507_v54 = vld [vmem:[%s10187_s14 + $0x138] sm:$0xff]  ;;  %v4921_v59 = vpack.c.bf16 %v9504_v53, %v12337_v11  ;;  %9500 = vst [vmem:[%s10210_s18 + $0x1c98] sm:$0xff] %v4905_v51 }
 0x185   : > { %v12424_v55 = vld [vmem:[%s10187_s14 + $0x3970] sm:$0xff]  ;;  %v4929_v60 = vpack.c.bf16 %v9507_v54, %v12340_v12  ;;  %v9510_v61 = vld [vmem:[%s10187_s14 + $0x4158] sm:$0xff]  ;;  %9503 = vst [vmem:[%s10210_s18 + $0x898] sm:$0xff] %v4913_v58 }
 0x186   : > { %v12427_v56 = vld [vmem:[%s10187_s14 + $0x2170] sm:$0xff]  ;;  %v9513_v62 = vld [vmem:[%s10187_s14 + $0x2958] sm:$0xff]  ;;  %v4937_v3 = vpack.c.bf16 %v9510_v61, %v12352_v19  ;;  %9506 = vst [vmem:[%s10210_s18 + $0x1498] sm:$0xff] %v4921_v59 }
 0x187   : > { %v12430_v57 = vld [vmem:[%s10187_s14 + $0x970] sm:$0xff]  ;;  %v9516_v63 = vld [vmem:[%s10187_s14 + $0x1158] sm:$0xff]  ;;  %v4945_v4 = vpack.c.bf16 %v9513_v62, %v12355_v20  ;;  %9509 = vst [vmem:[%s10210_s18 + $0x2098] sm:$0xff] %v4929_v60 }
 0x188   : > { %v12442_v0 = vld [vmem:[%s10187_s14 + $0x3170] sm:$0xff]  ;;  %v4953_v5 = vpack.c.bf16 %v9516_v63, %v12358_v21  ;;  %v9519_v6 = vld [vmem:[%s10187_s14 + $0x3958] sm:$0xff]  ;;  %9512 = vst [vmem:[%s10210_s18 + $0xa8] sm:$0xff] %v4937_v3 }
 0x189   : > { %v12445_v1 = vld [vmem:[%s10187_s14 + $0x1970] sm:$0xff]  ;;  %v9522_v7 = vld [vmem:[%s10187_s14 + $0x2158] sm:$0xff]  ;;  %v4961_v12 = vpack.c.bf16 %v9519_v6, %v12370_v28  ;;  %9515 = vst [vmem:[%s10210_s18 + $0xca8] sm:$0xff] %v4945_v4 }
 0x18a   : > { %v12448_v2 = vld [vmem:[%s10187_s14 + $0x170] sm:$0xff]  ;;  %v9525_v8 = vld [vmem:[%s10187_s14 + $0x958] sm:$0xff]  ;;  %v4969_v13 = vpack.c.bf16 %v9522_v7, %v12373_v29  ;;  %9518 = vst [vmem:[%s10210_s18 + $0x18a8] sm:$0xff] %v4953_v5 }
 0x18b   : > { %v12460_v9 = vld [vmem:[%s10187_s14 + $0x4190] sm:$0xff]  ;;  %v4977_v14 = vpack.c.bf16 %v9525_v8, %v12376_v30  ;;  %v9528_v15 = vld [vmem:[%s10187_s14 + $0x3158] sm:$0xff]  ;;  %9521 = vst [vmem:[%s10210_s18 + $0x4a8] sm:$0xff] %v4961_v12 }
 0x18c   : > { %v12463_v10 = vld [vmem:[%s10187_s14 + $0x2990] sm:$0xff]  ;;  %v9531_v16 = vld [vmem:[%s10187_s14 + $0x1958] sm:$0xff]  ;;  %v4985_v21 = vpack.c.bf16 %v9528_v15, %v12388_v37  ;;  %9524 = vst [vmem:[%s10210_s18 + $0x10a8] sm:$0xff] %v4969_v13 }
 0x18d   : > { %v12466_v11 = vld [vmem:[%s10187_s14 + $0x1190] sm:$0xff]  ;;  %v9534_v17 = vld [vmem:[%s10187_s14 + $0x158] sm:$0xff]  ;;  %v4993_v22 = vpack.c.bf16 %v9531_v16, %v12391_v38  ;;  %9527 = vst [vmem:[%s10210_s18 + $0x1ca8] sm:$0xff] %v4977_v14 }
 0x18e   : > { %v12478_v18 = vld [vmem:[%s10187_s14 + $0x3990] sm:$0xff]  ;;  %v5001_v23 = vpack.c.bf16 %v9534_v17, %v12394_v39  ;;  %v9537_v24 = vld [vmem:[%s10187_s14 + $0x4178] sm:$0xff]  ;;  %9530 = vst [vmem:[%s10210_s18 + $0x8a8] sm:$0xff] %v4985_v21 }
 0x18f   : > { %v12481_v19 = vld [vmem:[%s10187_s14 + $0x2190] sm:$0xff]  ;;  %v9540_v25 = vld [vmem:[%s10187_s14 + $0x2978] sm:$0xff]  ;;  %v5009_v30 = vpack.c.bf16 %v9537_v24, %v12406_v46  ;;  %9533 = vst [vmem:[%s10210_s18 + $0x14a8] sm:$0xff] %v4993_v22 }
 0x190   : > { %v12484_v20 = vld [vmem:[%s10187_s14 + $0x990] sm:$0xff]  ;;  %v9543_v26 = vld [vmem:[%s10187_s14 + $0x1178] sm:$0xff]  ;;  %v5017_v31 = vpack.c.bf16 %v9540_v25, %v12409_v47  ;;  %9536 = vst [vmem:[%s10210_s18 + $0x20a8] sm:$0xff] %v5001_v23 }
 0x191   : > { %v12496_v27 = vld [vmem:[%s10187_s14 + $0x3190] sm:$0xff]  ;;  %v5025_v32 = vpack.c.bf16 %v9543_v26, %v12412_v48  ;;  %v9546_v33 = vld [vmem:[%s10187_s14 + $0x3978] sm:$0xff]  ;;  %9539 = vst [vmem:[%s10210_s18 + $0xb8] sm:$0xff] %v5009_v30 }
 0x192   : > { %v12499_v28 = vld [vmem:[%s10187_s14 + $0x1990] sm:$0xff]  ;;  %v9549_v34 = vld [vmem:[%s10187_s14 + $0x2178] sm:$0xff]  ;;  %v5033_v39 = vpack.c.bf16 %v9546_v33, %v12424_v55  ;;  %9542 = vst [vmem:[%s10210_s18 + $0xcb8] sm:$0xff] %v5017_v31 }
 0x193   : > { %v12502_v29 = vld [vmem:[%s10187_s14 + $0x190] sm:$0xff]  ;;  %v9552_v35 = vld [vmem:[%s10187_s14 + $0x978] sm:$0xff]  ;;  %v5041_v40 = vpack.c.bf16 %v9549_v34, %v12427_v56  ;;  %9545 = vst [vmem:[%s10210_s18 + $0x18b8] sm:$0xff] %v5025_v32 }
 0x194   : > { %v12514_v36 = vld [vmem:[%s10187_s14 + $0x41b0] sm:$0xff]  ;;  %v5049_v41 = vpack.c.bf16 %v9552_v35, %v12430_v57  ;;  %v9555_v42 = vld [vmem:[%s10187_s14 + $0x3178] sm:$0xff]  ;;  %9548 = vst [vmem:[%s10210_s18 + $0x4b8] sm:$0xff] %v5033_v39 }
 0x195   : > { %v12517_v37 = vld [vmem:[%s10187_s14 + $0x29b0] sm:$0xff]  ;;  %v9558_v43 = vld [vmem:[%s10187_s14 + $0x1978] sm:$0xff]  ;;  %v5057_v48 = vpack.c.bf16 %v9555_v42, %v12442_v0  ;;  %9551 = vst [vmem:[%s10210_s18 + $0x10b8] sm:$0xff] %v5041_v40 }
 0x196   : > { %v12520_v38 = vld [vmem:[%s10187_s14 + $0x11b0] sm:$0xff]  ;;  %v9561_v44 = vld [vmem:[%s10187_s14 + $0x178] sm:$0xff]  ;;  %v5065_v49 = vpack.c.bf16 %v9558_v43, %v12445_v1  ;;  %9554 = vst [vmem:[%s10210_s18 + $0x1cb8] sm:$0xff] %v5049_v41 }
 0x197   : > { %v12532_v45 = vld [vmem:[%s10187_s14 + $0x39b0] sm:$0xff]  ;;  %v5073_v50 = vpack.c.bf16 %v9561_v44, %v12448_v2  ;;  %v9564_v51 = vld [vmem:[%s10187_s14 + $0x4198] sm:$0xff]  ;;  %9557 = vst [vmem:[%s10210_s18 + $0x8b8] sm:$0xff] %v5057_v48 }
 0x198   : > { %v12535_v46 = vld [vmem:[%s10187_s14 + $0x21b0] sm:$0xff]  ;;  %v9567_v52 = vld [vmem:[%s10187_s14 + $0x2998] sm:$0xff]  ;;  %v5081_v57 = vpack.c.bf16 %v9564_v51, %v12460_v9  ;;  %9560 = vst [vmem:[%s10210_s18 + $0x14b8] sm:$0xff] %v5065_v49 }
 0x199   : > { %v12538_v47 = vld [vmem:[%s10187_s14 + $0x9b0] sm:$0xff]  ;;  %v9570_v53 = vld [vmem:[%s10187_s14 + $0x1198] sm:$0xff]  ;;  %v5089_v58 = vpack.c.bf16 %v9567_v52, %v12463_v10  ;;  %9563 = vst [vmem:[%s10210_s18 + $0x20b8] sm:$0xff] %v5073_v50 }
 0x19a   : > { %v12550_v54 = vld [vmem:[%s10187_s14 + $0x31b0] sm:$0xff]  ;;  %v5097_v59 = vpack.c.bf16 %v9570_v53, %v12466_v11  ;;  %v9573_v60 = vld [vmem:[%s10187_s14 + $0x3998] sm:$0xff]  ;;  %9566 = vst [vmem:[%s10210_s18 + $0xc8] sm:$0xff] %v5081_v57 }
 0x19b   : > { %v12553_v55 = vld [vmem:[%s10187_s14 + $0x19b0] sm:$0xff]  ;;  %v9576_v61 = vld [vmem:[%s10187_s14 + $0x2198] sm:$0xff]  ;;  %v5105_v2 = vpack.c.bf16 %v9573_v60, %v12478_v18  ;;  %9569 = vst [vmem:[%s10210_s18 + $0xcc8] sm:$0xff] %v5089_v58 }
 0x19c   : > { %v12556_v56 = vld [vmem:[%s10187_s14 + $0x1b0] sm:$0xff]  ;;  %v9579_v62 = vld [vmem:[%s10187_s14 + $0x998] sm:$0xff]  ;;  %v5113_v3 = vpack.c.bf16 %v9576_v61, %v12481_v19  ;;  %9572 = vst [vmem:[%s10210_s18 + $0x18c8] sm:$0xff] %v5097_v59 }
 0x19d   : > { %v12568_v63 = vld [vmem:[%s10187_s14 + $0x41d0] sm:$0xff]  ;;  %v5121_v4 = vpack.c.bf16 %v9579_v62, %v12484_v20  ;;  %v9582_v5 = vld [vmem:[%s10187_s14 + $0x3198] sm:$0xff]  ;;  %9575 = vst [vmem:[%s10210_s18 + $0x4c8] sm:$0xff] %v5105_v2 }
 0x19e   : > { %v12571_v0 = vld [vmem:[%s10187_s14 + $0x29d0] sm:$0xff]  ;;  %v9585_v6 = vld [vmem:[%s10187_s14 + $0x1998] sm:$0xff]  ;;  %v5129_v11 = vpack.c.bf16 %v9582_v5, %v12496_v27  ;;  %9578 = vst [vmem:[%s10210_s18 + $0x10c8] sm:$0xff] %v5113_v3 }
 0x19f   : > { %v12574_v1 = vld [vmem:[%s10187_s14 + $0x11d0] sm:$0xff]  ;;  %v9588_v7 = vld [vmem:[%s10187_s14 + $0x198] sm:$0xff]  ;;  %v5137_v12 = vpack.c.bf16 %v9585_v6, %v12499_v28  ;;  %9581 = vst [vmem:[%s10210_s18 + $0x1cc8] sm:$0xff] %v5121_v4 }
 0x1a0   : > { %v12586_v8 = vld [vmem:[%s10187_s14 + $0x39d0] sm:$0xff]  ;;  %v5145_v13 = vpack.c.bf16 %v9588_v7, %v12502_v29  ;;  %v9591_v14 = vld [vmem:[%s10187_s14 + $0x41b8] sm:$0xff]  ;;  %9584 = vst [vmem:[%s10210_s18 + $0x8c8] sm:$0xff] %v5129_v11 }
 0x1a1   : > { %v12589_v9 = vld [vmem:[%s10187_s14 + $0x21d0] sm:$0xff]  ;;  %v9594_v15 = vld [vmem:[%s10187_s14 + $0x29b8] sm:$0xff]  ;;  %v5153_v20 = vpack.c.bf16 %v9591_v14, %v12514_v36  ;;  %9587 = vst [vmem:[%s10210_s18 + $0x14c8] sm:$0xff] %v5137_v12 }
 0x1a2   : > { %v12592_v10 = vld [vmem:[%s10187_s14 + $0x9d0] sm:$0xff]  ;;  %v9597_v16 = vld [vmem:[%s10187_s14 + $0x11b8] sm:$0xff]  ;;  %v5161_v21 = vpack.c.bf16 %v9594_v15, %v12517_v37  ;;  %9590 = vst [vmem:[%s10210_s18 + $0x20c8] sm:$0xff] %v5145_v13 }
 0x1a3   : > { %v12604_v17 = vld [vmem:[%s10187_s14 + $0x31d0] sm:$0xff]  ;;  %v5169_v22 = vpack.c.bf16 %v9597_v16, %v12520_v38  ;;  %v9600_v23 = vld [vmem:[%s10187_s14 + $0x39b8] sm:$0xff]  ;;  %9593 = vst [vmem:[%s10210_s18 + $0xd8] sm:$0xff] %v5153_v20 }
 0x1a4   : > { %v12607_v18 = vld [vmem:[%s10187_s14 + $0x19d0] sm:$0xff]  ;;  %v9603_v24 = vld [vmem:[%s10187_s14 + $0x21b8] sm:$0xff]  ;;  %v5177_v29 = vpack.c.bf16 %v9600_v23, %v12532_v45  ;;  %9596 = vst [vmem:[%s10210_s18 + $0xcd8] sm:$0xff] %v5161_v21 }
 0x1a5   : > { %v12610_v19 = vld [vmem:[%s10187_s14 + $0x1d0] sm:$0xff]  ;;  %v9606_v25 = vld [vmem:[%s10187_s14 + $0x9b8] sm:$0xff]  ;;  %v5185_v30 = vpack.c.bf16 %v9603_v24, %v12535_v46  ;;  %9599 = vst [vmem:[%s10210_s18 + $0x18d8] sm:$0xff] %v5169_v22 }
 0x1a6   : > { %v12622_v26 = vld [vmem:[%s10187_s14 + $0x41f0] sm:$0xff]  ;;  %v5193_v31 = vpack.c.bf16 %v9606_v25, %v12538_v47  ;;  %v9609_v32 = vld [vmem:[%s10187_s14 + $0x31b8] sm:$0xff]  ;;  %9602 = vst [vmem:[%s10210_s18 + $0x4d8] sm:$0xff] %v5177_v29 }
 0x1a7   : > { %v12625_v27 = vld [vmem:[%s10187_s14 + $0x29f0] sm:$0xff]  ;;  %v9612_v33 = vld [vmem:[%s10187_s14 + $0x19b8] sm:$0xff]  ;;  %v5201_v38 = vpack.c.bf16 %v9609_v32, %v12550_v54  ;;  %9605 = vst [vmem:[%s10210_s18 + $0x10d8] sm:$0xff] %v5185_v30 }
 0x1a8   : > { %v12628_v28 = vld [vmem:[%s10187_s14 + $0x11f0] sm:$0xff]  ;;  %v9615_v34 = vld [vmem:[%s10187_s14 + $0x1b8] sm:$0xff]  ;;  %v5209_v39 = vpack.c.bf16 %v9612_v33, %v12553_v55  ;;  %9608 = vst [vmem:[%s10210_s18 + $0x1cd8] sm:$0xff] %v5193_v31 }
 0x1a9   : > { %v12640_v35 = vld [vmem:[%s10187_s14 + $0x39f0] sm:$0xff]  ;;  %v5217_v40 = vpack.c.bf16 %v9615_v34, %v12556_v56  ;;  %v9618_v41 = vld [vmem:[%s10187_s14 + $0x41d8] sm:$0xff]  ;;  %9611 = vst [vmem:[%s10210_s18 + $0x8d8] sm:$0xff] %v5201_v38 }
 0x1aa   : > { %v12643_v36 = vld [vmem:[%s10187_s14 + $0x21f0] sm:$0xff]  ;;  %v9621_v42 = vld [vmem:[%s10187_s14 + $0x29d8] sm:$0xff]  ;;  %v5225_v47 = vpack.c.bf16 %v9618_v41, %v12568_v63  ;;  %9614 = vst [vmem:[%s10210_s18 + $0x14d8] sm:$0xff] %v5209_v39 }
 0x1ab   : > { %v12646_v37 = vld [vmem:[%s10187_s14 + $0x9f0] sm:$0xff]  ;;  %v9624_v43 = vld [vmem:[%s10187_s14 + $0x11d8] sm:$0xff]  ;;  %v5233_v48 = vpack.c.bf16 %v9621_v42, %v12571_v0  ;;  %9617 = vst [vmem:[%s10210_s18 + $0x20d8] sm:$0xff] %v5217_v40 }
 0x1ac   : > { %v12658_v44 = vld [vmem:[%s10187_s14 + $0x31f0] sm:$0xff]  ;;  %v5241_v49 = vpack.c.bf16 %v9624_v43, %v12574_v1  ;;  %v9627_v50 = vld [vmem:[%s10187_s14 + $0x39d8] sm:$0xff]  ;;  %9620 = vst [vmem:[%s10210_s18 + $0xe8] sm:$0xff] %v5225_v47 }
 0x1ad   : > { %v12661_v45 = vld [vmem:[%s10187_s14 + $0x19f0] sm:$0xff]  ;;  %v9630_v51 = vld [vmem:[%s10187_s14 + $0x21d8] sm:$0xff]  ;;  %v5249_v56 = vpack.c.bf16 %v9627_v50, %v12586_v8  ;;  %9623 = vst [vmem:[%s10210_s18 + $0xce8] sm:$0xff] %v5233_v48 }
 0x1ae   : > { %v12664_v46 = vld [vmem:[%s10187_s14 + $0x1f0] sm:$0xff]  ;;  %v9633_v52 = vld [vmem:[%s10187_s14 + $0x9d8] sm:$0xff]  ;;  %v5257_v57 = vpack.c.bf16 %v9630_v51, %v12589_v9  ;;  %9626 = vst [vmem:[%s10210_s18 + $0x18e8] sm:$0xff] %v5241_v49 }
 0x1af   : > { %v12676_v53 = vld [vmem:[%s10187_s14 + $0x4210] sm:$0xff]  ;;  %v5265_v58 = vpack.c.bf16 %v9633_v52, %v12592_v10  ;;  %v9636_v59 = vld [vmem:[%s10187_s14 + $0x31d8] sm:$0xff]  ;;  %9629 = vst [vmem:[%s10210_s18 + $0x4e8] sm:$0xff] %v5249_v56 }
 0x1b0   : > { %v12679_v54 = vld [vmem:[%s10187_s14 + $0x2a10] sm:$0xff]  ;;  %v9639_v60 = vld [vmem:[%s10187_s14 + $0x19d8] sm:$0xff]  ;;  %v5273_v1 = vpack.c.bf16 %v9636_v59, %v12604_v17  ;;  %9632 = vst [vmem:[%s10210_s18 + $0x10e8] sm:$0xff] %v5257_v57 }
 0x1b1   : > { %v12682_v55 = vld [vmem:[%s10187_s14 + $0x1210] sm:$0xff]  ;;  %v9642_v61 = vld [vmem:[%s10187_s14 + $0x1d8] sm:$0xff]  ;;  %v5281_v2 = vpack.c.bf16 %v9639_v60, %v12607_v18  ;;  %9635 = vst [vmem:[%s10210_s18 + $0x1ce8] sm:$0xff] %v5265_v58 }
 0x1b2   : > { %v12694_v62 = vld [vmem:[%s10187_s14 + $0x3a10] sm:$0xff]  ;;  %v5289_v3 = vpack.c.bf16 %v9642_v61, %v12610_v19  ;;  %v9645_v4 = vld [vmem:[%s10187_s14 + $0x41f8] sm:$0xff]  ;;  %9638 = vst [vmem:[%s10210_s18 + $0x8e8] sm:$0xff] %v5273_v1 }
 0x1b3   : > { %v12697_v63 = vld [vmem:[%s10187_s14 + $0x2210] sm:$0xff]  ;;  %v9648_v5 = vld [vmem:[%s10187_s14 + $0x29f8] sm:$0xff]  ;;  %v5297_v10 = vpack.c.bf16 %v9645_v4, %v12622_v26  ;;  %9641 = vst [vmem:[%s10210_s18 + $0x14e8] sm:$0xff] %v5281_v2 }
 0x1b4   : > { %v12700_v0 = vld [vmem:[%s10187_s14 + $0xa10] sm:$0xff]  ;;  %v9651_v6 = vld [vmem:[%s10187_s14 + $0x11f8] sm:$0xff]  ;;  %v5305_v11 = vpack.c.bf16 %v9648_v5, %v12625_v27  ;;  %9644 = vst [vmem:[%s10210_s18 + $0x20e8] sm:$0xff] %v5289_v3 }
 0x1b5   : > { %v12712_v7 = vld [vmem:[%s10187_s14 + $0x3210] sm:$0xff]  ;;  %v5313_v12 = vpack.c.bf16 %v9651_v6, %v12628_v28  ;;  %v9654_v13 = vld [vmem:[%s10187_s14 + $0x39f8] sm:$0xff]  ;;  %9647 = vst [vmem:[%s10210_s18 + $0xf8] sm:$0xff] %v5297_v10 }
 0x1b6   : > { %v12715_v8 = vld [vmem:[%s10187_s14 + $0x1a10] sm:$0xff]  ;;  %v9657_v14 = vld [vmem:[%s10187_s14 + $0x21f8] sm:$0xff]  ;;  %v5321_v19 = vpack.c.bf16 %v9654_v13, %v12640_v35  ;;  %9650 = vst [vmem:[%s10210_s18 + $0xcf8] sm:$0xff] %v5305_v11 }
 0x1b7   : > { %v12718_v9 = vld [vmem:[%s10187_s14 + $0x210] sm:$0xff]  ;;  %v9660_v15 = vld [vmem:[%s10187_s14 + $0x9f8] sm:$0xff]  ;;  %v5329_v20 = vpack.c.bf16 %v9657_v14, %v12643_v36  ;;  %9653 = vst [vmem:[%s10210_s18 + $0x18f8] sm:$0xff] %v5313_v12 }
 0x1b8   : > { %v12730_v16 = vld [vmem:[%s10187_s14 + $0x4230] sm:$0xff]  ;;  %v5337_v21 = vpack.c.bf16 %v9660_v15, %v12646_v37  ;;  %v9663_v22 = vld [vmem:[%s10187_s14 + $0x31f8] sm:$0xff]  ;;  %9656 = vst [vmem:[%s10210_s18 + $0x4f8] sm:$0xff] %v5321_v19 }
 0x1b9   : > { %v12733_v17 = vld [vmem:[%s10187_s14 + $0x2a30] sm:$0xff]  ;;  %v9666_v23 = vld [vmem:[%s10187_s14 + $0x19f8] sm:$0xff]  ;;  %v5345_v28 = vpack.c.bf16 %v9663_v22, %v12658_v44  ;;  %9659 = vst [vmem:[%s10210_s18 + $0x10f8] sm:$0xff] %v5329_v20 }
 0x1ba   : > { %v12736_v18 = vld [vmem:[%s10187_s14 + $0x1230] sm:$0xff]  ;;  %v9669_v24 = vld [vmem:[%s10187_s14 + $0x1f8] sm:$0xff]  ;;  %v5353_v29 = vpack.c.bf16 %v9666_v23, %v12661_v45  ;;  %9662 = vst [vmem:[%s10210_s18 + $0x1cf8] sm:$0xff] %v5337_v21 }
 0x1bb   : > { %v12748_v25 = vld [vmem:[%s10187_s14 + $0x3a30] sm:$0xff]  ;;  %v5361_v30 = vpack.c.bf16 %v9669_v24, %v12664_v46  ;;  %v9672_v31 = vld [vmem:[%s10187_s14 + $0x4218] sm:$0xff]  ;;  %9665 = vst [vmem:[%s10210_s18 + $0x8f8] sm:$0xff] %v5345_v28 }
 0x1bc   : > { %v12751_v26 = vld [vmem:[%s10187_s14 + $0x2230] sm:$0xff]  ;;  %v9675_v32 = vld [vmem:[%s10187_s14 + $0x2a18] sm:$0xff]  ;;  %v5369_v37 = vpack.c.bf16 %v9672_v31, %v12676_v53  ;;  %9668 = vst [vmem:[%s10210_s18 + $0x14f8] sm:$0xff] %v5353_v29 }
 0x1bd   : > { %v12754_v27 = vld [vmem:[%s10187_s14 + $0xa30] sm:$0xff]  ;;  %v9678_v33 = vld [vmem:[%s10187_s14 + $0x1218] sm:$0xff]  ;;  %v5377_v38 = vpack.c.bf16 %v9675_v32, %v12679_v54  ;;  %9671 = vst [vmem:[%s10210_s18 + $0x20f8] sm:$0xff] %v5361_v30 }
 0x1be   : > { %v12766_v34 = vld [vmem:[%s10187_s14 + $0x3230] sm:$0xff]  ;;  %v5385_v39 = vpack.c.bf16 %v9678_v33, %v12682_v55  ;;  %v9681_v40 = vld [vmem:[%s10187_s14 + $0x3a18] sm:$0xff]  ;;  %9674 = vst [vmem:[%s10210_s18 + $0x108] sm:$0xff] %v5369_v37 }
 0x1bf   : > { %v12769_v35 = vld [vmem:[%s10187_s14 + $0x1a30] sm:$0xff]  ;;  %v9684_v41 = vld [vmem:[%s10187_s14 + $0x2218] sm:$0xff]  ;;  %v5393_v46 = vpack.c.bf16 %v9681_v40, %v12694_v62  ;;  %9677 = vst [vmem:[%s10210_s18 + $0xd08] sm:$0xff] %v5377_v38 }
 0x1c0   : > { %v12772_v36 = vld [vmem:[%s10187_s14 + $0x230] sm:$0xff]  ;;  %v9687_v42 = vld [vmem:[%s10187_s14 + $0xa18] sm:$0xff]  ;;  %v5401_v47 = vpack.c.bf16 %v9684_v41, %v12697_v63  ;;  %9680 = vst [vmem:[%s10210_s18 + $0x1908] sm:$0xff] %v5385_v39 }
 0x1c1   : > { %v12784_v43 = vld [vmem:[%s10187_s14 + $0x4250] sm:$0xff]  ;;  %v5409_v48 = vpack.c.bf16 %v9687_v42, %v12700_v0  ;;  %v9690_v49 = vld [vmem:[%s10187_s14 + $0x3218] sm:$0xff]  ;;  %9683 = vst [vmem:[%s10210_s18 + $0x508] sm:$0xff] %v5393_v46 }
 0x1c2   : > { %v12787_v44 = vld [vmem:[%s10187_s14 + $0x2a50] sm:$0xff]  ;;  %v9693_v50 = vld [vmem:[%s10187_s14 + $0x1a18] sm:$0xff]  ;;  %v5417_v55 = vpack.c.bf16 %v9690_v49, %v12712_v7  ;;  %9686 = vst [vmem:[%s10210_s18 + $0x1108] sm:$0xff] %v5401_v47 }
 0x1c3   : > { %v12790_v45 = vld [vmem:[%s10187_s14 + $0x1250] sm:$0xff]  ;;  %v9696_v51 = vld [vmem:[%s10187_s14 + $0x218] sm:$0xff]  ;;  %v5425_v56 = vpack.c.bf16 %v9693_v50, %v12715_v8  ;;  %9689 = vst [vmem:[%s10210_s18 + $0x1d08] sm:$0xff] %v5409_v48 }
 0x1c4   : > { %v12802_v52 = vld [vmem:[%s10187_s14 + $0x3a50] sm:$0xff]  ;;  %v5433_v57 = vpack.c.bf16 %v9696_v51, %v12718_v9  ;;  %v9699_v58 = vld [vmem:[%s10187_s14 + $0x4238] sm:$0xff]  ;;  %9692 = vst [vmem:[%s10210_s18 + $0x908] sm:$0xff] %v5417_v55 }
 0x1c5   : > { %v12805_v53 = vld [vmem:[%s10187_s14 + $0x2250] sm:$0xff]  ;;  %v9702_v59 = vld [vmem:[%s10187_s14 + $0x2a38] sm:$0xff]  ;;  %v5441_v0 = vpack.c.bf16 %v9699_v58, %v12730_v16  ;;  %9695 = vst [vmem:[%s10210_s18 + $0x1508] sm:$0xff] %v5425_v56 }
 0x1c6   : > { %v12808_v54 = vld [vmem:[%s10187_s14 + $0xa50] sm:$0xff]  ;;  %v9705_v60 = vld [vmem:[%s10187_s14 + $0x1238] sm:$0xff]  ;;  %v5449_v1 = vpack.c.bf16 %v9702_v59, %v12733_v17  ;;  %9698 = vst [vmem:[%s10210_s18 + $0x2108] sm:$0xff] %v5433_v57 }
 0x1c7   : > { %v12820_v61 = vld [vmem:[%s10187_s14 + $0x3250] sm:$0xff]  ;;  %v5457_v2 = vpack.c.bf16 %v9705_v60, %v12736_v18  ;;  %v9708_v3 = vld [vmem:[%s10187_s14 + $0x3a38] sm:$0xff]  ;;  %9701 = vst [vmem:[%s10210_s18 + $0x118] sm:$0xff] %v5441_v0 }
 0x1c8   : > { %v12823_v62 = vld [vmem:[%s10187_s14 + $0x1a50] sm:$0xff]  ;;  %v9711_v4 = vld [vmem:[%s10187_s14 + $0x2238] sm:$0xff]  ;;  %v5465_v9 = vpack.c.bf16 %v9708_v3, %v12748_v25  ;;  %9704 = vst [vmem:[%s10210_s18 + $0xd18] sm:$0xff] %v5449_v1 }
 0x1c9   : > { %v12826_v63 = vld [vmem:[%s10187_s14 + $0x250] sm:$0xff]  ;;  %v9714_v5 = vld [vmem:[%s10187_s14 + $0xa38] sm:$0xff]  ;;  %v5473_v10 = vpack.c.bf16 %v9711_v4, %v12751_v26  ;;  %9707 = vst [vmem:[%s10210_s18 + $0x1918] sm:$0xff] %v5457_v2 }
 0x1ca   : > { %v12838_v6 = vld [vmem:[%s10187_s14 + $0x4270] sm:$0xff]  ;;  %v5481_v11 = vpack.c.bf16 %v9714_v5, %v12754_v27  ;;  %v9717_v12 = vld [vmem:[%s10187_s14 + $0x3238] sm:$0xff]  ;;  %9710 = vst [vmem:[%s10210_s18 + $0x518] sm:$0xff] %v5465_v9 }
 0x1cb   : > { %v12841_v7 = vld [vmem:[%s10187_s14 + $0x2a70] sm:$0xff]  ;;  %v9720_v13 = vld [vmem:[%s10187_s14 + $0x1a38] sm:$0xff]  ;;  %v5489_v18 = vpack.c.bf16 %v9717_v12, %v12766_v34  ;;  %9713 = vst [vmem:[%s10210_s18 + $0x1118] sm:$0xff] %v5473_v10 }
 0x1cc   : > { %v12844_v8 = vld [vmem:[%s10187_s14 + $0x1270] sm:$0xff]  ;;  %v9723_v14 = vld [vmem:[%s10187_s14 + $0x238] sm:$0xff]  ;;  %v5497_v19 = vpack.c.bf16 %v9720_v13, %v12769_v35  ;;  %9716 = vst [vmem:[%s10210_s18 + $0x1d18] sm:$0xff] %v5481_v11 }
 0x1cd   : > { %v12856_v15 = vld [vmem:[%s10187_s14 + $0x3a70] sm:$0xff]  ;;  %v5505_v20 = vpack.c.bf16 %v9723_v14, %v12772_v36  ;;  %v9726_v21 = vld [vmem:[%s10187_s14 + $0x4258] sm:$0xff]  ;;  %9719 = vst [vmem:[%s10210_s18 + $0x918] sm:$0xff] %v5489_v18 }
 0x1ce   : > { %v12859_v16 = vld [vmem:[%s10187_s14 + $0x2270] sm:$0xff]  ;;  %v9729_v22 = vld [vmem:[%s10187_s14 + $0x2a58] sm:$0xff]  ;;  %v5513_v27 = vpack.c.bf16 %v9726_v21, %v12784_v43  ;;  %9722 = vst [vmem:[%s10210_s18 + $0x1518] sm:$0xff] %v5497_v19 }
 0x1cf   : > { %v12862_v17 = vld [vmem:[%s10187_s14 + $0xa70] sm:$0xff]  ;;  %v9732_v23 = vld [vmem:[%s10187_s14 + $0x1258] sm:$0xff]  ;;  %v5521_v28 = vpack.c.bf16 %v9729_v22, %v12787_v44  ;;  %9725 = vst [vmem:[%s10210_s18 + $0x2118] sm:$0xff] %v5505_v20 }
 0x1d0   : > { %v12874_v24 = vld [vmem:[%s10187_s14 + $0x3270] sm:$0xff]  ;;  %v5529_v29 = vpack.c.bf16 %v9732_v23, %v12790_v45  ;;  %v9735_v30 = vld [vmem:[%s10187_s14 + $0x3a58] sm:$0xff]  ;;  %9728 = vst [vmem:[%s10210_s18 + $0x128] sm:$0xff] %v5513_v27 }
 0x1d1   : > { %v12877_v25 = vld [vmem:[%s10187_s14 + $0x1a70] sm:$0xff]  ;;  %v9738_v31 = vld [vmem:[%s10187_s14 + $0x2258] sm:$0xff]  ;;  %v5537_v36 = vpack.c.bf16 %v9735_v30, %v12802_v52  ;;  %9731 = vst [vmem:[%s10210_s18 + $0xd28] sm:$0xff] %v5521_v28 }
 0x1d2   : > { %v12880_v26 = vld [vmem:[%s10187_s14 + $0x270] sm:$0xff]  ;;  %v9741_v32 = vld [vmem:[%s10187_s14 + $0xa58] sm:$0xff]  ;;  %v5545_v37 = vpack.c.bf16 %v9738_v31, %v12805_v53  ;;  %9734 = vst [vmem:[%s10210_s18 + $0x1928] sm:$0xff] %v5529_v29 }
 0x1d3   : > { %v12892_v33 = vld [vmem:[%s10187_s14 + $0x4290] sm:$0xff]  ;;  %v5553_v38 = vpack.c.bf16 %v9741_v32, %v12808_v54  ;;  %v9744_v39 = vld [vmem:[%s10187_s14 + $0x3258] sm:$0xff]  ;;  %9737 = vst [vmem:[%s10210_s18 + $0x528] sm:$0xff] %v5537_v36 }
 0x1d4   : > { %v12895_v34 = vld [vmem:[%s10187_s14 + $0x2a90] sm:$0xff]  ;;  %v9747_v40 = vld [vmem:[%s10187_s14 + $0x1a58] sm:$0xff]  ;;  %v5561_v45 = vpack.c.bf16 %v9744_v39, %v12820_v61  ;;  %9740 = vst [vmem:[%s10210_s18 + $0x1128] sm:$0xff] %v5545_v37 }
 0x1d5   : > { %v12898_v35 = vld [vmem:[%s10187_s14 + $0x1290] sm:$0xff]  ;;  %v9750_v41 = vld [vmem:[%s10187_s14 + $0x258] sm:$0xff]  ;;  %v5569_v46 = vpack.c.bf16 %v9747_v40, %v12823_v62  ;;  %9743 = vst [vmem:[%s10210_s18 + $0x1d28] sm:$0xff] %v5553_v38 }
 0x1d6   : > { %v12910_v42 = vld [vmem:[%s10187_s14 + $0x3a90] sm:$0xff]  ;;  %v5577_v47 = vpack.c.bf16 %v9750_v41, %v12826_v63  ;;  %v9753_v48 = vld [vmem:[%s10187_s14 + $0x4278] sm:$0xff]  ;;  %9746 = vst [vmem:[%s10210_s18 + $0x928] sm:$0xff] %v5561_v45 }
 0x1d7   : > { %v12913_v43 = vld [vmem:[%s10187_s14 + $0x2290] sm:$0xff]  ;;  %v9756_v49 = vld [vmem:[%s10187_s14 + $0x2a78] sm:$0xff]  ;;  %v5585_v54 = vpack.c.bf16 %v9753_v48, %v12838_v6  ;;  %9749 = vst [vmem:[%s10210_s18 + $0x1528] sm:$0xff] %v5569_v46 }
 0x1d8   : > { %v12916_v44 = vld [vmem:[%s10187_s14 + $0xa90] sm:$0xff]  ;;  %v9759_v50 = vld [vmem:[%s10187_s14 + $0x1278] sm:$0xff]  ;;  %v5593_v55 = vpack.c.bf16 %v9756_v49, %v12841_v7  ;;  %9752 = vst [vmem:[%s10210_s18 + $0x2128] sm:$0xff] %v5577_v47 }
 0x1d9   : > { %v12928_v51 = vld [vmem:[%s10187_s14 + $0x3290] sm:$0xff]  ;;  %v5601_v56 = vpack.c.bf16 %v9759_v50, %v12844_v8  ;;  %v9762_v57 = vld [vmem:[%s10187_s14 + $0x3a78] sm:$0xff]  ;;  %9755 = vst [vmem:[%s10210_s18 + $0x138] sm:$0xff] %v5585_v54 }
 0x1da   : > { %v12931_v52 = vld [vmem:[%s10187_s14 + $0x1a90] sm:$0xff]  ;;  %v9765_v58 = vld [vmem:[%s10187_s14 + $0x2278] sm:$0xff]  ;;  %v5609_v63 = vpack.c.bf16 %v9762_v57, %v12856_v15  ;;  %9758 = vst [vmem:[%s10210_s18 + $0xd38] sm:$0xff] %v5593_v55 }
 0x1db   : > { %v12934_v53 = vld [vmem:[%s10187_s14 + $0x290] sm:$0xff]  ;;  %v9768_v59 = vld [vmem:[%s10187_s14 + $0xa78] sm:$0xff]  ;;  %v5617_v0 = vpack.c.bf16 %v9765_v58, %v12859_v16  ;;  %9761 = vst [vmem:[%s10210_s18 + $0x1938] sm:$0xff] %v5601_v56 }
 0x1dc   : > { %v12946_v60 = vld [vmem:[%s10187_s14 + $0x42b0] sm:$0xff]  ;;  %v5625_v1 = vpack.c.bf16 %v9768_v59, %v12862_v17  ;;  %v9771_v2 = vld [vmem:[%s10187_s14 + $0x3278] sm:$0xff]  ;;  %9764 = vst [vmem:[%s10210_s18 + $0x538] sm:$0xff] %v5609_v63 }
 0x1dd   : > { %v12949_v61 = vld [vmem:[%s10187_s14 + $0x2ab0] sm:$0xff]  ;;  %v9774_v3 = vld [vmem:[%s10187_s14 + $0x1a78] sm:$0xff]  ;;  %v5633_v8 = vpack.c.bf16 %v9771_v2, %v12874_v24  ;;  %9767 = vst [vmem:[%s10210_s18 + $0x1138] sm:$0xff] %v5617_v0 }
 0x1de   : > { %v12952_v62 = vld [vmem:[%s10187_s14 + $0x12b0] sm:$0xff]  ;;  %v9777_v4 = vld [vmem:[%s10187_s14 + $0x278] sm:$0xff]  ;;  %v5641_v9 = vpack.c.bf16 %v9774_v3, %v12877_v25  ;;  %9770 = vst [vmem:[%s10210_s18 + $0x1d38] sm:$0xff] %v5625_v1 }
 0x1df   : > { %v12964_v5 = vld [vmem:[%s10187_s14 + $0x3ab0] sm:$0xff]  ;;  %v5649_v10 = vpack.c.bf16 %v9777_v4, %v12880_v26  ;;  %v9780_v11 = vld [vmem:[%s10187_s14 + $0x4298] sm:$0xff]  ;;  %9773 = vst [vmem:[%s10210_s18 + $0x938] sm:$0xff] %v5633_v8 }
 0x1e0   : > { %v12967_v6 = vld [vmem:[%s10187_s14 + $0x22b0] sm:$0xff]  ;;  %v9783_v12 = vld [vmem:[%s10187_s14 + $0x2a98] sm:$0xff]  ;;  %v5657_v17 = vpack.c.bf16 %v9780_v11, %v12892_v33  ;;  %9776 = vst [vmem:[%s10210_s18 + $0x1538] sm:$0xff] %v5641_v9 }
 0x1e1   : > { %v12970_v7 = vld [vmem:[%s10187_s14 + $0xab0] sm:$0xff]  ;;  %v9786_v13 = vld [vmem:[%s10187_s14 + $0x1298] sm:$0xff]  ;;  %v5665_v18 = vpack.c.bf16 %v9783_v12, %v12895_v34  ;;  %9779 = vst [vmem:[%s10210_s18 + $0x2138] sm:$0xff] %v5649_v10 }
 0x1e2   : > { %v12982_v14 = vld [vmem:[%s10187_s14 + $0x32b0] sm:$0xff]  ;;  %v5673_v19 = vpack.c.bf16 %v9786_v13, %v12898_v35  ;;  %v9789_v20 = vld [vmem:[%s10187_s14 + $0x3a98] sm:$0xff]  ;;  %9782 = vst [vmem:[%s10210_s18 + $0x148] sm:$0xff] %v5657_v17 }
 0x1e3   : > { %v12985_v15 = vld [vmem:[%s10187_s14 + $0x1ab0] sm:$0xff]  ;;  %v9792_v21 = vld [vmem:[%s10187_s14 + $0x2298] sm:$0xff]  ;;  %v5681_v26 = vpack.c.bf16 %v9789_v20, %v12910_v42  ;;  %9785 = vst [vmem:[%s10210_s18 + $0xd48] sm:$0xff] %v5665_v18 }
 0x1e4   : > { %v12988_v16 = vld [vmem:[%s10187_s14 + $0x2b0] sm:$0xff]  ;;  %v9795_v22 = vld [vmem:[%s10187_s14 + $0xa98] sm:$0xff]  ;;  %v5689_v27 = vpack.c.bf16 %v9792_v21, %v12913_v43  ;;  %9788 = vst [vmem:[%s10210_s18 + $0x1948] sm:$0xff] %v5673_v19 }
 0x1e5   : > { %v13000_v23 = vld [vmem:[%s10187_s14 + $0x42d0] sm:$0xff]  ;;  %v5697_v28 = vpack.c.bf16 %v9795_v22, %v12916_v44  ;;  %v9798_v29 = vld [vmem:[%s10187_s14 + $0x3298] sm:$0xff]  ;;  %9791 = vst [vmem:[%s10210_s18 + $0x548] sm:$0xff] %v5681_v26 }
 0x1e6   : > { %v13003_v24 = vld [vmem:[%s10187_s14 + $0x2ad0] sm:$0xff]  ;;  %v9801_v30 = vld [vmem:[%s10187_s14 + $0x1a98] sm:$0xff]  ;;  %v5705_v35 = vpack.c.bf16 %v9798_v29, %v12928_v51  ;;  %9794 = vst [vmem:[%s10210_s18 + $0x1148] sm:$0xff] %v5689_v27 }
 0x1e7   : > { %v13006_v25 = vld [vmem:[%s10187_s14 + $0x12d0] sm:$0xff]  ;;  %v9804_v31 = vld [vmem:[%s10187_s14 + $0x298] sm:$0xff]  ;;  %v5713_v36 = vpack.c.bf16 %v9801_v30, %v12931_v52  ;;  %9797 = vst [vmem:[%s10210_s18 + $0x1d48] sm:$0xff] %v5697_v28 }
 0x1e8   : > { %v13018_v32 = vld [vmem:[%s10187_s14 + $0x3ad0] sm:$0xff]  ;;  %v5721_v37 = vpack.c.bf16 %v9804_v31, %v12934_v53  ;;  %v9807_v38 = vld [vmem:[%s10187_s14 + $0x42b8] sm:$0xff]  ;;  %9800 = vst [vmem:[%s10210_s18 + $0x948] sm:$0xff] %v5705_v35 }
 0x1e9   : > { %v13021_v33 = vld [vmem:[%s10187_s14 + $0x22d0] sm:$0xff]  ;;  %v9810_v39 = vld [vmem:[%s10187_s14 + $0x2ab8] sm:$0xff]  ;;  %v5729_v44 = vpack.c.bf16 %v9807_v38, %v12946_v60  ;;  %9803 = vst [vmem:[%s10210_s18 + $0x1548] sm:$0xff] %v5713_v36 }
 0x1ea   : > { %v13024_v34 = vld [vmem:[%s10187_s14 + $0xad0] sm:$0xff]  ;;  %v9813_v40 = vld [vmem:[%s10187_s14 + $0x12b8] sm:$0xff]  ;;  %v5737_v45 = vpack.c.bf16 %v9810_v39, %v12949_v61  ;;  %9806 = vst [vmem:[%s10210_s18 + $0x2148] sm:$0xff] %v5721_v37 }
 0x1eb   : > { %v13036_v41 = vld [vmem:[%s10187_s14 + $0x32d0] sm:$0xff]  ;;  %v5745_v46 = vpack.c.bf16 %v9813_v40, %v12952_v62  ;;  %v9816_v47 = vld [vmem:[%s10187_s14 + $0x3ab8] sm:$0xff]  ;;  %9809 = vst [vmem:[%s10210_s18 + $0x158] sm:$0xff] %v5729_v44 }
 0x1ec   : > { %v13039_v42 = vld [vmem:[%s10187_s14 + $0x1ad0] sm:$0xff]  ;;  %v9819_v48 = vld [vmem:[%s10187_s14 + $0x22b8] sm:$0xff]  ;;  %v5753_v53 = vpack.c.bf16 %v9816_v47, %v12964_v5  ;;  %9812 = vst [vmem:[%s10210_s18 + $0xd58] sm:$0xff] %v5737_v45 }
 0x1ed   : > { %v13042_v43 = vld [vmem:[%s10187_s14 + $0x2d0] sm:$0xff]  ;;  %v9822_v49 = vld [vmem:[%s10187_s14 + $0xab8] sm:$0xff]  ;;  %v5761_v54 = vpack.c.bf16 %v9819_v48, %v12967_v6  ;;  %9815 = vst [vmem:[%s10210_s18 + $0x1958] sm:$0xff] %v5745_v46 }
 0x1ee   : > { %v13054_v50 = vld [vmem:[%s10187_s14 + $0x42f0] sm:$0xff]  ;;  %v5769_v55 = vpack.c.bf16 %v9822_v49, %v12970_v7  ;;  %v9825_v56 = vld [vmem:[%s10187_s14 + $0x32b8] sm:$0xff]  ;;  %9818 = vst [vmem:[%s10210_s18 + $0x558] sm:$0xff] %v5753_v53 }
 0x1ef   : > { %v13057_v51 = vld [vmem:[%s10187_s14 + $0x2af0] sm:$0xff]  ;;  %v9828_v57 = vld [vmem:[%s10187_s14 + $0x1ab8] sm:$0xff]  ;;  %v5777_v62 = vpack.c.bf16 %v9825_v56, %v12982_v14  ;;  %9821 = vst [vmem:[%s10210_s18 + $0x1158] sm:$0xff] %v5761_v54 }
 0x1f0   : > { %v13060_v52 = vld [vmem:[%s10187_s14 + $0x12f0] sm:$0xff]  ;;  %v9831_v58 = vld [vmem:[%s10187_s14 + $0x2b8] sm:$0xff]  ;;  %v5785_v63 = vpack.c.bf16 %v9828_v57, %v12985_v15  ;;  %9824 = vst [vmem:[%s10210_s18 + $0x1d58] sm:$0xff] %v5769_v55 }
 0x1f1   : > { %v13072_v59 = vld [vmem:[%s10187_s14 + $0x3af0] sm:$0xff]  ;;  %v5793_v0 = vpack.c.bf16 %v9831_v58, %v12988_v16  ;;  %v9834_v1 = vld [vmem:[%s10187_s14 + $0x42d8] sm:$0xff]  ;;  %9827 = vst [vmem:[%s10210_s18 + $0x958] sm:$0xff] %v5777_v62 }
 0x1f2   : > { %v13075_v60 = vld [vmem:[%s10187_s14 + $0x22f0] sm:$0xff]  ;;  %v9837_v2 = vld [vmem:[%s10187_s14 + $0x2ad8] sm:$0xff]  ;;  %v5801_v7 = vpack.c.bf16 %v9834_v1, %v13000_v23  ;;  %9830 = vst [vmem:[%s10210_s18 + $0x1558] sm:$0xff] %v5785_v63 }
 0x1f3   : > { %v13078_v61 = vld [vmem:[%s10187_s14 + $0xaf0] sm:$0xff]  ;;  %v9840_v3 = vld [vmem:[%s10187_s14 + $0x12d8] sm:$0xff]  ;;  %v5809_v8 = vpack.c.bf16 %v9837_v2, %v13003_v24  ;;  %9833 = vst [vmem:[%s10210_s18 + $0x2158] sm:$0xff] %v5793_v0 }
 0x1f4   : > { %v13090_v4 = vld [vmem:[%s10187_s14 + $0x32f0] sm:$0xff]  ;;  %v5817_v9 = vpack.c.bf16 %v9840_v3, %v13006_v25  ;;  %v9843_v10 = vld [vmem:[%s10187_s14 + $0x3ad8] sm:$0xff]  ;;  %9836 = vst [vmem:[%s10210_s18 + $0x168] sm:$0xff] %v5801_v7 }
 0x1f5   : > { %v13093_v5 = vld [vmem:[%s10187_s14 + $0x1af0] sm:$0xff]  ;;  %v9846_v11 = vld [vmem:[%s10187_s14 + $0x22d8] sm:$0xff]  ;;  %v5825_v16 = vpack.c.bf16 %v9843_v10, %v13018_v32  ;;  %9839 = vst [vmem:[%s10210_s18 + $0xd68] sm:$0xff] %v5809_v8 }
 0x1f6   : > { %v13096_v6 = vld [vmem:[%s10187_s14 + $0x2f0] sm:$0xff]  ;;  %v9849_v12 = vld [vmem:[%s10187_s14 + $0xad8] sm:$0xff]  ;;  %v5833_v17 = vpack.c.bf16 %v9846_v11, %v13021_v33  ;;  %9842 = vst [vmem:[%s10210_s18 + $0x1968] sm:$0xff] %v5817_v9 }
 0x1f7   : > { %v13108_v13 = vld [vmem:[%s10187_s14 + $0x4310] sm:$0xff]  ;;  %v5841_v18 = vpack.c.bf16 %v9849_v12, %v13024_v34  ;;  %v9852_v19 = vld [vmem:[%s10187_s14 + $0x32d8] sm:$0xff]  ;;  %9845 = vst [vmem:[%s10210_s18 + $0x568] sm:$0xff] %v5825_v16 }
 0x1f8   : > { %v13111_v14 = vld [vmem:[%s10187_s14 + $0x2b10] sm:$0xff]  ;;  %v9855_v20 = vld [vmem:[%s10187_s14 + $0x1ad8] sm:$0xff]  ;;  %v5849_v25 = vpack.c.bf16 %v9852_v19, %v13036_v41  ;;  %9848 = vst [vmem:[%s10210_s18 + $0x1168] sm:$0xff] %v5833_v17 }
 0x1f9   : > { %v13114_v15 = vld [vmem:[%s10187_s14 + $0x1310] sm:$0xff]  ;;  %v9858_v21 = vld [vmem:[%s10187_s14 + $0x2d8] sm:$0xff]  ;;  %v5857_v26 = vpack.c.bf16 %v9855_v20, %v13039_v42  ;;  %9851 = vst [vmem:[%s10210_s18 + $0x1d68] sm:$0xff] %v5841_v18 }
 0x1fa   : > { %v13126_v22 = vld [vmem:[%s10187_s14 + $0x3b10] sm:$0xff]  ;;  %v5865_v27 = vpack.c.bf16 %v9858_v21, %v13042_v43  ;;  %v9861_v28 = vld [vmem:[%s10187_s14 + $0x42f8] sm:$0xff]  ;;  %9854 = vst [vmem:[%s10210_s18 + $0x968] sm:$0xff] %v5849_v25 }
 0x1fb   : > { %v13129_v23 = vld [vmem:[%s10187_s14 + $0x2310] sm:$0xff]  ;;  %v9864_v29 = vld [vmem:[%s10187_s14 + $0x2af8] sm:$0xff]  ;;  %v5873_v34 = vpack.c.bf16 %v9861_v28, %v13054_v50  ;;  %9857 = vst [vmem:[%s10210_s18 + $0x1568] sm:$0xff] %v5857_v26 }
 0x1fc   : > { %v13132_v24 = vld [vmem:[%s10187_s14 + $0xb10] sm:$0xff]  ;;  %v9867_v30 = vld [vmem:[%s10187_s14 + $0x12f8] sm:$0xff]  ;;  %v5881_v35 = vpack.c.bf16 %v9864_v29, %v13057_v51  ;;  %9860 = vst [vmem:[%s10210_s18 + $0x2168] sm:$0xff] %v5865_v27 }
 0x1fd   : > { %v13144_v31 = vld [vmem:[%s10187_s14 + $0x3310] sm:$0xff]  ;;  %v5889_v36 = vpack.c.bf16 %v9867_v30, %v13060_v52  ;;  %v9870_v37 = vld [vmem:[%s10187_s14 + $0x3af8] sm:$0xff]  ;;  %9863 = vst [vmem:[%s10210_s18 + $0x178] sm:$0xff] %v5873_v34 }
 0x1fe   : > { %v13147_v32 = vld [vmem:[%s10187_s14 + $0x1b10] sm:$0xff]  ;;  %v9873_v38 = vld [vmem:[%s10187_s14 + $0x22f8] sm:$0xff]  ;;  %v5897_v43 = vpack.c.bf16 %v9870_v37, %v13072_v59  ;;  %9866 = vst [vmem:[%s10210_s18 + $0xd78] sm:$0xff] %v5881_v35 }
 0x1ff   : > { %v13150_v33 = vld [vmem:[%s10187_s14 + $0x310] sm:$0xff]  ;;  %v9876_v39 = vld [vmem:[%s10187_s14 + $0xaf8] sm:$0xff]  ;;  %v5905_v44 = vpack.c.bf16 %v9873_v38, %v13075_v60  ;;  %9869 = vst [vmem:[%s10210_s18 + $0x1978] sm:$0xff] %v5889_v36 }
 0x200   : > { %v13162_v40 = vld [vmem:[%s10187_s14 + $0x4330] sm:$0xff]  ;;  %v5913_v45 = vpack.c.bf16 %v9876_v39, %v13078_v61  ;;  %v9879_v46 = vld [vmem:[%s10187_s14 + $0x32f8] sm:$0xff]  ;;  %9872 = vst [vmem:[%s10210_s18 + $0x578] sm:$0xff] %v5897_v43 }
 0x201   : > { %v13165_v41 = vld [vmem:[%s10187_s14 + $0x2b30] sm:$0xff]  ;;  %v9882_v47 = vld [vmem:[%s10187_s14 + $0x1af8] sm:$0xff]  ;;  %v5921_v52 = vpack.c.bf16 %v9879_v46, %v13090_v4  ;;  %9875 = vst [vmem:[%s10210_s18 + $0x1178] sm:$0xff] %v5905_v44 }
 0x202   : > { %v13168_v42 = vld [vmem:[%s10187_s14 + $0x1330] sm:$0xff]  ;;  %v9885_v48 = vld [vmem:[%s10187_s14 + $0x2f8] sm:$0xff]  ;;  %v5929_v53 = vpack.c.bf16 %v9882_v47, %v13093_v5  ;;  %9878 = vst [vmem:[%s10210_s18 + $0x1d78] sm:$0xff] %v5913_v45 }
 0x203   : > { %v13180_v49 = vld [vmem:[%s10187_s14 + $0x3b30] sm:$0xff]  ;;  %v5937_v54 = vpack.c.bf16 %v9885_v48, %v13096_v6  ;;  %v9888_v55 = vld [vmem:[%s10187_s14 + $0x4318] sm:$0xff]  ;;  %9881 = vst [vmem:[%s10210_s18 + $0x978] sm:$0xff] %v5921_v52 }
 0x204   : > { %v13183_v50 = vld [vmem:[%s10187_s14 + $0x2330] sm:$0xff]  ;;  %v9891_v56 = vld [vmem:[%s10187_s14 + $0x2b18] sm:$0xff]  ;;  %v5945_v61 = vpack.c.bf16 %v9888_v55, %v13108_v13  ;;  %9884 = vst [vmem:[%s10210_s18 + $0x1578] sm:$0xff] %v5929_v53 }
 0x205   : > { %v13186_v51 = vld [vmem:[%s10187_s14 + $0xb30] sm:$0xff]  ;;  %v9894_v57 = vld [vmem:[%s10187_s14 + $0x1318] sm:$0xff]  ;;  %v5953_v62 = vpack.c.bf16 %v9891_v56, %v13111_v14  ;;  %9887 = vst [vmem:[%s10210_s18 + $0x2178] sm:$0xff] %v5937_v54 }
 0x206   : > { %v13198_v58 = vld [vmem:[%s10187_s14 + $0x3330] sm:$0xff]  ;;  %v5961_v63 = vpack.c.bf16 %v9894_v57, %v13114_v15  ;;  %v9897_v0 = vld [vmem:[%s10187_s14 + $0x3b18] sm:$0xff]  ;;  %9890 = vst [vmem:[%s10210_s18 + $0x188] sm:$0xff] %v5945_v61 }
 0x207   : > { %v13201_v59 = vld [vmem:[%s10187_s14 + $0x1b30] sm:$0xff]  ;;  %v9900_v1 = vld [vmem:[%s10187_s14 + $0x2318] sm:$0xff]  ;;  %v5969_v6 = vpack.c.bf16 %v9897_v0, %v13126_v22  ;;  %9893 = vst [vmem:[%s10210_s18 + $0xd88] sm:$0xff] %v5953_v62 }
 0x208   : > { %v13204_v60 = vld [vmem:[%s10187_s14 + $0x330] sm:$0xff]  ;;  %v9903_v2 = vld [vmem:[%s10187_s14 + $0xb18] sm:$0xff]  ;;  %v5977_v7 = vpack.c.bf16 %v9900_v1, %v13129_v23  ;;  %9896 = vst [vmem:[%s10210_s18 + $0x1988] sm:$0xff] %v5961_v63 }
 0x209   : > { %v13216_v3 = vld [vmem:[%s10187_s14 + $0x4350] sm:$0xff]  ;;  %v5985_v8 = vpack.c.bf16 %v9903_v2, %v13132_v24  ;;  %v9906_v9 = vld [vmem:[%s10187_s14 + $0x3318] sm:$0xff]  ;;  %9899 = vst [vmem:[%s10210_s18 + $0x588] sm:$0xff] %v5969_v6 }
 0x20a   : > { %v13219_v4 = vld [vmem:[%s10187_s14 + $0x2b50] sm:$0xff]  ;;  %v9909_v10 = vld [vmem:[%s10187_s14 + $0x1b18] sm:$0xff]  ;;  %v5993_v15 = vpack.c.bf16 %v9906_v9, %v13144_v31  ;;  %9902 = vst [vmem:[%s10210_s18 + $0x1188] sm:$0xff] %v5977_v7 }
 0x20b   : > { %v13222_v5 = vld [vmem:[%s10187_s14 + $0x1350] sm:$0xff]  ;;  %v9912_v11 = vld [vmem:[%s10187_s14 + $0x318] sm:$0xff]  ;;  %v6001_v16 = vpack.c.bf16 %v9909_v10, %v13147_v32  ;;  %9905 = vst [vmem:[%s10210_s18 + $0x1d88] sm:$0xff] %v5985_v8 }
 0x20c   : > { %v13234_v12 = vld [vmem:[%s10187_s14 + $0x3b50] sm:$0xff]  ;;  %v6009_v17 = vpack.c.bf16 %v9912_v11, %v13150_v33  ;;  %v9915_v18 = vld [vmem:[%s10187_s14 + $0x4338] sm:$0xff]  ;;  %9908 = vst [vmem:[%s10210_s18 + $0x988] sm:$0xff] %v5993_v15 }
 0x20d   : > { %v13237_v13 = vld [vmem:[%s10187_s14 + $0x2350] sm:$0xff]  ;;  %v9918_v19 = vld [vmem:[%s10187_s14 + $0x2b38] sm:$0xff]  ;;  %v6017_v24 = vpack.c.bf16 %v9915_v18, %v13162_v40  ;;  %9911 = vst [vmem:[%s10210_s18 + $0x1588] sm:$0xff] %v6001_v16 }
 0x20e   : > { %v13240_v14 = vld [vmem:[%s10187_s14 + $0xb50] sm:$0xff]  ;;  %v9921_v20 = vld [vmem:[%s10187_s14 + $0x1338] sm:$0xff]  ;;  %v6025_v25 = vpack.c.bf16 %v9918_v19, %v13165_v41  ;;  %9914 = vst [vmem:[%s10210_s18 + $0x2188] sm:$0xff] %v6009_v17 }
 0x20f   : > { %v13252_v21 = vld [vmem:[%s10187_s14 + $0x3350] sm:$0xff]  ;;  %v6033_v26 = vpack.c.bf16 %v9921_v20, %v13168_v42  ;;  %v9924_v27 = vld [vmem:[%s10187_s14 + $0x3b38] sm:$0xff]  ;;  %9917 = vst [vmem:[%s10210_s18 + $0x198] sm:$0xff] %v6017_v24 }
 0x210   : > { %v13255_v22 = vld [vmem:[%s10187_s14 + $0x1b50] sm:$0xff]  ;;  %v9927_v28 = vld [vmem:[%s10187_s14 + $0x2338] sm:$0xff]  ;;  %v6041_v33 = vpack.c.bf16 %v9924_v27, %v13180_v49  ;;  %9920 = vst [vmem:[%s10210_s18 + $0xd98] sm:$0xff] %v6025_v25 }
 0x211   : > { %v13258_v23 = vld [vmem:[%s10187_s14 + $0x350] sm:$0xff]  ;;  %v9930_v29 = vld [vmem:[%s10187_s14 + $0xb38] sm:$0xff]  ;;  %v6049_v34 = vpack.c.bf16 %v9927_v28, %v13183_v50  ;;  %9923 = vst [vmem:[%s10210_s18 + $0x1998] sm:$0xff] %v6033_v26 }
 0x212   : > { %v13270_v30 = vld [vmem:[%s10187_s14 + $0x4370] sm:$0xff]  ;;  %v6057_v35 = vpack.c.bf16 %v9930_v29, %v13186_v51  ;;  %v9933_v36 = vld [vmem:[%s10187_s14 + $0x3338] sm:$0xff]  ;;  %9926 = vst [vmem:[%s10210_s18 + $0x598] sm:$0xff] %v6041_v33 }
 0x213   : > { %v13273_v31 = vld [vmem:[%s10187_s14 + $0x2b70] sm:$0xff]  ;;  %v9936_v37 = vld [vmem:[%s10187_s14 + $0x1b38] sm:$0xff]  ;;  %v6065_v42 = vpack.c.bf16 %v9933_v36, %v13198_v58  ;;  %9929 = vst [vmem:[%s10210_s18 + $0x1198] sm:$0xff] %v6049_v34 }
 0x214   : > { %v13276_v32 = vld [vmem:[%s10187_s14 + $0x1370] sm:$0xff]  ;;  %v9939_v38 = vld [vmem:[%s10187_s14 + $0x338] sm:$0xff]  ;;  %v6073_v43 = vpack.c.bf16 %v9936_v37, %v13201_v59  ;;  %9932 = vst [vmem:[%s10210_s18 + $0x1d98] sm:$0xff] %v6057_v35 }
 0x215   : > { %v13288_v39 = vld [vmem:[%s10187_s14 + $0x3b70] sm:$0xff]  ;;  %v6081_v44 = vpack.c.bf16 %v9939_v38, %v13204_v60  ;;  %v9942_v45 = vld [vmem:[%s10187_s14 + $0x4358] sm:$0xff]  ;;  %9935 = vst [vmem:[%s10210_s18 + $0x998] sm:$0xff] %v6065_v42 }
 0x216   : > { %v13291_v40 = vld [vmem:[%s10187_s14 + $0x2370] sm:$0xff]  ;;  %v9945_v46 = vld [vmem:[%s10187_s14 + $0x2b58] sm:$0xff]  ;;  %v6089_v51 = vpack.c.bf16 %v9942_v45, %v13216_v3  ;;  %9938 = vst [vmem:[%s10210_s18 + $0x1598] sm:$0xff] %v6073_v43 }
 0x217   : > { %v13294_v41 = vld [vmem:[%s10187_s14 + $0xb70] sm:$0xff]  ;;  %v9948_v47 = vld [vmem:[%s10187_s14 + $0x1358] sm:$0xff]  ;;  %v6097_v52 = vpack.c.bf16 %v9945_v46, %v13219_v4  ;;  %9941 = vst [vmem:[%s10210_s18 + $0x2198] sm:$0xff] %v6081_v44 }
 0x218   : > { %v13306_v48 = vld [vmem:[%s10187_s14 + $0x3370] sm:$0xff]  ;;  %v6105_v53 = vpack.c.bf16 %v9948_v47, %v13222_v5  ;;  %v9951_v54 = vld [vmem:[%s10187_s14 + $0x3b58] sm:$0xff]  ;;  %9944 = vst [vmem:[%s10210_s18 + $0x1a8] sm:$0xff] %v6089_v51 }
 0x219   : > { %v13309_v49 = vld [vmem:[%s10187_s14 + $0x1b70] sm:$0xff]  ;;  %v9954_v55 = vld [vmem:[%s10187_s14 + $0x2358] sm:$0xff]  ;;  %v6113_v60 = vpack.c.bf16 %v9951_v54, %v13234_v12  ;;  %9947 = vst [vmem:[%s10210_s18 + $0xda8] sm:$0xff] %v6097_v52 }
 0x21a   : > { %v13312_v50 = vld [vmem:[%s10187_s14 + $0x370] sm:$0xff]  ;;  %v9957_v56 = vld [vmem:[%s10187_s14 + $0xb58] sm:$0xff]  ;;  %v6121_v61 = vpack.c.bf16 %v9954_v55, %v13237_v13  ;;  %9950 = vst [vmem:[%s10210_s18 + $0x19a8] sm:$0xff] %v6105_v53 }
 0x21b   : > { %v13324_v57 = vld [vmem:[%s10187_s14 + $0x4390] sm:$0xff]  ;;  %v6129_v62 = vpack.c.bf16 %v9957_v56, %v13240_v14  ;;  %v9960_v63 = vld [vmem:[%s10187_s14 + $0x3358] sm:$0xff]  ;;  %9953 = vst [vmem:[%s10210_s18 + $0x5a8] sm:$0xff] %v6113_v60 }
 0x21c   : > { %v13327_v58 = vld [vmem:[%s10187_s14 + $0x2b90] sm:$0xff]  ;;  %v9963_v0 = vld [vmem:[%s10187_s14 + $0x1b58] sm:$0xff]  ;;  %v6137_v5 = vpack.c.bf16 %v9960_v63, %v13252_v21  ;;  %9956 = vst [vmem:[%s10210_s18 + $0x11a8] sm:$0xff] %v6121_v61 }
 0x21d   : > { %v13330_v59 = vld [vmem:[%s10187_s14 + $0x1390] sm:$0xff]  ;;  %v9966_v1 = vld [vmem:[%s10187_s14 + $0x358] sm:$0xff]  ;;  %v6145_v6 = vpack.c.bf16 %v9963_v0, %v13255_v22  ;;  %9959 = vst [vmem:[%s10210_s18 + $0x1da8] sm:$0xff] %v6129_v62 }
 0x21e   : > { %v13342_v2 = vld [vmem:[%s10187_s14 + $0x3b90] sm:$0xff]  ;;  %v6153_v7 = vpack.c.bf16 %v9966_v1, %v13258_v23  ;;  %v9969_v8 = vld [vmem:[%s10187_s14 + $0x4378] sm:$0xff]  ;;  %9962 = vst [vmem:[%s10210_s18 + $0x9a8] sm:$0xff] %v6137_v5 }
 0x21f   : > { %v13345_v3 = vld [vmem:[%s10187_s14 + $0x2390] sm:$0xff]  ;;  %v9972_v9 = vld [vmem:[%s10187_s14 + $0x2b78] sm:$0xff]  ;;  %v6161_v14 = vpack.c.bf16 %v9969_v8, %v13270_v30  ;;  %9965 = vst [vmem:[%s10210_s18 + $0x15a8] sm:$0xff] %v6145_v6 }
 0x220   : > { %v13348_v4 = vld [vmem:[%s10187_s14 + $0xb90] sm:$0xff]  ;;  %v9975_v10 = vld [vmem:[%s10187_s14 + $0x1378] sm:$0xff]  ;;  %v6169_v15 = vpack.c.bf16 %v9972_v9, %v13273_v31  ;;  %9968 = vst [vmem:[%s10210_s18 + $0x21a8] sm:$0xff] %v6153_v7 }
 0x221   : > { %v13360_v11 = vld [vmem:[%s10187_s14 + $0x3390] sm:$0xff]  ;;  %v6177_v16 = vpack.c.bf16 %v9975_v10, %v13276_v32  ;;  %v9978_v17 = vld [vmem:[%s10187_s14 + $0x3b78] sm:$0xff]  ;;  %9971 = vst [vmem:[%s10210_s18 + $0x1b8] sm:$0xff] %v6161_v14 }
 0x222   : > { %v13363_v12 = vld [vmem:[%s10187_s14 + $0x1b90] sm:$0xff]  ;;  %v9981_v18 = vld [vmem:[%s10187_s14 + $0x2378] sm:$0xff]  ;;  %v6185_v23 = vpack.c.bf16 %v9978_v17, %v13288_v39  ;;  %9974 = vst [vmem:[%s10210_s18 + $0xdb8] sm:$0xff] %v6169_v15 }
 0x223   : > { %v13366_v13 = vld [vmem:[%s10187_s14 + $0x390] sm:$0xff]  ;;  %v9984_v19 = vld [vmem:[%s10187_s14 + $0xb78] sm:$0xff]  ;;  %v6193_v24 = vpack.c.bf16 %v9981_v18, %v13291_v40  ;;  %9977 = vst [vmem:[%s10210_s18 + $0x19b8] sm:$0xff] %v6177_v16 }
 0x224   : > { %v13378_v20 = vld [vmem:[%s10187_s14 + $0x43b0] sm:$0xff]  ;;  %v6201_v25 = vpack.c.bf16 %v9984_v19, %v13294_v41  ;;  %v9987_v26 = vld [vmem:[%s10187_s14 + $0x3378] sm:$0xff]  ;;  %9980 = vst [vmem:[%s10210_s18 + $0x5b8] sm:$0xff] %v6185_v23 }
 0x225   : > { %v13381_v21 = vld [vmem:[%s10187_s14 + $0x2bb0] sm:$0xff]  ;;  %v9990_v27 = vld [vmem:[%s10187_s14 + $0x1b78] sm:$0xff]  ;;  %v6209_v32 = vpack.c.bf16 %v9987_v26, %v13306_v48  ;;  %9983 = vst [vmem:[%s10210_s18 + $0x11b8] sm:$0xff] %v6193_v24 }
 0x226   : > { %v13384_v22 = vld [vmem:[%s10187_s14 + $0x13b0] sm:$0xff]  ;;  %v9993_v28 = vld [vmem:[%s10187_s14 + $0x378] sm:$0xff]  ;;  %v6217_v33 = vpack.c.bf16 %v9990_v27, %v13309_v49  ;;  %9986 = vst [vmem:[%s10210_s18 + $0x1db8] sm:$0xff] %v6201_v25 }
 0x227   : > { %v13396_v29 = vld [vmem:[%s10187_s14 + $0x3bb0] sm:$0xff]  ;;  %v6225_v34 = vpack.c.bf16 %v9993_v28, %v13312_v50  ;;  %v9996_v35 = vld [vmem:[%s10187_s14 + $0x4398] sm:$0xff]  ;;  %9989 = vst [vmem:[%s10210_s18 + $0x9b8] sm:$0xff] %v6209_v32 }
 0x228   : > { %v13399_v30 = vld [vmem:[%s10187_s14 + $0x23b0] sm:$0xff]  ;;  %v9999_v36 = vld [vmem:[%s10187_s14 + $0x2b98] sm:$0xff]  ;;  %v6233_v41 = vpack.c.bf16 %v9996_v35, %v13324_v57  ;;  %9992 = vst [vmem:[%s10210_s18 + $0x15b8] sm:$0xff] %v6217_v33 }
 0x229   : > { %v13402_v31 = vld [vmem:[%s10187_s14 + $0xbb0] sm:$0xff]  ;;  %v10002_v37 = vld [vmem:[%s10187_s14 + $0x1398] sm:$0xff]  ;;  %v6241_v42 = vpack.c.bf16 %v9999_v36, %v13327_v58  ;;  %9995 = vst [vmem:[%s10210_s18 + $0x21b8] sm:$0xff] %v6225_v34 }
 0x22a   : > { %v13414_v38 = vld [vmem:[%s10187_s14 + $0x33b0] sm:$0xff]  ;;  %v6249_v43 = vpack.c.bf16 %v10002_v37, %v13330_v59  ;;  %v10005_v44 = vld [vmem:[%s10187_s14 + $0x3b98] sm:$0xff]  ;;  %9998 = vst [vmem:[%s10210_s18 + $0x1c8] sm:$0xff] %v6233_v41 }
 0x22b   : > { %v13417_v39 = vld [vmem:[%s10187_s14 + $0x1bb0] sm:$0xff]  ;;  %v10008_v45 = vld [vmem:[%s10187_s14 + $0x2398] sm:$0xff]  ;;  %v6257_v50 = vpack.c.bf16 %v10005_v44, %v13342_v2  ;;  %10001 = vst [vmem:[%s10210_s18 + $0xdc8] sm:$0xff] %v6241_v42 }
 0x22c   : > { %v13420_v40 = vld [vmem:[%s10187_s14 + $0x3b0] sm:$0xff]  ;;  %v10011_v46 = vld [vmem:[%s10187_s14 + $0xb98] sm:$0xff]  ;;  %v6265_v51 = vpack.c.bf16 %v10008_v45, %v13345_v3  ;;  %10004 = vst [vmem:[%s10210_s18 + $0x19c8] sm:$0xff] %v6249_v43 }
 0x22d   : > { %v13432_v47 = vld [vmem:[%s10187_s14 + $0x43d0] sm:$0xff]  ;;  %v6273_v52 = vpack.c.bf16 %v10011_v46, %v13348_v4  ;;  %v10014_v53 = vld [vmem:[%s10187_s14 + $0x3398] sm:$0xff]  ;;  %10007 = vst [vmem:[%s10210_s18 + $0x5c8] sm:$0xff] %v6257_v50 }
 0x22e   : > { %v13435_v48 = vld [vmem:[%s10187_s14 + $0x2bd0] sm:$0xff]  ;;  %v10017_v54 = vld [vmem:[%s10187_s14 + $0x1b98] sm:$0xff]  ;;  %v6281_v59 = vpack.c.bf16 %v10014_v53, %v13360_v11  ;;  %10010 = vst [vmem:[%s10210_s18 + $0x11c8] sm:$0xff] %v6265_v51 }
 0x22f   : > { %v13438_v49 = vld [vmem:[%s10187_s14 + $0x13d0] sm:$0xff]  ;;  %v10020_v55 = vld [vmem:[%s10187_s14 + $0x398] sm:$0xff]  ;;  %v6289_v60 = vpack.c.bf16 %v10017_v54, %v13363_v12  ;;  %10013 = vst [vmem:[%s10210_s18 + $0x1dc8] sm:$0xff] %v6273_v52 }
 0x230   : > { %v13450_v56 = vld [vmem:[%s10187_s14 + $0x3bd0] sm:$0xff]  ;;  %v6297_v61 = vpack.c.bf16 %v10020_v55, %v13366_v13  ;;  %v10023_v62 = vld [vmem:[%s10187_s14 + $0x43b8] sm:$0xff]  ;;  %10016 = vst [vmem:[%s10210_s18 + $0x9c8] sm:$0xff] %v6281_v59 }
 0x231   : > { %v13453_v57 = vld [vmem:[%s10187_s14 + $0x23d0] sm:$0xff]  ;;  %v10026_v63 = vld [vmem:[%s10187_s14 + $0x2bb8] sm:$0xff]  ;;  %v6305_v4 = vpack.c.bf16 %v10023_v62, %v13378_v20  ;;  %10019 = vst [vmem:[%s10210_s18 + $0x15c8] sm:$0xff] %v6289_v60 }
 0x232   : > { %v13456_v58 = vld [vmem:[%s10187_s14 + $0xbd0] sm:$0xff]  ;;  %v10029_v0 = vld [vmem:[%s10187_s14 + $0x13b8] sm:$0xff]  ;;  %v6313_v5 = vpack.c.bf16 %v10026_v63, %v13381_v21  ;;  %10022 = vst [vmem:[%s10210_s18 + $0x21c8] sm:$0xff] %v6297_v61 }
 0x233   : > { %v13468_v1 = vld [vmem:[%s10187_s14 + $0x33d0] sm:$0xff]  ;;  %v6321_v6 = vpack.c.bf16 %v10029_v0, %v13384_v22  ;;  %v10032_v7 = vld [vmem:[%s10187_s14 + $0x3bb8] sm:$0xff]  ;;  %10025 = vst [vmem:[%s10210_s18 + $0x1d8] sm:$0xff] %v6305_v4 }
 0x234   : > { %v13471_v2 = vld [vmem:[%s10187_s14 + $0x1bd0] sm:$0xff]  ;;  %v10035_v8 = vld [vmem:[%s10187_s14 + $0x23b8] sm:$0xff]  ;;  %v6329_v13 = vpack.c.bf16 %v10032_v7, %v13396_v29  ;;  %10028 = vst [vmem:[%s10210_s18 + $0xdd8] sm:$0xff] %v6313_v5 }
 0x235   : > { %v13474_v3 = vld [vmem:[%s10187_s14 + $0x3d0] sm:$0xff]  ;;  %v10038_v9 = vld [vmem:[%s10187_s14 + $0xbb8] sm:$0xff]  ;;  %v6337_v14 = vpack.c.bf16 %v10035_v8, %v13399_v30  ;;  %10031 = vst [vmem:[%s10210_s18 + $0x19d8] sm:$0xff] %v6321_v6 }
 0x236   : > { %v13486_v10 = vld [vmem:[%s10187_s14 + $0x43f0] sm:$0xff]  ;;  %v6345_v15 = vpack.c.bf16 %v10038_v9, %v13402_v31  ;;  %v10041_v16 = vld [vmem:[%s10187_s14 + $0x33b8] sm:$0xff]  ;;  %10034 = vst [vmem:[%s10210_s18 + $0x5d8] sm:$0xff] %v6329_v13 }
 0x237   : > { %v13489_v11 = vld [vmem:[%s10187_s14 + $0x2bf0] sm:$0xff]  ;;  %v10044_v17 = vld [vmem:[%s10187_s14 + $0x1bb8] sm:$0xff]  ;;  %v6353_v22 = vpack.c.bf16 %v10041_v16, %v13414_v38  ;;  %10037 = vst [vmem:[%s10210_s18 + $0x11d8] sm:$0xff] %v6337_v14 }
 0x238   : > { %v13492_v12 = vld [vmem:[%s10187_s14 + $0x13f0] sm:$0xff]  ;;  %v10047_v18 = vld [vmem:[%s10187_s14 + $0x3b8] sm:$0xff]  ;;  %v6361_v23 = vpack.c.bf16 %v10044_v17, %v13417_v39  ;;  %10040 = vst [vmem:[%s10210_s18 + $0x1dd8] sm:$0xff] %v6345_v15 }
 0x239   : > { %v13504_v19 = vld [vmem:[%s10187_s14 + $0x3bf0] sm:$0xff]  ;;  %v6369_v24 = vpack.c.bf16 %v10047_v18, %v13420_v40  ;;  %v10050_v25 = vld [vmem:[%s10187_s14 + $0x43d8] sm:$0xff]  ;;  %10043 = vst [vmem:[%s10210_s18 + $0x9d8] sm:$0xff] %v6353_v22 }
 0x23a   : > { %v13507_v20 = vld [vmem:[%s10187_s14 + $0x23f0] sm:$0xff]  ;;  %v10053_v26 = vld [vmem:[%s10187_s14 + $0x2bd8] sm:$0xff]  ;;  %v6377_v31 = vpack.c.bf16 %v10050_v25, %v13432_v47  ;;  %10046 = vst [vmem:[%s10210_s18 + $0x15d8] sm:$0xff] %v6361_v23 }
 0x23b   : > { %v13510_v21 = vld [vmem:[%s10187_s14 + $0xbf0] sm:$0xff]  ;;  %v10056_v27 = vld [vmem:[%s10187_s14 + $0x13d8] sm:$0xff]  ;;  %v6385_v32 = vpack.c.bf16 %v10053_v26, %v13435_v48  ;;  %10049 = vst [vmem:[%s10210_s18 + $0x21d8] sm:$0xff] %v6369_v24 }
 0x23c   : > { %v9237_v28 = vld [vmem:[%s10187_s14 + $0x33f0] sm:$0xff]  ;;  %v6393_v33 = vpack.c.bf16 %v10056_v27, %v13438_v49  ;;  %v10059_v34 = vld [vmem:[%s10187_s14 + $0x3bd8] sm:$0xff]  ;;  %10052 = vst [vmem:[%s10210_s18 + $0x1e8] sm:$0xff] %v6377_v31 }
 0x23d   : > { %v9238_v29 = vld [vmem:[%s10187_s14 + $0x1bf0] sm:$0xff]  ;;  %v10062_v35 = vld [vmem:[%s10187_s14 + $0x23d8] sm:$0xff]  ;;  %v6401_v37 = vpack.c.bf16 %v10059_v34, %v13450_v56  ;;  %10055 = vst [vmem:[%s10210_s18 + $0xde8] sm:$0xff] %v6385_v32 }
 0x23e   : > { %v9239_v30 = vld [vmem:[%s10187_s14 + $0x3f0] sm:$0xff]  ;;  %v10065_v36 = vld [vmem:[%s10187_s14 + $0xbd8] sm:$0xff]  ;;  %v6409_v38 = vpack.c.bf16 %v10062_v35, %v13453_v57  ;;  %10058 = vst [vmem:[%s10210_s18 + $0x19e8] sm:$0xff] %v6393_v33 }
 0x23f   : > { %v6417_v39 = vpack.c.bf16 %v10065_v36, %v13456_v58  ;;  %v10068_v40 = vld [vmem:[%s10187_s14 + $0x33d8] sm:$0xff]  ;;  %10061 = vst [vmem:[%s10210_s18 + $0x5e8] sm:$0xff] %v6401_v37 }
 0x240   : > { %v10071_v41 = vld [vmem:[%s10187_s14 + $0x1bd8] sm:$0xff]  ;;  %v6425_v43 = vpack.c.bf16 %v10068_v40, %v13468_v1  ;;  %10064 = vst [vmem:[%s10210_s18 + $0x11e8] sm:$0xff] %v6409_v38 }
 0x241   : > { %v10074_v42 = vld [vmem:[%s10187_s14 + $0x3d8] sm:$0xff]  ;;  %v6433_v44 = vpack.c.bf16 %v10071_v41, %v13471_v2  ;;  %10067 = vst [vmem:[%s10210_s18 + $0x1de8] sm:$0xff] %v6417_v39 }
 0x242   : > { %v6441_v45 = vpack.c.bf16 %v10074_v42, %v13474_v3  ;;  %v10077_v46 = vld [vmem:[%s10187_s14 + $0x43f8] sm:$0xff]  ;;  %10070 = vst [vmem:[%s10210_s18 + $0x9e8] sm:$0xff] %v6425_v43 }
 0x243   : > { %v10080_v47 = vld [vmem:[%s10187_s14 + $0x2bf8] sm:$0xff]  ;;  %v6449_v49 = vpack.c.bf16 %v10077_v46, %v13486_v10  ;;  %10073 = vst [vmem:[%s10210_s18 + $0x15e8] sm:$0xff] %v6433_v44 }
 0x244   : > { %v10083_v48 = vld [vmem:[%s10187_s14 + $0x13f8] sm:$0xff]  ;;  %v6457_v50 = vpack.c.bf16 %v10080_v47, %v13489_v11  ;;  %10076 = vst [vmem:[%s10210_s18 + $0x21e8] sm:$0xff] %v6441_v45 }
 0x245   : > { %v6465_v51 = vpack.c.bf16 %v10083_v48, %v13492_v12  ;;  %v10086_v52 = vld [vmem:[%s10187_s14 + $0x3bf8] sm:$0xff]  ;;  %10079 = vst [vmem:[%s10210_s18 + $0x1f8] sm:$0xff] %v6449_v49 }
 0x246   : > { %v10089_v53 = vld [vmem:[%s10187_s14 + $0x23f8] sm:$0xff]  ;;  %v6473_v55 = vpack.c.bf16 %v10086_v52, %v13504_v19  ;;  %10082 = vst [vmem:[%s10210_s18 + $0xdf8] sm:$0xff] %v6457_v50 }
 0x247   : > { %v10092_v54 = vld [vmem:[%s10187_s14 + $0xbf8] sm:$0xff]  ;;  %v6481_v56 = vpack.c.bf16 %v10089_v53, %v13507_v20  ;;  %10085 = vst [vmem:[%s10210_s18 + $0x19f8] sm:$0xff] %v6465_v51 }
 0x248   : > { %v6489_v57 = vpack.c.bf16 %v10092_v54, %v13510_v21  ;;  %v10095_v58 = vld [vmem:[%s10187_s14 + $0x33f8] sm:$0xff]  ;;  %10088 = vst [vmem:[%s10210_s18 + $0x5f8] sm:$0xff] %v6473_v55 }
 0x249   : > { %v10098_v59 = vld [vmem:[%s10187_s14 + $0x1bf8] sm:$0xff]  ;;  %v6497_v61 = vpack.c.bf16 %v10095_v58, %v9237_v28  ;;  %10091 = vst [vmem:[%s10210_s18 + $0x11f8] sm:$0xff] %v6481_v56 }
 0x24a   : > { %v10101_v60 = vld [vmem:[%s10187_s14 + $0x3f8] sm:$0xff]  ;;  %v6505_v62 = vpack.c.bf16 %v10098_v59, %v9238_v29  ;;  %10094 = vst [vmem:[%s10210_s18 + $0x1df8] sm:$0xff] %v6489_v57 }
 0x24b   : > { %v6513_v63 = vpack.c.bf16 %v10101_v60, %v9239_v30  ;;  %10097 = vst [vmem:[%s10210_s18 + $0x9f8] sm:$0xff] %v6497_v61 }
 0x24c   : > { %10100 = vst [vmem:[%s10210_s18 + $0x15f8] sm:$0xff] %v6505_v62 }
 0x24d   : > { %10103 = vst [vmem:[%s10210_s18 + $0x21f8] sm:$0xff] %v6513_v63 }
 0x24e PF: > { %s7_s8 = sadd.s32 1, %s10154_s8   ;;  %s13589_s6 = smov %s10150_s7 }
 0x24f   : > { %p4_p5 = scmp.ge.s32.totalorder %s7_s8, 4   ;;  %s13590_s7 = smov %s13592_s9 }
 0x251   :  { %6 = sbr.rel (!%p4_p5) target bundleno = 2 (0x2), region = 2919 }

</bundles_post_ra>
